<compile_context>
chip_gen: v5e
topology: v5e:2x2
jax: 0.10.0
libtpu: 0.0.40
codegen_flags: <defaults>
</compile_context>

<pallas_src>
import jax
import jax.numpy as jnp
from jax import lax
from jax.experimental import pallas as pl
from jax.experimental.pallas import tpu as pltpu

BN_EPS = 1e-5
LANES = 128                     # lane width -> channel padding / channel block
MXU_DTYPE = jnp.bfloat16        # MXU input dtype (f32 accumulation)


def _round_up(x, m):
    return ((x + m - 1) // m) * m


def _compiler_params(semantics, est_bytes):
    # est_bytes ~= sum of one set of blocks; x3 covers double buffering + acc.
    vmem = int(min(48 * 2**20, max(3 * est_bytes, 32 * 2**20)))
    return pltpu.CompilerParams(dimension_semantics=semantics,
                                vmem_limit_bytes=vmem)


# ---------------------------------------------------------------------------
# Kernel 1: conv3x3 (per-tap matmuls) + per-channel sum / sumsq accumulation
# ---------------------------------------------------------------------------
def _conv3x3_bn_stats(x_phases, w9, *, Ho, Wo, stride):
    """x_phases: (N, stride^2 * Hq, Wq, Cin_pad)  polyphase-split padded input.
       w9:       (9, Cin_pad, Cout_pad)           tap-major weights.
       Returns   y:    (N, Ho*Wo, Cout_pad) f32   pre-BN conv output,
                 ssum: (1, Cout_pad) f32          per-channel sum over N*Ho*Wo,
                 ssq:  (1, Cout_pad) f32          per-channel sum of squares."""
    N, SHq, Wq, C = x_phases.shape
    Hq = Ho + 2 // stride
    assert SHq == stride * stride * Hq
    Cout_p = w9.shape[2]
    CB = LANES
    J = Cout_p // CB
    M = Ho * Wo

    def kernel(xp_ref, w_ref, y_ref, ssum_ref, ssq_ref):
        n = pl.program_id(1)
        acc = jnp.zeros((M, CB), jnp.float32)
        # 9 taps, each a lane-dense (M, C) @ (C, CB) MXU matmul, f32 accumulate.
        for dy in range(3):
            for dx in range(3):
                ph = (dy % stride) * stride + (dx % stride)   # polyphase plane
                r0 = ph * Hq + dy // stride
                c0 = dx // stride
                xs = xp_ref[0, r0:r0 + Ho, c0:c0 + Wo, :]      # (Ho, Wo, C)
                acc = acc + jnp.dot(xs.reshape(M, C),
                                    w_ref[dy * 3 + dx],
                                    preferred_element_type=jnp.float32)
        y_ref[...] = acc[None]

        # Global BN batch stats: accumulate sum / sumsq across the batch axis
        # in the resident (1, CB) output blocks.
        @pl.when(n == 0)
        def _init():
            ssum_ref[...] = jnp.zeros_like(ssum_ref)
            ssq_ref[...] = jnp.zeros_like(ssq_ref)

        ssum_ref[...] += jnp.sum(acc, axis=0, keepdims=True)
        ssq_ref[...] += jnp.sum(acc * acc, axis=0, keepdims=True)

    est = (SHq * Wq * C * x_phases.dtype.itemsize          # input block
           + 9 * C * CB * w9.dtype.itemsize                # resident weights
           + 2 * M * CB * 4 + 2 * CB * 4)                  # y block + acc + stats
    return pl.pallas_call(
        kernel,
        out_shape=(jax.ShapeDtypeStruct((N, M, Cout_p), jnp.float32),
                   jax.ShapeDtypeStruct((1, Cout_p), jnp.float32),
                   jax.ShapeDtypeStruct((1, Cout_p), jnp.float32)),
        grid=(J, N),
        in_specs=[pl.BlockSpec((1, SHq, Wq, C), lambda j, n: (n, 0, 0, 0)),
                  pl.BlockSpec((9, C, CB), lambda j, n: (0, 0, j))],
        out_specs=(pl.BlockSpec((1, M, CB), lambda j, n: (n, 0, j)),
                   pl.BlockSpec((1, CB), lambda j, n: (0, j)),
                   pl.BlockSpec((1, CB), lambda j, n: (0, j))),
        compiler_params=_compiler_params(("parallel", "arbitrary"), est),
    )(x_phases, w9)


# ---------------------------------------------------------------------------
# Kernel 2: folded BN affine + ReLU (lane-dense elementwise epilogue)
#   pad_out=True additionally emits the spatially zero-padded NHWC activation
#   (N, Ho+2, Wo+2, C) so the next conv consumes it directly (no XLA pad pass).
# ---------------------------------------------------------------------------
def _affine_relu(y3, scale, shift, out_dtype, *, Ho, Wo, pad_out):
    """y3: (N, Ho*Wo, Cout_pad) f32; scale/shift: (1, Cout_pad) f32."""
    N, M, Cout_p = y3.shape
    assert M == Ho * Wo
    CB = LANES
    J = Cout_p // CB
    out_isize = jnp.dtype(out_dtype).itemsize

    if pad_out:
        Hq, Wq = Ho + 2, Wo + 2

        def kernel(y_ref, sc_ref, sh_ref, o_ref):
            # Zero the whole padded block, then store the interior window.
            o_ref[...] = jnp.zeros_like(o_ref)
            v = jnp.maximum(y_ref[0] * sc_ref[...] + sh_ref[...], 0.0)
            o_ref[0, 1:1 + Ho, 1:1 + Wo, :] = (
                v.reshape(Ho, Wo, CB).astype(o_ref.dtype))

        out_shape = jax.ShapeDtypeStruct((N, Hq, Wq, Cout_p), out_dtype)
        out_spec = pl.BlockSpec((1, Hq, Wq, CB), lambda n, j: (n, 0, 0, j))
        est = M * CB * 4 + 2 * CB * 4 + Hq * Wq * CB * out_isize
    else:
        def kernel(y_ref, sc_ref, sh_ref, o_ref):
            o_ref[...] = jnp.maximum(
                y_ref[...] * sc_ref[...] + sh_ref[...], 0.0).astype(o_ref.dtype)

        out_shape = jax.ShapeDtypeStruct((N, M, Cout_p), out_dtype)
        out_spec = pl.BlockSpec((1, M, CB), lambda n, j: (n, 0, j))
        est = M * CB * 4 + 2 * CB * 4 + M * CB * out_isize

    return pl.pallas_call(
        kernel,
        out_shape=out_shape,
        grid=(N, J),
        in_specs=[pl.BlockSpec((1, M, CB), lambda n, j: (n, 0, j)),
                  pl.BlockSpec((1, CB), lambda n, j: (0, j)),
                  pl.BlockSpec((1, CB), lambda n, j: (0, j))],
        out_specs=out_spec,
        compiler_params=_compiler_params(("parallel", "parallel"), est),
    )(y3, scale, shift)


# ---------------------------------------------------------------------------
# Glue (plain JAX): layout / padding / per-channel scale-shift
# ---------------------------------------------------------------------------
def _pad_phase_cast(x_nhwc, stride, Ho, Wo, C_pad):
    """Zero-pad (spatial pad=1 + channel pad to C_pad), cast to MXU dtype and
    polyphase-split so in-kernel tap windows are contiguous slices.
    Returns (N, stride^2 * Hq, Wq, C_pad)."""
    N, H, W, C = x_nhwc.shape
    ext = 2 // stride
    Hq, Wq = Ho + ext, Wo + ext
    Hp, Wp = stride * Hq, stride * Wq
    xp = jnp.pad(x_nhwc, ((0, 0), (1, Hp - H - 1), (1, Wp - W - 1),
                          (0, C_pad - C))).astype(MXU_DTYPE)
    if stride == 1:
        return xp
    xp = xp.reshape(N, Hq, stride, Wq, stride, C_pad)
    xp = jnp.transpose(xp, (0, 2, 4, 1, 3, 5))        # (N, p, q, Hq, Wq, C)
    return xp.reshape(N, stride * stride * Hq, Wq, C_pad)


def _prep_weight(w_oihw, Cin_p, Cout_p):
    Cout, Cin, _, _ = w_oihw.shape
    w = jnp.transpose(w_oihw, (2, 3, 1, 0)).reshape(9, Cin, Cout)
    w = jnp.pad(w, ((0, 0), (0, Cin_p - Cin), (0, Cout_p - Cout)))
    return w.astype(MXU_DTYPE)


def _bn_scale_shift(ssum, ssq, gamma, beta, count, Cout_p):
    """Fold train-mode BN (biased var) into one per-channel scale/shift (f32).
    Padded channels have gamma=beta=0 -> scale=shift=0 -> stay exactly zero."""
    mean = ssum / count
    var = jnp.maximum(ssq / count - mean * mean, 0.0)
    g = jnp.pad(gamma.astype(jnp.float32),
                (0, Cout_p - gamma.shape[0])).reshape(1, Cout_p)
    b = jnp.pad(beta.astype(jnp.float32),
                (0, Cout_p - beta.shape[0])).reshape(1, Cout_p)
    inv = lax.rsqrt(var + BN_EPS)
    scale = g * inv
    shift = b - mean * scale
    return scale, shift


# ---------------------------------------------------------------------------
# BaseBlock forward (NCHW in / NCHW out, like the PyTorch module)
# ---------------------------------------------------------------------------
def base_block_forward(x_nchw, params):
    w1, g1, b1, w2, g2, b2 = params
    N, Cin, H, W = x_nchw.shape
    Cout = w1.shape[0]
    stride = 2 if Cin != Cout else 1
    Cin_p = _round_up(Cin, LANES)
    Cout_p = _round_up(Cout, LANES)
    Ho = (H - 1) // stride + 1
    Wo = (W - 1) // stride + 1
    M = N * Ho * Wo

    x = jnp.transpose(x_nchw, (0, 2, 3, 1)).astype(jnp.float32)   # NCHW -> NHWC

    # ----- layer 1: conv(stride) + BN(batch stats) + ReLU ------------------
    xph = _pad_phase_cast(x, stride, Ho, Wo, Cin_p)
    y1, s1, q1 = _conv3x3_bn_stats(xph, _prep_weight(w1, Cin_p, Cout_p),
                                   Ho=Ho, Wo=Wo, stride=stride)
    sc1, sh1 = _bn_scale_shift(s1, q1, g1, b1, M, Cout_p)
    # Epilogue writes the spatially zero-padded bf16 activation directly
    # (feeds layer-2's conv without an extra XLA pad pass over HBM).
    x2 = _affine_relu(y1, sc1, sh1, MXU_DTYPE, Ho=Ho, Wo=Wo, pad_out=True)

    # ----- layer 2: conv(stride=1) + BN + ReLU ------------------------------
    y2, s2, q2 = _conv3x3_bn_stats(x2, _prep_weight(w2, Cout_p, Cout_p),
                                   Ho=Ho, Wo=Wo, stride=1)
    sc2, sh2 = _bn_scale_shift(s2, q2, g2, b2, M, Cout_p)
    out = _affine_relu(y2, sc2, sh2, jnp.float32, Ho=Ho, Wo=Wo, pad_out=False)

    out = out.reshape(N, Ho, Wo, Cout_p)[..., :Cout]
    return jnp.transpose(out, (0, 3, 1, 2))            # NHWC -> NCHW


# ---------------------------------------------------------------------------
# Pure-JAX reference (matmul_dtype=f32: true semantics;
#                     matmul_dtype=bf16: matches the kernel's MXU rounding)
# ---------------------------------------------------------------------------
def base_block_reference(x_nchw, params, matmul_dtype=jnp.float32):
    w1, g1, b1, w2, g2, b2 = params
    Cin = x_nchw.shape[1]
    Cout = w1.shape[0]
    stride = 2 if Cin != Cout else 1

    def conv(x_nhwc, w_oihw, s):
        w_hwio = jnp.transpose(w_oihw, (2, 3, 1, 0)).astype(matmul_dtype)
        return lax.conv_general_dilated(
            x_nhwc.astype(matmul_dtype), w_hwio, (s, s), ((1, 1), (1, 1)),
            dimension_numbers=("NHWC", "HWIO", "NHWC"),
            preferred_element_type=jnp.float32)

    def bn_relu(y, g, b):
        mean = jnp.mean(y, axis=(0, 1, 2), keepdims=True)
        var = jnp.mean((y - mean) ** 2, axis=(0, 1, 2), keepdims=True)
        return jnp.maximum((y - mean) * lax.rsqrt(var + BN_EPS) * g + b, 0.0)

    x = jnp.transpose(x_nchw, (0, 2, 3, 1)).astype(jnp.float32)
    y = bn_relu(conv(x, w1, stride), g1, b1)
    y = bn_relu(conv(y, w2, 1), g2, b2)
    return jnp.transpose(y, (0, 3, 1, 2))


# ---------------------------------------------------------------------------
# Deterministic parameter init (shapes from BaseBlock.__init__)
# ---------------------------------------------------------------------------
def init_params(key, in_channels, out_channels):
    k1, k2 = jax.random.split(key)
    w1 = 0.1 * jax.random.normal(k1, (out_channels, in_channels, 3, 3), jnp.float32)
    w2 = 0.1 * jax.random.normal(k2, (out_channels, out_channels, 3, 3), jnp.float32)
    g1 = jnp.ones((out_channels,), jnp.float32)
    b1 = jnp.zeros((out_channels,), jnp.float32)
    g2 = jnp.ones((out_channels,), jnp.float32)
    b2 = jnp.zeros((out_channels,), jnp.float32)
    return (w1, g1, b1, w2, g2, b2)


if __name__ == "__main__":
    key = jax.random.PRNGKey(0)
    kx, kp = jax.random.split(key)

    N, Cin, Cout, H, W = 2, 4, 8, 16, 16     # Cin != Cout -> stride-2 path
    x = jax.random.normal(kx, (N, Cin, H, W), jnp.float32)
    params = init_params(kp, Cin, Cout)

    forward = jax.jit(base_block_forward)
    out = jax.block_until_ready(forward(x, params))
    assert out.shape == (N, Cout, H // 2, W // 2), out.shape

    # Tight check vs. a reference that uses the same bf16 MXU input rounding
    # (only accumulation order differs -> ~1e-5 level).
    ref_mx = jax.block_until_ready(base_block_reference(x, params, MXU_DTYPE))
    err_tight = float(jnp.max(jnp.abs(out - ref_mx)))
    assert jnp.allclose(out, ref_mx, rtol=2e-3, atol=2e-3), err_tight

    # Sanity check vs. the full-f32 reference: bf16 MXU inputs cost roughly
    # 1e-2 absolute on the (unit-variance, post-BN) outputs.
    ref_f32 = jax.block_until_ready(base_block_reference(x, params, jnp.float32))
    err_loose = float(jnp.max(jnp.abs(out - ref_f32)))
    assert jnp.allclose(out, ref_f32, rtol=5e-2, atol=5e-2), err_loose

    print("KERNEL_OK")
</pallas_src>

<mosaic_0001>
module attributes {stable_mosaic.version = 11 : i64} {
  func.func @kernel(%arg0: i32, %arg1: i32, %arg2: memref<1x36x9x128xbf16, #tpu.memory_space<vmem>>, %arg3: memref<9x128x128xbf16, #tpu.memory_space<vmem>>, %arg4: memref<1x64x128xf32, #tpu.memory_space<vmem>>, %arg5: memref<1x128xf32, #tpu.memory_space<vmem>>, %arg6: memref<1x128xf32, #tpu.memory_space<vmem>>) attributes {dimension_semantics = [#tpu.dimension_semantics<parallel>, #tpu.dimension_semantics<arbitrary>], iteration_bounds = array<i64: 1, 2>, scalar_prefetch = 0 : i64, scratch_operands = 0 : i64, tpu.core_type = #tpu.core_type<tc>, window_params = [{transform_indices = @transform_0, window_bounds = array<i64: 1, 36, 9, 128>}, {transform_indices = @transform_1, window_bounds = array<i64: 9, 128, 128>}, {transform_indices = @transform_2, window_bounds = array<i64: 1, 64, 128>}, {transform_indices = @transform_3, window_bounds = array<i64: 1, 128>}, {transform_indices = @transform_4, window_bounds = array<i64: 1, 128>}]} {
    %cst = arith.constant 0.000000e+00 : f32
    %0 = vector.broadcast %cst : f32 to vector<64x128xf32>
    %c0 = arith.constant 0 : index
    %c0_0 = arith.constant 0 : index
    %c0_1 = arith.constant 0 : index
    %c0_2 = arith.constant 0 : index
    %1 = vector.load %arg2[%c0, %c0_0, %c0_1, %c0_2] : memref<1x36x9x128xbf16, #tpu.memory_space<vmem>>, vector<1x8x8x128xbf16>
    %2 = vector.shape_cast %1 : vector<1x8x8x128xbf16> to vector<8x8x128xbf16>
    %3 = vector.shape_cast %2 : vector<8x8x128xbf16> to vector<64x128xbf16>
    %c0_3 = arith.constant 0 : index
    %c0_4 = arith.constant 0 : index
    %c0_5 = arith.constant 0 : index
    %4 = vector.load %arg3[%c0_3, %c0_4, %c0_5] : memref<9x128x128xbf16, #tpu.memory_space<vmem>>, vector<1x128x128xbf16>
    %5 = vector.shape_cast %4 : vector<1x128x128xbf16> to vector<128x128xbf16>
    %cst_6 = arith.constant dense<0.000000e+00> : vector<64x128xf32>
    %6 = tpu.matmul %3, %5, %cst_6 {dimension_numbers = #tpu.dot_dimension_numbers<[1], [0], [0], [1], [0, 0, 1, 1], [], []>} : vector<64x128xbf16>, vector<128x128xbf16>, vector<64x128xf32> -> vector<64x128xf32>
    %7 = arith.addf %0, %6 : vector<64x128xf32>
    %c0_7 = arith.constant 0 : index
    %c9 = arith.constant 9 : index
    %c0_8 = arith.constant 0 : index
    %c0_9 = arith.constant 0 : index
    %8 = vector.load %arg2[%c0_7, %c9, %c0_8, %c0_9] : memref<1x36x9x128xbf16, #tpu.memory_space<vmem>>, vector<1x8x8x128xbf16>
    %9 = vector.shape_cast %8 : vector<1x8x8x128xbf16> to vector<8x8x128xbf16>
    %10 = vector.shape_cast %9 : vector<8x8x128xbf16> to vector<64x128xbf16>
    %c1 = arith.constant 1 : index
    %c0_10 = arith.constant 0 : index
    %c0_11 = arith.constant 0 : index
    %11 = vector.load %arg3[%c1, %c0_10, %c0_11] : memref<9x128x128xbf16, #tpu.memory_space<vmem>>, vector<1x128x128xbf16>
    %12 = vector.shape_cast %11 : vector<1x128x128xbf16> to vector<128x128xbf16>
    %cst_12 = arith.constant dense<0.000000e+00> : vector<64x128xf32>
    %13 = tpu.matmul %10, %12, %cst_12 {dimension_numbers = #tpu.dot_dimension_numbers<[1], [0], [0], [1], [0, 0, 1, 1], [], []>} : vector<64x128xbf16>, vector<128x128xbf16>, vector<64x128xf32> -> vector<64x128xf32>
    %14 = arith.addf %7, %13 : vector<64x128xf32>
    %c0_13 = arith.constant 0 : index
    %c0_14 = arith.constant 0 : index
    %c1_15 = arith.constant 1 : index
    %c0_16 = arith.constant 0 : index
    %15 = vector.load %arg2[%c0_13, %c0_14, %c1_15, %c0_16] : memref<1x36x9x128xbf16, #tpu.memory_space<vmem>>, vector<1x8x8x128xbf16>
    %16 = vector.shape_cast %15 : vector<1x8x8x128xbf16> to vector<8x8x128xbf16>
    %17 = vector.shape_cast %16 : vector<8x8x128xbf16> to vector<64x128xbf16>
    %c2 = arith.constant 2 : index
    %c0_17 = arith.constant 0 : index
    %c0_18 = arith.constant 0 : index
    %18 = vector.load %arg3[%c2, %c0_17, %c0_18] : memref<9x128x128xbf16, #tpu.memory_space<vmem>>, vector<1x128x128xbf16>
    %19 = vector.shape_cast %18 : vector<1x128x128xbf16> to vector<128x128xbf16>
    %cst_19 = arith.constant dense<0.000000e+00> : vector<64x128xf32>
    %20 = tpu.matmul %17, %19, %cst_19 {dimension_numbers = #tpu.dot_dimension_numbers<[1], [0], [0], [1], [0, 0, 1, 1], [], []>} : vector<64x128xbf16>, vector<128x128xbf16>, vector<64x128xf32> -> vector<64x128xf32>
    %21 = arith.addf %14, %20 : vector<64x128xf32>
    %c0_20 = arith.constant 0 : index
    %c18 = arith.constant 18 : index
    %c0_21 = arith.constant 0 : index
    %c0_22 = arith.constant 0 : index
    %22 = vector.load %arg2[%c0_20, %c18, %c0_21, %c0_22] : memref<1x36x9x128xbf16, #tpu.memory_space<vmem>>, vector<1x8x8x128xbf16>
    %23 = vector.shape_cast %22 : vector<1x8x8x128xbf16> to vector<8x8x128xbf16>
    %24 = vector.shape_cast %23 : vector<8x8x128xbf16> to vector<64x128xbf16>
    %c3 = arith.constant 3 : index
    %c0_23 = arith.constant 0 : index
    %c0_24 = arith.constant 0 : index
    %25 = vector.load %arg3[%c3, %c0_23, %c0_24] : memref<9x128x128xbf16, #tpu.memory_space<vmem>>, vector<1x128x128xbf16>
    %26 = vector.shape_cast %25 : vector<1x128x128xbf16> to vector<128x128xbf16>
    %cst_25 = arith.constant dense<0.000000e+00> : vector<64x128xf32>
    %27 = tpu.matmul %24, %26, %cst_25 {dimension_numbers = #tpu.dot_dimension_numbers<[1], [0], [0], [1], [0, 0, 1, 1], [], []>} : vector<64x128xbf16>, vector<128x128xbf16>, vector<64x128xf32> -> vector<64x128xf32>
    %28 = arith.addf %21, %27 : vector<64x128xf32>
    %c0_26 = arith.constant 0 : index
    %c27 = arith.constant 27 : index
    %c0_27 = arith.constant 0 : index
    %c0_28 = arith.constant 0 : index
    %29 = vector.load %arg2[%c0_26, %c27, %c0_27, %c0_28] : memref<1x36x9x128xbf16, #tpu.memory_space<vmem>>, vector<1x8x8x128xbf16>
    %30 = vector.shape_cast %29 : vector<1x8x8x128xbf16> to vector<8x8x128xbf16>
    %31 = vector.shape_cast %30 : vector<8x8x128xbf16> to vector<64x128xbf16>
    %c4 = arith.constant 4 : index
    %c0_29 = arith.constant 0 : index
    %c0_30 = arith.constant 0 : index
    %32 = vector.load %arg3[%c4, %c0_29, %c0_30] : memref<9x128x128xbf16, #tpu.memory_space<vmem>>, vector<1x128x128xbf16>
    %33 = vector.shape_cast %32 : vector<1x128x128xbf16> to vector<128x128xbf16>
    %cst_31 = arith.constant dense<0.000000e+00> : vector<64x128xf32>
    %34 = tpu.matmul %31, %33, %cst_31 {dimension_numbers = #tpu.dot_dimension_numbers<[1], [0], [0], [1], [0, 0, 1, 1], [], []>} : vector<64x128xbf16>, vector<128x128xbf16>, vector<64x128xf32> -> vector<64x128xf32>
    %35 = arith.addf %28, %34 : vector<64x128xf32>
    %c0_32 = arith.constant 0 : index
    %c18_33 = arith.constant 18 : index
    %c1_34 = arith.constant 1 : index
    %c0_35 = arith.constant 0 : index
    %36 = vector.load %arg2[%c0_32, %c18_33, %c1_34, %c0_35] : memref<1x36x9x128xbf16, #tpu.memory_space<vmem>>, vector<1x8x8x128xbf16>
    %37 = vector.shape_cast %36 : vector<1x8x8x128xbf16> to vector<8x8x128xbf16>
    %38 = vector.shape_cast %37 : vector<8x8x128xbf16> to vector<64x128xbf16>
    %c5 = arith.constant 5 : index
    %c0_36 = arith.constant 0 : index
    %c0_37 = arith.constant 0 : index
    %39 = vector.load %arg3[%c5, %c0_36, %c0_37] : memref<9x128x128xbf16, #tpu.memory_space<vmem>>, vector<1x128x128xbf16>
    %40 = vector.shape_cast %39 : vector<1x128x128xbf16> to vector<128x128xbf16>
    %cst_38 = arith.constant dense<0.000000e+00> : vector<64x128xf32>
    %41 = tpu.matmul %38, %40, %cst_38 {dimension_numbers = #tpu.dot_dimension_numbers<[1], [0], [0], [1], [0, 0, 1, 1], [], []>} : vector<64x128xbf16>, vector<128x128xbf16>, vector<64x128xf32> -> vector<64x128xf32>
    %42 = arith.addf %35, %41 : vector<64x128xf32>
    %c0_39 = arith.constant 0 : index
    %c1_40 = arith.constant 1 : index
    %c0_41 = arith.constant 0 : index
    %c0_42 = arith.constant 0 : index
    %43 = vector.load %arg2[%c0_39, %c1_40, %c0_41, %c0_42] : memref<1x36x9x128xbf16, #tpu.memory_space<vmem>>, vector<1x8x8x128xbf16>
    %44 = vector.shape_cast %43 : vector<1x8x8x128xbf16> to vector<8x8x128xbf16>
    %45 = vector.shape_cast %44 : vector<8x8x128xbf16> to vector<64x128xbf16>
    %c6 = arith.constant 6 : index
    %c0_43 = arith.constant 0 : index
    %c0_44 = arith.constant 0 : index
    %46 = vector.load %arg3[%c6, %c0_43, %c0_44] : memref<9x128x128xbf16, #tpu.memory_space<vmem>>, vector<1x128x128xbf16>
    %47 = vector.shape_cast %46 : vector<1x128x128xbf16> to vector<128x128xbf16>
    %cst_45 = arith.constant dense<0.000000e+00> : vector<64x128xf32>
    %48 = tpu.matmul %45, %47, %cst_45 {dimension_numbers = #tpu.dot_dimension_numbers<[1], [0], [0], [1], [0, 0, 1, 1], [], []>} : vector<64x128xbf16>, vector<128x128xbf16>, vector<64x128xf32> -> vector<64x128xf32>
    %49 = arith.addf %42, %48 : vector<64x128xf32>
    %c0_46 = arith.constant 0 : index
    %c10 = arith.constant 10 : index
    %c0_47 = arith.constant 0 : index
    %c0_48 = arith.constant 0 : index
    %50 = vector.load %arg2[%c0_46, %c10, %c0_47, %c0_48] : memref<1x36x9x128xbf16, #tpu.memory_space<vmem>>, vector<1x8x8x128xbf16>
    %51 = vector.shape_cast %50 : vector<1x8x8x128xbf16> to vector<8x8x128xbf16>
    %52 = vector.shape_cast %51 : vector<8x8x128xbf16> to vector<64x128xbf16>
    %c7 = arith.constant 7 : index
    %c0_49 = arith.constant 0 : index
    %c0_50 = arith.constant 0 : index
    %53 = vector.load %arg3[%c7, %c0_49, %c0_50] : memref<9x128x128xbf16, #tpu.memory_space<vmem>>, vector<1x128x128xbf16>
    %54 = vector.shape_cast %53 : vector<1x128x128xbf16> to vector<128x128xbf16>
    %cst_51 = arith.constant dense<0.000000e+00> : vector<64x128xf32>
    %55 = tpu.matmul %52, %54, %cst_51 {dimension_numbers = #tpu.dot_dimension_numbers<[1], [0], [0], [1], [0, 0, 1, 1], [], []>} : vector<64x128xbf16>, vector<128x128xbf16>, vector<64x128xf32> -> vector<64x128xf32>
    %56 = arith.addf %49, %55 : vector<64x128xf32>
    %c0_52 = arith.constant 0 : index
    %c1_53 = arith.constant 1 : index
    %c1_54 = arith.constant 1 : index
    %c0_55 = arith.constant 0 : index
    %57 = vector.load %arg2[%c0_52, %c1_53, %c1_54, %c0_55] : memref<1x36x9x128xbf16, #tpu.memory_space<vmem>>, vector<1x8x8x128xbf16>
    %58 = vector.shape_cast %57 : vector<1x8x8x128xbf16> to vector<8x8x128xbf16>
    %59 = vector.shape_cast %58 : vector<8x8x128xbf16> to vector<64x128xbf16>
    %c8 = arith.constant 8 : index
    %c0_56 = arith.constant 0 : index
    %c0_57 = arith.constant 0 : index
    %60 = vector.load %arg3[%c8, %c0_56, %c0_57] : memref<9x128x128xbf16, #tpu.memory_space<vmem>>, vector<1x128x128xbf16>
    %61 = vector.shape_cast %60 : vector<1x128x128xbf16> to vector<128x128xbf16>
    %cst_58 = arith.constant dense<0.000000e+00> : vector<64x128xf32>
    %62 = tpu.matmul %59, %61, %cst_58 {dimension_numbers = #tpu.dot_dimension_numbers<[1], [0], [0], [1], [0, 0, 1, 1], [], []>} : vector<64x128xbf16>, vector<128x128xbf16>, vector<64x128xf32> -> vector<64x128xf32>
    %63 = arith.addf %56, %62 : vector<64x128xf32>
    %64 = vector.shape_cast %63 : vector<64x128xf32> to vector<1x64x128xf32>
    %c0_59 = arith.constant 0 : index
    %c0_60 = arith.constant 0 : index
    %c0_61 = arith.constant 0 : index
    %65 = vector.load %arg4[%c0_59, %c0_60, %c0_61] : memref<1x64x128xf32, #tpu.memory_space<vmem>>, vector<1x64x128xf32>
    tpu.vector_store %arg4[%c0_59, %c0_60, %c0_61], %64 {strides = array<i32>} : memref<1x64x128xf32, #tpu.memory_space<vmem>>, vector<1x64x128xf32>,
    %c0_i32 = arith.constant 0 : i32
    %66 = arith.cmpi eq, %arg1, %c0_i32 : i32
    %67 = arith.extui %66 : i1 to i32
    %c0_i32_62 = arith.constant 0 : i32
    %68 = arith.cmpi ne, %67, %c0_i32_62 : i32
    scf.if %68 {
      %cst_73 = arith.constant 0.000000e+00 : f32
      %80 = vector.broadcast %cst_73 : f32 to vector<1x128xf32>
      %c0_74 = arith.constant 0 : index
      %c0_75 = arith.constant 0 : index
      %81 = vector.load %arg5[%c0_74, %c0_75] : memref<1x128xf32, #tpu.memory_space<vmem>>, vector<1x128xf32>
      tpu.vector_store %arg5[%c0_74, %c0_75], %80 {strides = array<i32>} : memref<1x128xf32, #tpu.memory_space<vmem>>, vector<1x128xf32>,
      %cst_76 = arith.constant 0.000000e+00 : f32
      %82 = vector.broadcast %cst_76 : f32 to vector<1x128xf32>
      %c0_77 = arith.constant 0 : index
      %c0_78 = arith.constant 0 : index
      %83 = vector.load %arg6[%c0_77, %c0_78] : memref<1x128xf32, #tpu.memory_space<vmem>>, vector<1x128xf32>
      tpu.vector_store %arg6[%c0_77, %c0_78], %82 {strides = array<i32>} : memref<1x128xf32, #tpu.memory_space<vmem>>, vector<1x128xf32>,
    } else {
    }
    %c0_63 = arith.constant 0 : index
    %c0_64 = arith.constant 0 : index
    %69 = vector.load %arg5[%c0_63, %c0_64] : memref<1x128xf32, #tpu.memory_space<vmem>>, vector<1x128xf32>
    %cst_65 = arith.constant dense<0.000000e+00> : vector<128xf32>
    %70 = vector.multi_reduction <add>, %63, %cst_65 [0] : vector<64x128xf32> to vector<128xf32>
    %71 = vector.shape_cast %70 : vector<128xf32> to vector<1x128xf32>
    %72 = arith.addf %69, %71 : vector<1x128xf32>
    %c0_66 = arith.constant 0 : index
    %c0_67 = arith.constant 0 : index
    %73 = vector.load %arg5[%c0_66, %c0_67] : memref<1x128xf32, #tpu.memory_space<vmem>>, vector<1x128xf32>
    tpu.vector_store %arg5[%c0_66, %c0_67], %72 {strides = array<i32>} : memref<1x128xf32, #tpu.memory_space<vmem>>, vector<1x128xf32>,
    %c0_68 = arith.constant 0 : index
    %c0_69 = arith.constant 0 : index
    %74 = vector.load %arg6[%c0_68, %c0_69] : memref<1x128xf32, #tpu.memory_space<vmem>>, vector<1x128xf32>
    %75 = arith.mulf %63, %63 : vector<64x128xf32>
    %cst_70 = arith.constant dense<0.000000e+00> : vector<128xf32>
    %76 = vector.multi_reduction <add>, %75, %cst_70 [0] : vector<64x128xf32> to vector<128xf32>
    %77 = vector.shape_cast %76 : vector<128xf32> to vector<1x128xf32>
    %78 = arith.addf %74, %77 : vector<1x128xf32>
    %c0_71 = arith.constant 0 : index
    %c0_72 = arith.constant 0 : index
    %79 = vector.load %arg6[%c0_71, %c0_72] : memref<1x128xf32, #tpu.memory_space<vmem>>, vector<1x128xf32>
    tpu.vector_store %arg6[%c0_71, %c0_72], %78 {strides = array<i32>} : memref<1x128xf32, #tpu.memory_space<vmem>>, vector<1x128xf32>,
    return
  }
  func.func @transform_0(%arg0: i32, %arg1: i32) -> (i32, i32, i32, i32) {
    %c0_i32 = arith.constant 0 : i32
    %c0_i32_0 = arith.constant 0 : i32
    %c0_i32_1 = arith.constant 0 : i32
    %c0_i32_2 = arith.constant 0 : i32
    return %arg1, %c0_i32, %c0_i32_0, %c0_i32_1 : i32, i32, i32, i32
  }
  func.func @transform_1(%arg0: i32, %arg1: i32) -> (i32, i32, i32) {
    %c0_i32 = arith.constant 0 : i32
    %c0_i32_0 = arith.constant 0 : i32
    %c0_i32_1 = arith.constant 0 : i32
    return %c0_i32, %c0_i32_0, %arg0 : i32, i32, i32
  }
  func.func @transform_2(%arg0: i32, %arg1: i32) -> (i32, i32, i32) {
    %c0_i32 = arith.constant 0 : i32
    %c0_i32_0 = arith.constant 0 : i32
    return %arg1, %c0_i32, %arg0 : i32, i32, i32
  }
  func.func @transform_3(%arg0: i32, %arg1: i32) -> (i32, i32) {
    %c0_i32 = arith.constant 0 : i32
    %c0_i32_0 = arith.constant 0 : i32
    return %c0_i32, %arg0 : i32, i32
  }
  func.func @transform_4(%arg0: i32, %arg1: i32) -> (i32, i32) {
    %c0_i32 = arith.constant 0 : i32
    %c0_i32_0 = arith.constant 0 : i32
    return %c0_i32, %arg0 : i32, i32
  }
}

module attributes {stable_mosaic.version = 11 : i64} {
  func.func @kernel(%arg0: i32, %arg1: i32, %arg2: memref<1x64x128xf32, #tpu.memory_space<vmem>>, %arg3: memref<1x128xf32, #tpu.memory_space<vmem>>, %arg4: memref<1x128xf32, #tpu.memory_space<vmem>>, %arg5: memref<1x10x10x128xbf16, #tpu.memory_space<vmem>>) attributes {dimension_semantics = [#tpu.dimension_semantics<parallel>, #tpu.dimension_semantics<parallel>], iteration_bounds = array<i64: 2, 1>, scalar_prefetch = 0 : i64, scratch_operands = 0 : i64, tpu.core_type = #tpu.core_type<tc>, window_params = [{transform_indices = @transform_0, window_bounds = array<i64: 1, 64, 128>}, {transform_indices = @transform_1, window_bounds = array<i64: 1, 128>}, {transform_indices = @transform_2, window_bounds = array<i64: 1, 128>}, {transform_indices = @transform_3, window_bounds = array<i64: 1, 10, 10, 128>}]} {
    %cst = arith.constant 0.000000e+00 : bf16
    %0 = vector.broadcast %cst : bf16 to vector<1x10x10x128xbf16>
    %c0 = arith.constant 0 : index
    %c0_0 = arith.constant 0 : index
    %c0_1 = arith.constant 0 : index
    %c0_2 = arith.constant 0 : index
    %1 = vector.load %arg5[%c0, %c0_0, %c0_1, %c0_2] : memref<1x10x10x128xbf16, #tpu.memory_space<vmem>>, vector<1x10x10x128xbf16>
    tpu.vector_store %arg5[%c0, %c0_0, %c0_1, %c0_2], %0 {strides = array<i32>} : memref<1x10x10x128xbf16, #tpu.memory_space<vmem>>, vector<1x10x10x128xbf16>,
    %c0_3 = arith.constant 0 : index
    %c0_4 = arith.constant 0 : index
    %c0_5 = arith.constant 0 : index
    %2 = vector.load %arg2[%c0_3, %c0_4, %c0_5] : memref<1x64x128xf32, #tpu.memory_space<vmem>>, vector<1x64x128xf32>
    %3 = vector.shape_cast %2 : vector<1x64x128xf32> to vector<64x128xf32>
    %c0_6 = arith.constant 0 : index
    %c0_7 = arith.constant 0 : index
    %4 = vector.load %arg3[%c0_6, %c0_7] : memref<1x128xf32, #tpu.memory_space<vmem>>, vector<1x128xf32>
    %5 = vector.broadcast %4 : vector<1x128xf32> to vector<64x128xf32>
    %6 = arith.mulf %3, %5 : vector<64x128xf32>
    %c0_8 = arith.constant 0 : index
    %c0_9 = arith.constant 0 : index
    %7 = vector.load %arg4[%c0_8, %c0_9] : memref<1x128xf32, #tpu.memory_space<vmem>>, vector<1x128xf32>
    %8 = vector.broadcast %7 : vector<1x128xf32> to vector<64x128xf32>
    %9 = arith.addf %6, %8 : vector<64x128xf32>
    %cst_10 = arith.constant 0.000000e+00 : f32
    %10 = vector.broadcast %cst_10 : f32 to vector<64x128xf32>
    %11 = arith.maximumf %9, %10 : vector<64x128xf32>
    %12 = vector.shape_cast %11 : vector<64x128xf32> to vector<8x8x128xf32>
    %13 = arith.truncf %12 : vector<8x8x128xf32> to vector<8x8x128xbf16>
    %c0_11 = arith.constant 0 : index
    %c1 = arith.constant 1 : index
    %c1_12 = arith.constant 1 : index
    %c0_13 = arith.constant 0 : index
    %14 = vector.load %arg5[%c0_11, %c1, %c1_12, %c0_13] : memref<1x10x10x128xbf16, #tpu.memory_space<vmem>>, vector<1x8x8x128xbf16>
    %15 = vector.shape_cast %14 : vector<1x8x8x128xbf16> to vector<8x8x128xbf16>
    %16 = vector.shape_cast %13 : vector<8x8x128xbf16> to vector<1x8x8x128xbf16>
    tpu.vector_store %arg5[%c0_11, %c1, %c1_12, %c0_13], %16 {strides = array<i32>} : memref<1x10x10x128xbf16, #tpu.memory_space<vmem>>, vector<1x8x8x128xbf16>,
    return
  }
  func.func @transform_0(%arg0: i32, %arg1: i32) -> (i32, i32, i32) {
    %c0_i32 = arith.constant 0 : i32
    %c0_i32_0 = arith.constant 0 : i32
    return %arg0, %c0_i32, %arg1 : i32, i32, i32
  }
  func.func @transform_1(%arg0: i32, %arg1: i32) -> (i32, i32) {
    %c0_i32 = arith.constant 0 : i32
    %c0_i32_0 = arith.constant 0 : i32
    return %c0_i32, %arg1 : i32, i32
  }
  func.func @transform_2(%arg0: i32, %arg1: i32) -> (i32, i32) {
    %c0_i32 = arith.constant 0 : i32
    %c0_i32_0 = arith.constant 0 : i32
    return %c0_i32, %arg1 : i32, i32
  }
  func.func @transform_3(%arg0: i32, %arg1: i32) -> (i32, i32, i32, i32) {
    %c0_i32 = arith.constant 0 : i32
    %c0_i32_0 = arith.constant 0 : i32
    %c0_i32_1 = arith.constant 0 : i32
    return %arg0, %c0_i32, %c0_i32_0, %arg1 : i32, i32, i32, i32
  }
}

module attributes {stable_mosaic.version = 11 : i64} {
  func.func @kernel(%arg0: i32, %arg1: i32, %arg2: memref<1x10x10x128xbf16, #tpu.memory_space<vmem>>, %arg3: memref<9x128x128xbf16, #tpu.memory_space<vmem>>, %arg4: memref<1x64x128xf32, #tpu.memory_space<vmem>>, %arg5: memref<1x128xf32, #tpu.memory_space<vmem>>, %arg6: memref<1x128xf32, #tpu.memory_space<vmem>>) attributes {dimension_semantics = [#tpu.dimension_semantics<parallel>, #tpu.dimension_semantics<arbitrary>], iteration_bounds = array<i64: 1, 2>, scalar_prefetch = 0 : i64, scratch_operands = 0 : i64, tpu.core_type = #tpu.core_type<tc>, window_params = [{transform_indices = @transform_0, window_bounds = array<i64: 1, 10, 10, 128>}, {transform_indices = @transform_1, window_bounds = array<i64: 9, 128, 128>}, {transform_indices = @transform_2, window_bounds = array<i64: 1, 64, 128>}, {transform_indices = @transform_3, window_bounds = array<i64: 1, 128>}, {transform_indices = @transform_4, window_bounds = array<i64: 1, 128>}]} {
    %cst = arith.constant 0.000000e+00 : f32
    %0 = vector.broadcast %cst : f32 to vector<64x128xf32>
    %c0 = arith.constant 0 : index
    %c0_0 = arith.constant 0 : index
    %c0_1 = arith.constant 0 : index
    %c0_2 = arith.constant 0 : index
    %1 = vector.load %arg2[%c0, %c0_0, %c0_1, %c0_2] : memref<1x10x10x128xbf16, #tpu.memory_space<vmem>>, vector<1x8x8x128xbf16>
    %2 = vector.shape_cast %1 : vector<1x8x8x128xbf16> to vector<8x8x128xbf16>
    %3 = vector.shape_cast %2 : vector<8x8x128xbf16> to vector<64x128xbf16>
    %c0_3 = arith.constant 0 : index
    %c0_4 = arith.constant 0 : index
    %c0_5 = arith.constant 0 : index
    %4 = vector.load %arg3[%c0_3, %c0_4, %c0_5] : memref<9x128x128xbf16, #tpu.memory_space<vmem>>, vector<1x128x128xbf16>
    %5 = vector.shape_cast %4 : vector<1x128x128xbf16> to vector<128x128xbf16>
    %cst_6 = arith.constant dense<0.000000e+00> : vector<64x128xf32>
    %6 = tpu.matmul %3, %5, %cst_6 {dimension_numbers = #tpu.dot_dimension_numbers<[1], [0], [0], [1], [0, 0, 1, 1], [], []>} : vector<64x128xbf16>, vector<128x128xbf16>, vector<64x128xf32> -> vector<64x128xf32>
    %7 = arith.addf %0, %6 : vector<64x128xf32>
    %c0_7 = arith.constant 0 : index
    %c0_8 = arith.constant 0 : index
    %c1 = arith.constant 1 : index
    %c0_9 = arith.constant 0 : index
    %8 = vector.load %arg2[%c0_7, %c0_8, %c1, %c0_9] : memref<1x10x10x128xbf16, #tpu.memory_space<vmem>>, vector<1x8x8x128xbf16>
    %9 = vector.shape_cast %8 : vector<1x8x8x128xbf16> to vector<8x8x128xbf16>
    %10 = vector.shape_cast %9 : vector<8x8x128xbf16> to vector<64x128xbf16>
    %c1_10 = arith.constant 1 : index
    %c0_11 = arith.constant 0 : index
    %c0_12 = arith.constant 0 : index
    %11 = vector.load %arg3[%c1_10, %c0_11, %c0_12] : memref<9x128x128xbf16, #tpu.memory_space<vmem>>, vector<1x128x128xbf16>
    %12 = vector.shape_cast %11 : vector<1x128x128xbf16> to vector<128x128xbf16>
    %cst_13 = arith.constant dense<0.000000e+00> : vector<64x128xf32>
    %13 = tpu.matmul %10, %12, %cst_13 {dimension_numbers = #tpu.dot_dimension_numbers<[1], [0], [0], [1], [0, 0, 1, 1], [], []>} : vector<64x128xbf16>, vector<128x128xbf16>, vector<64x128xf32> -> vector<64x128xf32>
    %14 = arith.addf %7, %13 : vector<64x128xf32>
    %c0_14 = arith.constant 0 : index
    %c0_15 = arith.constant 0 : index
    %c2 = arith.constant 2 : index
    %c0_16 = arith.constant 0 : index
    %15 = vector.load %arg2[%c0_14, %c0_15, %c2, %c0_16] : memref<1x10x10x128xbf16, #tpu.memory_space<vmem>>, vector<1x8x8x128xbf16>
    %16 = vector.shape_cast %15 : vector<1x8x8x128xbf16> to vector<8x8x128xbf16>
    %17 = vector.shape_cast %16 : vector<8x8x128xbf16> to vector<64x128xbf16>
    %c2_17 = arith.constant 2 : index
    %c0_18 = arith.constant 0 : index
    %c0_19 = arith.constant 0 : index
    %18 = vector.load %arg3[%c2_17, %c0_18, %c0_19] : memref<9x128x128xbf16, #tpu.memory_space<vmem>>, vector<1x128x128xbf16>
    %19 = vector.shape_cast %18 : vector<1x128x128xbf16> to vector<128x128xbf16>
    %cst_20 = arith.constant dense<0.000000e+00> : vector<64x128xf32>
    %20 = tpu.matmul %17, %19, %cst_20 {dimension_numbers = #tpu.dot_dimension_numbers<[1], [0], [0], [1], [0, 0, 1, 1], [], []>} : vector<64x128xbf16>, vector<128x128xbf16>, vector<64x128xf32> -> vector<64x128xf32>
    %21 = arith.addf %14, %20 : vector<64x128xf32>
    %c0_21 = arith.constant 0 : index
    %c1_22 = arith.constant 1 : index
    %c0_23 = arith.constant 0 : index
    %c0_24 = arith.constant 0 : index
    %22 = vector.load %arg2[%c0_21, %c1_22, %c0_23, %c0_24] : memref<1x10x10x128xbf16, #tpu.memory_space<vmem>>, vector<1x8x8x128xbf16>
    %23 = vector.shape_cast %22 : vector<1x8x8x128xbf16> to vector<8x8x128xbf16>
    %24 = vector.shape_cast %23 : vector<8x8x128xbf16> to vector<64x128xbf16>
    %c3 = arith.constant 3 : index
    %c0_25 = arith.constant 0 : index
    %c0_26 = arith.constant 0 : index
    %25 = vector.load %arg3[%c3, %c0_25, %c0_26] : memref<9x128x128xbf16, #tpu.memory_space<vmem>>, vector<1x128x128xbf16>
    %26 = vector.shape_cast %25 : vector<1x128x128xbf16> to vector<128x128xbf16>
    %cst_27 = arith.constant dense<0.000000e+00> : vector<64x128xf32>
    %27 = tpu.matmul %24, %26, %cst_27 {dimension_numbers = #tpu.dot_dimension_numbers<[1], [0], [0], [1], [0, 0, 1, 1], [], []>} : vector<64x128xbf16>, vector<128x128xbf16>, vector<64x128xf32> -> vector<64x128xf32>
    %28 = arith.addf %21, %27 : vector<64x128xf32>
    %c0_28 = arith.constant 0 : index
    %c1_29 = arith.constant 1 : index
    %c1_30 = arith.constant 1 : index
    %c0_31 = arith.constant 0 : index
    %29 = vector.load %arg2[%c0_28, %c1_29, %c1_30, %c0_31] : memref<1x10x10x128xbf16, #tpu.memory_space<vmem>>, vector<1x8x8x128xbf16>
    %30 = vector.shape_cast %29 : vector<1x8x8x128xbf16> to vector<8x8x128xbf16>
    %31 = vector.shape_cast %30 : vector<8x8x128xbf16> to vector<64x128xbf16>
    %c4 = arith.constant 4 : index
    %c0_32 = arith.constant 0 : index
    %c0_33 = arith.constant 0 : index
    %32 = vector.load %arg3[%c4, %c0_32, %c0_33] : memref<9x128x128xbf16, #tpu.memory_space<vmem>>, vector<1x128x128xbf16>
    %33 = vector.shape_cast %32 : vector<1x128x128xbf16> to vector<128x128xbf16>
    %cst_34 = arith.constant dense<0.000000e+00> : vector<64x128xf32>
    %34 = tpu.matmul %31, %33, %cst_34 {dimension_numbers = #tpu.dot_dimension_numbers<[1], [0], [0], [1], [0, 0, 1, 1], [], []>} : vector<64x128xbf16>, vector<128x128xbf16>, vector<64x128xf32> -> vector<64x128xf32>
    %35 = arith.addf %28, %34 : vector<64x128xf32>
    %c0_35 = arith.constant 0 : index
    %c1_36 = arith.constant 1 : index
    %c2_37 = arith.constant 2 : index
    %c0_38 = arith.constant 0 : index
    %36 = vector.load %arg2[%c0_35, %c1_36, %c2_37, %c0_38] : memref<1x10x10x128xbf16, #tpu.memory_space<vmem>>, vector<1x8x8x128xbf16>
    %37 = vector.shape_cast %36 : vector<1x8x8x128xbf16> to vector<8x8x128xbf16>
    %38 = vector.shape_cast %37 : vector<8x8x128xbf16> to vector<64x128xbf16>
    %c5 = arith.constant 5 : index
    %c0_39 = arith.constant 0 : index
    %c0_40 = arith.constant 0 : index
    %39 = vector.load %arg3[%c5, %c0_39, %c0_40] : memref<9x128x128xbf16, #tpu.memory_space<vmem>>, vector<1x128x128xbf16>
    %40 = vector.shape_cast %39 : vector<1x128x128xbf16> to vector<128x128xbf16>
    %cst_41 = arith.constant dense<0.000000e+00> : vector<64x128xf32>
    %41 = tpu.matmul %38, %40, %cst_41 {dimension_numbers = #tpu.dot_dimension_numbers<[1], [0], [0], [1], [0, 0, 1, 1], [], []>} : vector<64x128xbf16>, vector<128x128xbf16>, vector<64x128xf32> -> vector<64x128xf32>
    %42 = arith.addf %35, %41 : vector<64x128xf32>
    %c0_42 = arith.constant 0 : index
    %c2_43 = arith.constant 2 : index
    %c0_44 = arith.constant 0 : index
    %c0_45 = arith.constant 0 : index
    %43 = vector.load %arg2[%c0_42, %c2_43, %c0_44, %c0_45] : memref<1x10x10x128xbf16, #tpu.memory_space<vmem>>, vector<1x8x8x128xbf16>
    %44 = vector.shape_cast %43 : vector<1x8x8x128xbf16> to vector<8x8x128xbf16>
    %45 = vector.shape_cast %44 : vector<8x8x128xbf16> to vector<64x128xbf16>
    %c6 = arith.constant 6 : index
    %c0_46 = arith.constant 0 : index
    %c0_47 = arith.constant 0 : index
    %46 = vector.load %arg3[%c6, %c0_46, %c0_47] : memref<9x128x128xbf16, #tpu.memory_space<vmem>>, vector<1x128x128xbf16>
    %47 = vector.shape_cast %46 : vector<1x128x128xbf16> to vector<128x128xbf16>
    %cst_48 = arith.constant dense<0.000000e+00> : vector<64x128xf32>
    %48 = tpu.matmul %45, %47, %cst_48 {dimension_numbers = #tpu.dot_dimension_numbers<[1], [0], [0], [1], [0, 0, 1, 1], [], []>} : vector<64x128xbf16>, vector<128x128xbf16>, vector<64x128xf32> -> vector<64x128xf32>
    %49 = arith.addf %42, %48 : vector<64x128xf32>
    %c0_49 = arith.constant 0 : index
    %c2_50 = arith.constant 2 : index
    %c1_51 = arith.constant 1 : index
    %c0_52 = arith.constant 0 : index
    %50 = vector.load %arg2[%c0_49, %c2_50, %c1_51, %c0_52] : memref<1x10x10x128xbf16, #tpu.memory_space<vmem>>, vector<1x8x8x128xbf16>
    %51 = vector.shape_cast %50 : vector<1x8x8x128xbf16> to vector<8x8x128xbf16>
    %52 = vector.shape_cast %51 : vector<8x8x128xbf16> to vector<64x128xbf16>
    %c7 = arith.constant 7 : index
    %c0_53 = arith.constant 0 : index
    %c0_54 = arith.constant 0 : index
    %53 = vector.load %arg3[%c7, %c0_53, %c0_54] : memref<9x128x128xbf16, #tpu.memory_space<vmem>>, vector<1x128x128xbf16>
    %54 = vector.shape_cast %53 : vector<1x128x128xbf16> to vector<128x128xbf16>
    %cst_55 = arith.constant dense<0.000000e+00> : vector<64x128xf32>
    %55 = tpu.matmul %52, %54, %cst_55 {dimension_numbers = #tpu.dot_dimension_numbers<[1], [0], [0], [1], [0, 0, 1, 1], [], []>} : vector<64x128xbf16>, vector<128x128xbf16>, vector<64x128xf32> -> vector<64x128xf32>
    %56 = arith.addf %49, %55 : vector<64x128xf32>
    %c0_56 = arith.constant 0 : index
    %c2_57 = arith.constant 2 : index
    %c2_58 = arith.constant 2 : index
    %c0_59 = arith.constant 0 : index
    %57 = vector.load %arg2[%c0_56, %c2_57, %c2_58, %c0_59] : memref<1x10x10x128xbf16, #tpu.memory_space<vmem>>, vector<1x8x8x128xbf16>
    %58 = vector.shape_cast %57 : vector<1x8x8x128xbf16> to vector<8x8x128xbf16>
    %59 = vector.shape_cast %58 : vector<8x8x128xbf16> to vector<64x128xbf16>
    %c8 = arith.constant 8 : index
    %c0_60 = arith.constant 0 : index
    %c0_61 = arith.constant 0 : index
    %60 = vector.load %arg3[%c8, %c0_60, %c0_61] : memref<9x128x128xbf16, #tpu.memory_space<vmem>>, vector<1x128x128xbf16>
    %61 = vector.shape_cast %60 : vector<1x128x128xbf16> to vector<128x128xbf16>
    %cst_62 = arith.constant dense<0.000000e+00> : vector<64x128xf32>
    %62 = tpu.matmul %59, %61, %cst_62 {dimension_numbers = #tpu.dot_dimension_numbers<[1], [0], [0], [1], [0, 0, 1, 1], [], []>} : vector<64x128xbf16>, vector<128x128xbf16>, vector<64x128xf32> -> vector<64x128xf32>
    %63 = arith.addf %56, %62 : vector<64x128xf32>
    %64 = vector.shape_cast %63 : vector<64x128xf32> to vector<1x64x128xf32>
    %c0_63 = arith.constant 0 : index
    %c0_64 = arith.constant 0 : index
    %c0_65 = arith.constant 0 : index
    %65 = vector.load %arg4[%c0_63, %c0_64, %c0_65] : memref<1x64x128xf32, #tpu.memory_space<vmem>>, vector<1x64x128xf32>
    tpu.vector_store %arg4[%c0_63, %c0_64, %c0_65], %64 {strides = array<i32>} : memref<1x64x128xf32, #tpu.memory_space<vmem>>, vector<1x64x128xf32>,
    %c0_i32 = arith.constant 0 : i32
    %66 = arith.cmpi eq, %arg1, %c0_i32 : i32
    %67 = arith.extui %66 : i1 to i32
    %c0_i32_66 = arith.constant 0 : i32
    %68 = arith.cmpi ne, %67, %c0_i32_66 : i32
    scf.if %68 {
      %cst_77 = arith.constant 0.000000e+00 : f32
      %80 = vector.broadcast %cst_77 : f32 to vector<1x128xf32>
      %c0_78 = arith.constant 0 : index
      %c0_79 = arith.constant 0 : index
      %81 = vector.load %arg5[%c0_78, %c0_79] : memref<1x128xf32, #tpu.memory_space<vmem>>, vector<1x128xf32>
      tpu.vector_store %arg5[%c0_78, %c0_79], %80 {strides = array<i32>} : memref<1x128xf32, #tpu.memory_space<vmem>>, vector<1x128xf32>,
      %cst_80 = arith.constant 0.000000e+00 : f32
      %82 = vector.broadcast %cst_80 : f32 to vector<1x128xf32>
      %c0_81 = arith.constant 0 : index
      %c0_82 = arith.constant 0 : index
      %83 = vector.load %arg6[%c0_81, %c0_82] : memref<1x128xf32, #tpu.memory_space<vmem>>, vector<1x128xf32>
      tpu.vector_store %arg6[%c0_81, %c0_82], %82 {strides = array<i32>} : memref<1x128xf32, #tpu.memory_space<vmem>>, vector<1x128xf32>,
    } else {
    }
    %c0_67 = arith.constant 0 : index
    %c0_68 = arith.constant 0 : index
    %69 = vector.load %arg5[%c0_67, %c0_68] : memref<1x128xf32, #tpu.memory_space<vmem>>, vector<1x128xf32>
    %cst_69 = arith.constant dense<0.000000e+00> : vector<128xf32>
    %70 = vector.multi_reduction <add>, %63, %cst_69 [0] : vector<64x128xf32> to vector<128xf32>
    %71 = vector.shape_cast %70 : vector<128xf32> to vector<1x128xf32>
    %72 = arith.addf %69, %71 : vector<1x128xf32>
    %c0_70 = arith.constant 0 : index
    %c0_71 = arith.constant 0 : index
    %73 = vector.load %arg5[%c0_70, %c0_71] : memref<1x128xf32, #tpu.memory_space<vmem>>, vector<1x128xf32>
    tpu.vector_store %arg5[%c0_70, %c0_71], %72 {strides = array<i32>} : memref<1x128xf32, #tpu.memory_space<vmem>>, vector<1x128xf32>,
    %c0_72 = arith.constant 0 : index
    %c0_73 = arith.constant 0 : index
    %74 = vector.load %arg6[%c0_72, %c0_73] : memref<1x128xf32, #tpu.memory_space<vmem>>, vector<1x128xf32>
    %75 = arith.mulf %63, %63 : vector<64x128xf32>
    %cst_74 = arith.constant dense<0.000000e+00> : vector<128xf32>
    %76 = vector.multi_reduction <add>, %75, %cst_74 [0] : vector<64x128xf32> to vector<128xf32>
    %77 = vector.shape_cast %76 : vector<128xf32> to vector<1x128xf32>
    %78 = arith.addf %74, %77 : vector<1x128xf32>
    %c0_75 = arith.constant 0 : index
    %c0_76 = arith.constant 0 : index
    %79 = vector.load %arg6[%c0_75, %c0_76] : memref<1x128xf32, #tpu.memory_space<vmem>>, vector<1x128xf32>
    tpu.vector_store %arg6[%c0_75, %c0_76], %78 {strides = array<i32>} : memref<1x128xf32, #tpu.memory_space<vmem>>, vector<1x128xf32>,
    return
  }
  func.func @transform_0(%arg0: i32, %arg1: i32) -> (i32, i32, i32, i32) {
    %c0_i32 = arith.constant 0 : i32
    %c0_i32_0 = arith.constant 0 : i32
    %c0_i32_1 = arith.constant 0 : i32
    %c0_i32_2 = arith.constant 0 : i32
    return %arg1, %c0_i32, %c0_i32_0, %c0_i32_1 : i32, i32, i32, i32
  }
  func.func @transform_1(%arg0: i32, %arg1: i32) -> (i32, i32, i32) {
    %c0_i32 = arith.constant 0 : i32
    %c0_i32_0 = arith.constant 0 : i32
    %c0_i32_1 = arith.constant 0 : i32
    return %c0_i32, %c0_i32_0, %arg0 : i32, i32, i32
  }
  func.func @transform_2(%arg0: i32, %arg1: i32) -> (i32, i32, i32) {
    %c0_i32 = arith.constant 0 : i32
    %c0_i32_0 = arith.constant 0 : i32
    return %arg1, %c0_i32, %arg0 : i32, i32, i32
  }
  func.func @transform_3(%arg0: i32, %arg1: i32) -> (i32, i32) {
    %c0_i32 = arith.constant 0 : i32
    %c0_i32_0 = arith.constant 0 : i32
    return %c0_i32, %arg0 : i32, i32
  }
  func.func @transform_4(%arg0: i32, %arg1: i32) -> (i32, i32) {
    %c0_i32 = arith.constant 0 : i32
    %c0_i32_0 = arith.constant 0 : i32
    return %c0_i32, %arg0 : i32, i32
  }
}

module attributes {stable_mosaic.version = 11 : i64} {
  func.func @kernel(%arg0: i32, %arg1: i32, %arg2: memref<1x64x128xf32, #tpu.memory_space<vmem>>, %arg3: memref<1x128xf32, #tpu.memory_space<vmem>>, %arg4: memref<1x128xf32, #tpu.memory_space<vmem>>, %arg5: memref<1x64x128xf32, #tpu.memory_space<vmem>>) attributes {dimension_semantics = [#tpu.dimension_semantics<parallel>, #tpu.dimension_semantics<parallel>], iteration_bounds = array<i64: 2, 1>, scalar_prefetch = 0 : i64, scratch_operands = 0 : i64, tpu.core_type = #tpu.core_type<tc>, window_params = [{transform_indices = @transform_0, window_bounds = array<i64: 1, 64, 128>}, {transform_indices = @transform_1, window_bounds = array<i64: 1, 128>}, {transform_indices = @transform_2, window_bounds = array<i64: 1, 128>}, {transform_indices = @transform_3, window_bounds = array<i64: 1, 64, 128>}]} {
    %c0 = arith.constant 0 : index
    %c0_0 = arith.constant 0 : index
    %c0_1 = arith.constant 0 : index
    %0 = vector.load %arg2[%c0, %c0_0, %c0_1] : memref<1x64x128xf32, #tpu.memory_space<vmem>>, vector<1x64x128xf32>
    %c0_2 = arith.constant 0 : index
    %c0_3 = arith.constant 0 : index
    %1 = vector.load %arg3[%c0_2, %c0_3] : memref<1x128xf32, #tpu.memory_space<vmem>>, vector<1x128xf32>
    %2 = vector.shape_cast %1 : vector<1x128xf32> to vector<1x1x128xf32>
    %3 = vector.broadcast %2 : vector<1x1x128xf32> to vector<1x64x128xf32>
    %4 = arith.mulf %0, %3 : vector<1x64x128xf32>
    %c0_4 = arith.constant 0 : index
    %c0_5 = arith.constant 0 : index
    %5 = vector.load %arg4[%c0_4, %c0_5] : memref<1x128xf32, #tpu.memory_space<vmem>>, vector<1x128xf32>
    %6 = vector.shape_cast %5 : vector<1x128xf32> to vector<1x1x128xf32>
    %7 = vector.broadcast %6 : vector<1x1x128xf32> to vector<1x64x128xf32>
    %8 = arith.addf %4, %7 : vector<1x64x128xf32>
    %cst = arith.constant 0.000000e+00 : f32
    %9 = vector.broadcast %cst : f32 to vector<1x64x128xf32>
    %10 = arith.maximumf %8, %9 : vector<1x64x128xf32>
    %c0_6 = arith.constant 0 : index
    %c0_7 = arith.constant 0 : index
    %c0_8 = arith.constant 0 : index
    %11 = vector.load %arg5[%c0_6, %c0_7, %c0_8] : memref<1x64x128xf32, #tpu.memory_space<vmem>>, vector<1x64x128xf32>
    tpu.vector_store %arg5[%c0_6, %c0_7, %c0_8], %10 {strides = array<i32>} : memref<1x64x128xf32, #tpu.memory_space<vmem>>, vector<1x64x128xf32>,
    return
  }
  func.func @transform_0(%arg0: i32, %arg1: i32) -> (i32, i32, i32) {
    %c0_i32 = arith.constant 0 : i32
    %c0_i32_0 = arith.constant 0 : i32
    return %arg0, %c0_i32, %arg1 : i32, i32, i32
  }
  func.func @transform_1(%arg0: i32, %arg1: i32) -> (i32, i32) {
    %c0_i32 = arith.constant 0 : i32
    %c0_i32_0 = arith.constant 0 : i32
    return %c0_i32, %arg1 : i32, i32
  }
  func.func @transform_2(%arg0: i32, %arg1: i32) -> (i32, i32) {
    %c0_i32 = arith.constant 0 : i32
    %c0_i32_0 = arith.constant 0 : i32
    return %c0_i32, %arg1 : i32, i32
  }
  func.func @transform_3(%arg0: i32, %arg1: i32) -> (i32, i32, i32) {
    %c0_i32 = arith.constant 0 : i32
    %c0_i32_0 = arith.constant 0 : i32
    return %arg0, %c0_i32, %arg1 : i32, i32, i32
  }
}

</mosaic_0001>

<bundles_post_ra>
// kernel: base_block_forward.5
= control target key start
LH: loop header
LB: loop body
LE: loop exit
PB: predicated region body
PF: predicated region fallthrough
CT: control target
= control target key end

     0   :  { %s660_s12 = smov 0   ;;  %s662_s13 = smov 0   ;;  %s817_s0 = inlined_call_operand.vmem [shape: f32[2,64,128], index: 0, kind: input, shape index: {}]   ;;  %s818_s1 = inlined_call_operand.vmem [shape: f32[1,128], index: 1, kind: input, shape index: {}]   ;;  %s819_s2 = inlined_call_operand.vmem [shape: f32[1,128], index: 2, kind: input, shape index: {}]   ;;  %s820_s3 = inlined_call_operand.vmem [shape: bf16[2,10,10,128], index: 3, kind: output, shape index: {}]  }
   0x1   :  { %s664_s14 = smov 0  }
   0x2 LB: > { %s25_s15 = sadd.s32 1, %s633_s13  ;;  %p548_p0 = scmp.ge.s32.totalorder %s637_s14, 1  ;;  %s637_s14 = sphi %s664_s14, %s13_s14   ;;  %s633_s13 = sphi %s662_s13, %s826_s13   ;;  %s629_s12 = sphi %s660_s12, %s825_s12  }
   0x3   : > { %p27_p1 = scmp.ge.s32.totalorder %s25_s15, 2  ;;  %p172_p2 = scmp.lt.s32.totalorder %s637_s14, 3 }
   0x5   : > { %s828_s15 = smov (%p27_p1, %s25_s15), 0  ;;  %p173_p3 = pnand %p548_p0, %p172_p2 }
   0x6   : > { %p208_p4 = scmp.lt.s32.totalorder (!%p173_p3), %s629_s12, 1 }
   0x7   : > { %176 = sbr.rel (%p173_p3) target bundleno = 52 (0x34), region = 32 }
   0xc   : > { %s830_s12 = smov (!%p208_p4, %s629_s12), 1  ;;  %v613_v0 = vld [vmem:[%s818_s1] ss:$0 sm:$0xff]  ;;  %v639_v5 = vmov 0   ;;  %vm381_vm0 = vsmask.f32 7938 }
   0xd   : > { %s587_s18 = smul.u32 80, %s830_s12  ;;  %s586_s19 = sshll.u32 %s830_s12, 6  ;;  %v614_v1 = vld [vmem:[%s819_s2] ss:$0 sm:$0xff]  ;;  %vm380_vm1 = vcmask 1043456   ;;  %vm386_vm2 = vcmask 1040384  }
   0xe   : > { %s215_s22 = scalar_lea.vmem %s817_s0, %s586_s19  ;;  %vm387_vm3 = vsmask.f32 256  ;;  %vm725_vm4 = vmand %vm380_vm1, %vm381_vm0 }
   0xf   : > { %s690_s27 = scalar_lea.vmem %s820_s3, %s587_s18  ;;  %v251_v2 = vld [vmem:[%s215_s22] sm:$0xff]  ;;  %v252_v3 = vld [vmem:[%s215_s22 + $0x8] sm:$0xff]  ;;  %v253_v4 = vld [vmem:[%s215_s22 + $0x10] sm:$0xff] }
  0x10   : > { %233 = vst [vmem:[%s690_s27 + $0x8] sm:$0xf] %v639_v5  ;;  %v263_v6 = vmul.f32 %v613_v0, %v251_v2  ;;  %v264_v7 = vmul.f32 %v613_v0, %v252_v3  ;;  %v265_v8 = vmul.f32 %v613_v0, %v253_v4  ;;  %v254_v9 = vld [vmem:[%s215_s22 + $0x18] sm:$0xff]  ;;  %v255_v10 = vld [vmem:[%s215_s22 + $0x20] sm:$0xff]  ;;  %v256_v11 = vld [vmem:[%s215_s22 + $0x28] sm:$0xff] }
  0x11   : > { %231 = vst [vmem:[%s690_s27] sm:$0xf] %v639_v5  ;;  %v266_v12 = vmul.f32 %v613_v0, %v254_v9  ;;  %v267_v13 = vmul.f32 %v613_v0, %v255_v10  ;;  %v268_v14 = vmul.f32 %v613_v0, %v256_v11  ;;  %v257_v15 = vld [vmem:[%s215_s22 + $0x30] sm:$0xff]  ;;  %v258_v16 = vld [vmem:[%s215_s22 + $0x38] sm:$0xff]  ;;  %vm734_vm5 = vmand %vm386_vm2, %vm387_vm3 }
  0x12   : > { %232 = vst [vmem:[%s690_s27 + $0x4] sm:$0x1] %v639_v5  ;;  %v275_v17 = vadd.f32 %v614_v1, %v263_v6  ;;  %v276_v18 = vadd.f32 %v614_v1, %v264_v7  ;;  %v277_v19 = vadd.f32 %v614_v1, %v265_v8  ;;  %v269_v20 = vmul.f32 %v613_v0, %v257_v15 }
  0x13   : > { %234 = vst [vmem:[%s690_s27 + $0xc] sm:$0x1] %v639_v5  ;;  %v278_v21 = vadd.f32 %v614_v1, %v266_v12  ;;  %v279_v22 = vadd.f32 %v614_v1, %v267_v13  ;;  %v280_v23 = vadd.f32 %v614_v1, %v268_v14  ;;  %v270_v27 = vmul.f32 %v613_v0, %v258_v16 }
  0x14   : > { %235 = vst [vmem:[%s690_s27 + $0x10] sm:$0xf] %v639_v5  ;;  %v283_v24 = vmax.f32 %v275_v17, 0.0  ;;  %v284_v25 = vmax.f32 %v276_v18, 0.0  ;;  %v285_v26 = vmax.f32 %v277_v19, 0.0  ;;  %v281_v29 = vadd.f32 %v614_v1, %v269_v20 }
  0x15   : > { %236 = vst [vmem:[%s690_s27 + $0x14] sm:$0x1] %v639_v5  ;;  %v286_v28 = vmax.f32 %v278_v21, 0.0  ;;  %v287_v34 = vmax.f32 %v279_v22, 0.0  ;;  %v288_v37 = vmax.f32 %v280_v23, 0.0  ;;  %v282_v38 = vadd.f32 %v614_v1, %v270_v27 }
  0x16   : > { %237 = vst [vmem:[%s690_s27 + $0x18] sm:$0xf] %v639_v5  ;;  %v291_v30 = vpack.c.bf16 %v283_v24, %v283_v24  ;;  %v292_v31 = vpack.c.bf16 %v284_v25, %v284_v25  ;;  %v293_v32 = vpack.c.bf16 %v285_v26, %v285_v26  ;;  %v289_v41 = vmax.f32 %v281_v29, 0.0 }
  0x17   : > { %238 = vst [vmem:[%s690_s27 + $0x1c] sm:$0x1] %v639_v5  ;;  %v294_v33 = vpack.c.bf16 %v286_v28, %v286_v28  ;;  %v295_v46 = vpack.c.bf16 %v287_v34, %v287_v34  ;;  %v296_v49 = vpack.c.bf16 %v288_v37, %v288_v37  ;;  %v290_v50 = vmax.f32 %v282_v38, 0.0  ;;  %v552_v52 = vld [vmem:[%s690_s27 + $0x8] sm:$0xf] }
  0x18   : > { %239 = vst [vmem:[%s690_s27 + $0x20] sm:$0xf] %v639_v5  ;;  %v300_v35 = vshrl.u32 %v291_v30, 16  ;;  %v308_v36 = vshrl.u32 %v292_v31, 16  ;;  %v303_v39 = vshll.u32 %v291_v30, 16  ;;  %v316_v40 = vshrl.u32 %v293_v32, 16 }
  0x19   : > { %240 = vst [vmem:[%s690_s27 + $0x24] sm:$0x1] %v639_v5  ;;  %v311_v44 = vshll.u32 %v292_v31, 16  ;;  %v324_v45 = vshrl.u32 %v294_v33, 16  ;;  %v319_v48 = vshll.u32 %v293_v32, 16  ;;  %v297_v53 = vpack.c.bf16 %v289_v41, %v289_v41 }
  0x1a   : > { %241 = vst [vmem:[%s690_s27 + $0x28] sm:$0xf] %v639_v5  ;;  %v302_v42 = vrot.slane %v300_v35, 7  ;;  %v310_v43 = vrot.slane %v308_v36, 7  ;;  %v318_v47 = vrot.slane %v316_v40, 7  ;;  %v327_v57 = vshll.u32 %v294_v33, 16 }
  0x1b   : > { %242 = vst [vmem:[%s690_s27 + $0x2c] sm:$0x1] %v639_v5  ;;  %v554_v56 = vld [vmem:[%s690_s27 + $0xc] sm:$0x1]  ;;  %v556_v60 = vld [vmem:[%s690_s27 + $0x10] sm:$0xf]  ;;  %v298_v3 = vpack.c.bf16 %v290_v50, %v290_v50 }
  0x1c   : > { %243 = vst [vmem:[%s690_s27 + $0x30] sm:$0xf] %v639_v5  ;;  %v305_v51 = vor.u32 %v303_v39, %v302_v42  ;;  %v306_v55 = vrot.slane %v302_v42, 4  ;;  %v313_v59 = vor.u32 %v311_v44, %v310_v43  ;;  %v326_v61 = vrot.slane %v324_v45, 7  ;;  %v558_v0 = vld [vmem:[%s690_s27 + $0x14] sm:$0x1] }
  0x1d   : > { %244 = vst [vmem:[%s690_s27 + $0x34] sm:$0x1] %v639_v5  ;;  %v332_v62 = vshrl.u32 %v295_v46, 16  ;;  %v314_v63 = vrot.slane %v310_v43, 4  ;;  %v321_v1 = vor.u32 %v319_v48, %v318_v47  ;;  %v340_v2 = vshrl.u32 %v296_v49, 16 }
  0x1e   : > { %245 = vst [vmem:[%s690_s27 + $0x38] sm:$0xf] %v639_v5  ;;  %v384_v4 = vsel %vm725_vm4, %v305_v51, %v552_v52  ;;  %v335_v7 = vshll.u32 %v295_v46, 16  ;;  %v348_v8 = vshrl.u32 %v297_v53, 16  ;;  %v390_v9 = vsel %vm734_vm5, %v306_v55, %v554_v56  ;;  %v560_v10 = vld [vmem:[%s690_s27 + $0x18] sm:$0xf] }
  0x1f   : > { %246 = vst [vmem:[%s690_s27 + $0x3c] sm:$0x1] %v639_v5  ;;  %v334_v6 = vrot.slane %v332_v62, 7  ;;  %v322_v11 = vrot.slane %v318_v47, 4  ;;  %v393_v12 = vsel %vm725_vm4, %v313_v59, %v556_v60  ;;  %v562_v13 = vld [vmem:[%s690_s27 + $0x1c] sm:$0x1]  ;;  %v329_v14 = vor.u32 %v327_v57, %v326_v61 }
  0x20   : > { %247 = vst [vmem:[%s690_s27 + $0x40] sm:$0xf] %v639_v5  ;;  %v342_v15 = vrot.slane %v340_v2, 7  ;;  %v343_v16 = vshll.u32 %v296_v49, 16  ;;  %v396_v17 = vsel %vm734_vm5, %v314_v63, %v558_v0  ;;  %v564_v18 = vld [vmem:[%s690_s27 + $0x20] sm:$0xf] }
  0x21   : > { %248 = vst [vmem:[%s690_s27 + $0x44] sm:$0x1] %v639_v5  ;;  %v330_v19 = vrot.slane %v326_v61, 4  ;;  %v356_v20 = vshrl.u32 %v298_v3, 16  ;;  %v566_v21 = vld [vmem:[%s690_s27 + $0x24] sm:$0x1]  ;;  %v337_v22 = vor.u32 %v335_v7, %v334_v6  ;;  %v402_v25 = vsel %vm734_vm5, %v322_v11, %v562_v13 }
  0x22   : > { %249 = vst [vmem:[%s690_s27 + $0x48] sm:$0xf] %v639_v5  ;;  %v350_v23 = vrot.slane %v348_v8, 7  ;;  %v351_v24 = vshll.u32 %v297_v53, 16  ;;  %v568_v26 = vld [vmem:[%s690_s27 + $0x28] sm:$0xf]  ;;  %v405_v28 = vsel %vm725_vm4, %v329_v14, %v564_v18  ;;  %v345_v30 = vor.u32 %v343_v16, %v342_v15 }
  0x23   : > { %250 = vst [vmem:[%s690_s27 + $0x4c] sm:$0x1] %v639_v5  ;;  %v399_v5 = vsel %vm725_vm4, %v321_v1, %v560_v10  ;;  %v338_v27 = vrot.slane %v334_v6, 4  ;;  %v570_v29 = vld [vmem:[%s690_s27 + $0x2c] sm:$0x1]  ;;  %v358_v31 = vrot.slane %v356_v20, 7  ;;  %v408_v33 = vsel %vm734_vm5, %v330_v19, %v566_v21 }
  0x24   : > { %553 = vst [vmem:[%s690_s27 + $0x8] sm:$0xf] %v384_v4  ;;  %v359_v32 = vshll.u32 %v298_v3, 16  ;;  %v572_v34 = vld [vmem:[%s690_s27 + $0x30] sm:$0xf]  ;;  %v346_v35 = vrot.slane %v342_v15, 4  ;;  %v411_v36 = vsel %vm725_vm4, %v337_v22, %v568_v26  ;;  %v353_v38 = vor.u32 %v351_v24, %v350_v23 }
  0x25   : > { %555 = vst [vmem:[%s690_s27 + $0xc] sm:$0x1] %v390_v9  ;;  %v574_v37 = vld [vmem:[%s690_s27 + $0x34] sm:$0x1]  ;;  %v414_v39 = vsel %vm734_vm5, %v338_v27, %v570_v29  ;;  %v576_v40 = vld [vmem:[%s690_s27 + $0x38] sm:$0xf]  ;;  %v417_v42 = vsel %vm725_vm4, %v345_v30, %v572_v34 }
  0x26   : > { %557 = vst [vmem:[%s690_s27 + $0x10] sm:$0xf] %v393_v12  ;;  %v354_v41 = vrot.slane %v350_v23, 4  ;;  %v578_v43 = vld [vmem:[%s690_s27 + $0x3c] sm:$0x1]  ;;  %v361_v44 = vor.u32 %v359_v32, %v358_v31  ;;  %v420_v45 = vsel %vm734_vm5, %v346_v35, %v574_v37  ;;  %v362_v47 = vrot.slane %v358_v31, 4 }
  0x27   : > { %559 = vst [vmem:[%s690_s27 + $0x14] sm:$0x1] %v396_v17  ;;  %v580_v46 = vld [vmem:[%s690_s27 + $0x40] sm:$0xf]  ;;  %v423_v48 = vsel %vm725_vm4, %v353_v38, %v576_v40 }
  0x28   : > { %561 = vst [vmem:[%s690_s27 + $0x18] sm:$0xf] %v399_v5  ;;  %v582_v49 = vld [vmem:[%s690_s27 + $0x44] sm:$0x1]  ;;  %v426_v50 = vsel %vm734_vm5, %v354_v41, %v578_v43  ;;  %v429_v51 = vsel %vm725_vm4, %v361_v44, %v580_v46 }
  0x29   : > { %563 = vst [vmem:[%s690_s27 + $0x1c] sm:$0x1] %v402_v25  ;;  %v432_v52 = vsel %vm734_vm5, %v362_v47, %v582_v49 }
  0x2a   : > { %565 = vst [vmem:[%s690_s27 + $0x20] sm:$0xf] %v405_v28 }
  0x2b   : > { %567 = vst [vmem:[%s690_s27 + $0x24] sm:$0x1] %v408_v33 }
  0x2c   : > { %569 = vst [vmem:[%s690_s27 + $0x28] sm:$0xf] %v411_v36 }
  0x2d   : > { %571 = vst [vmem:[%s690_s27 + $0x2c] sm:$0x1] %v414_v39 }
  0x2e   : > { %573 = vst [vmem:[%s690_s27 + $0x30] sm:$0xf] %v417_v42 }
  0x2f   : > { %575 = vst [vmem:[%s690_s27 + $0x34] sm:$0x1] %v420_v45 }
  0x30   : > { %577 = vst [vmem:[%s690_s27 + $0x38] sm:$0xf] %v423_v48 }
  0x31   : > { %579 = vst [vmem:[%s690_s27 + $0x3c] sm:$0x1] %v426_v50 }
  0x32   : > { %581 = vst [vmem:[%s690_s27 + $0x40] sm:$0xf] %v429_v51 }
  0x33   : > { %583 = vst [vmem:[%s690_s27 + $0x44] sm:$0x1] %v432_v52 }
  0x34 PF: > { %s13_s14 = sadd.s32 1, %s637_s14   ;;  %s825_s12 = smov %s633_s13 }
  0x35   : > { %p10_p5 = scmp.ge.s32.totalorder %s13_s14, 4   ;;  %s826_s13 = smov %s828_s15 }
  0x37   :  { %12 = sbr.rel (!%p10_p5) target bundleno = 2 (0x2), region = 69 }

// kernel: base_block_forward.7
= control target key start
LH: loop header
LB: loop body
LE: loop exit
PB: predicated region body
PF: predicated region fallthrough
CT: control target
= control target key end

     0   :  { %s471_s12 = smov 0   ;;  %s473_s13 = smov 0   ;;  %s510_s0 = inlined_call_operand.vmem [shape: f32[2,64,128], index: 0, kind: input, shape index: {}]   ;;  %s511_s1 = inlined_call_operand.vmem [shape: f32[1,128], index: 1, kind: input, shape index: {}]   ;;  %s512_s2 = inlined_call_operand.vmem [shape: f32[1,128], index: 2, kind: input, shape index: {}]   ;;  %s513_s3 = inlined_call_operand.vmem [shape: f32[2,64,128], index: 3, kind: output, shape index: {}]  }
   0x1   :  { %s475_s14 = smov 0  }
   0x2 LB: > { %s25_s15 = sadd.s32 1, %s445_s13  ;;  %p392_p0 = scmp.ge.s32.totalorder %s449_s14, 1  ;;  %s449_s14 = sphi %s475_s14, %s13_s14   ;;  %s445_s13 = sphi %s473_s13, %s515_s13   ;;  %s441_s12 = sphi %s471_s12, %s514_s12  }
   0x3   : > { %p27_p1 = scmp.ge.s32.totalorder %s25_s15, 2  ;;  %p172_p2 = scmp.lt.s32.totalorder %s449_s14, 3 }
   0x5   : > { %s517_s15 = smov (%p27_p1, %s25_s15), 0  ;;  %p173_p3 = pnand %p392_p0, %p172_p2 }
   0x6   : > { %p208_p4 = scmp.lt.s32.totalorder (!%p173_p3), %s441_s12, 1 }
   0x7   : > { %176 = sbr.rel (%p173_p3) target bundleno = 30 (0x1e), region = 32 }
   0xc   : > { %s519_s12 = smov (!%p208_p4, %s441_s12), 1  ;;  %v425_v0 = vld [vmem:[%s511_s1] ss:$0 sm:$0xff] }
   0xd   : > { %s399_s18 = sshll.u32 %s519_s12, 6  ;;  %v426_v1 = vld [vmem:[%s512_s2] ss:$0 sm:$0xff] }
   0xe   : > { %s215_s21 = scalar_lea.vmem %s510_s0, %s399_s18  ;;  %s229_s26 = scalar_lea.vmem %s513_s3, %s399_s18 }
   0xf   : > { %v230_v2 = vld [vmem:[%s215_s21] sm:$0xff]  ;;  %v231_v3 = vld [vmem:[%s215_s21 + $0x8] sm:$0xff]  ;;  %v232_v4 = vld [vmem:[%s215_s21 + $0x10] sm:$0xff] }
  0x10   : > { %v242_v5 = vmul.f32 %v425_v0, %v230_v2  ;;  %v243_v6 = vmul.f32 %v425_v0, %v231_v3  ;;  %v244_v7 = vmul.f32 %v425_v0, %v232_v4  ;;  %v233_v8 = vld [vmem:[%s215_s21 + $0x18] sm:$0xff]  ;;  %v234_v9 = vld [vmem:[%s215_s21 + $0x20] sm:$0xff]  ;;  %v235_v10 = vld [vmem:[%s215_s21 + $0x28] sm:$0xff] }
  0x11   : > { %v245_v11 = vmul.f32 %v425_v0, %v233_v8  ;;  %v246_v12 = vmul.f32 %v425_v0, %v234_v9  ;;  %v247_v13 = vmul.f32 %v425_v0, %v235_v10  ;;  %v236_v14 = vld [vmem:[%s215_s21 + $0x30] sm:$0xff]  ;;  %v237_v15 = vld [vmem:[%s215_s21 + $0x38] sm:$0xff] }
  0x12   : > { %v254_v16 = vadd.f32 %v426_v1, %v242_v5  ;;  %v255_v17 = vadd.f32 %v426_v1, %v243_v6  ;;  %v256_v18 = vadd.f32 %v426_v1, %v244_v7  ;;  %v248_v19 = vmul.f32 %v425_v0, %v236_v14 }
  0x13   : > { %v257_v20 = vadd.f32 %v426_v1, %v245_v11  ;;  %v258_v21 = vadd.f32 %v426_v1, %v246_v12  ;;  %v259_v22 = vadd.f32 %v426_v1, %v247_v13  ;;  %v249_v23 = vmul.f32 %v425_v0, %v237_v15 }
  0x14   : > { %v262_v24 = vmax.f32 %v254_v16, 0.0  ;;  %v263_v25 = vmax.f32 %v255_v17, 0.0  ;;  %v264_v26 = vmax.f32 %v256_v18, 0.0  ;;  %v260_v27 = vadd.f32 %v426_v1, %v248_v19 }
  0x15   : > { %v265_v28 = vmax.f32 %v257_v20, 0.0  ;;  %v261_v29 = vadd.f32 %v426_v1, %v249_v23  ;;  %v266_v30 = vmax.f32 %v258_v21, 0.0  ;;  %v267_v31 = vmax.f32 %v259_v22, 0.0 }
  0x16   : > { %270 = vst [vmem:[%s229_s26] sm:$0xff] %v262_v24  ;;  %v268_v32 = vmax.f32 %v260_v27, 0.0 }
  0x17   : > { %271 = vst [vmem:[%s229_s26 + $0x8] sm:$0xff] %v263_v25  ;;  %v269_v33 = vmax.f32 %v261_v29, 0.0 }
  0x18   : > { %272 = vst [vmem:[%s229_s26 + $0x10] sm:$0xff] %v264_v26 }
  0x19   : > { %273 = vst [vmem:[%s229_s26 + $0x18] sm:$0xff] %v265_v28 }
  0x1a   : > { %274 = vst [vmem:[%s229_s26 + $0x20] sm:$0xff] %v266_v30 }
  0x1b   : > { %275 = vst [vmem:[%s229_s26 + $0x28] sm:$0xff] %v267_v31 }
  0x1c   : > { %276 = vst [vmem:[%s229_s26 + $0x30] sm:$0xff] %v268_v32 }
  0x1d   : > { %277 = vst [vmem:[%s229_s26 + $0x38] sm:$0xff] %v269_v33 }
  0x1e PF: > { %s13_s14 = sadd.s32 1, %s449_s14   ;;  %s514_s12 = smov %s445_s13 }
  0x1f   : > { %p10_p5 = scmp.ge.s32.totalorder %s13_s14, 4   ;;  %s515_s13 = smov %s517_s15 }
  0x21   :  { %12 = sbr.rel (!%p10_p5) target bundleno = 2 (0x2), region = 68 }

// kernel: base_block_forward.4
= control target key start
LH: loop header
LB: loop body
LE: loop exit
PB: predicated region body
PF: predicated region fallthrough
CT: control target
= control target key end

     0   :  { %s2763_s15 = smov 0   ;;  %s2765_s16 = smov 0   ;;  %s3250_s0 = inlined_call_operand.vmem [shape: bf16[2,36,9,128], index: 0, kind: input, shape index: {}]   ;;  %s3251_s1 = inlined_call_operand.vmem [shape: bf16[9,128,128], index: 1, kind: input, shape index: {}]   ;;  %s3252_s2 = inlined_call_operand.vmem [shape: f32[2,64,128], index: 2, kind: output, shape index: {0}]   ;;  %s3253_s3 = inlined_call_operand.vmem [shape: f32[1,128], index: 3, kind: output, shape index: {1}]   ;;  %s3254_s4 = inlined_call_operand.vmem [shape: f32[1,128], index: 4, kind: output, shape index: {2}]  }
   0x1   :  { %s2767_s17 = smov 0  }
   0x2 LB: > { %s24_s18 = sadd.s32 1, %s2731_s16  ;;  %p1981_p0 = scmp.ge.s32.totalorder %s2735_s17, 1  ;;  %s2735_s17 = sphi %s2767_s17, %s15_s17   ;;  %s2731_s16 = sphi %s2765_s16, %s3258_s16   ;;  %s2727_s15 = sphi %s2763_s15, %s3257_s15  }
   0x3   : > { %p25_p1 = scmp.ge.s32.totalorder %s24_s18, 2  ;;  %p190_p2 = scmp.lt.s32.totalorder %s2735_s17, 3 }
   0x5   : > { %s3260_s18 = smov (%p25_p1, %s24_s18), 0  ;;  %p191_p3 = pnand %p1981_p0, %p190_p2 }
   0x6   : > { %p229_p4 = scmp.lt.s32.totalorder (!%p191_p3), %s2727_s15, 1  ;;  %p2569_p5 = scmp.ne.s32.totalorder (!%p191_p3), %s2727_s15, 0 }
   0x7   : > { %194 = sbr.rel (%p191_p3) target bundleno = 365 (0x16d), region = 28 }
   0xc   : > { %v2598_v0 = vld [vmem:[%s3251_s1 + $0x78] sm:$0xff]  ;;  %v2597_v2 = vld [vmem:[%s3251_s1 + $0x70] sm:$0xff]  ;;  %s2794_s25 = scalar_select %p229_p4, %s2727_s15, 1  ;;  %v2596_v6 = vld [vmem:[%s3251_s1 + $0x68] sm:$0xff]  ;;  %vm520_vm0 = vsmask.f32 3328 }
   0xd   : > { %v2606_v1 = vld [vmem:[%s3251_s1 + $0xb8] sm:$0xff]  ;;  %2671 = vmatpush.bf16.msra.mxu1 %v2598_v0  ;;  %374 = vmatpush.bf16.msra.mxu0 %v2598_v0  ;;  %v2605_v3 = vld [vmem:[%s3251_s1 + $0xb0] sm:$0xff]  ;;  %v2604_v7 = vld [vmem:[%s3251_s1 + $0xa8] sm:$0xff]  ;;  %vm521_vm1 = vsmask.f32 7440 }
   0xe   : > { %716 = vmatpush.bf16.msra.mxu2 %v2606_v1  ;;  %v2618_v4 = vld [vmem:[%s3251_s1 + $0xf8] sm:$0xff]  ;;  %s2687_s30 = smul.u32 288, %s2794_s25  ;;  %v2617_v5 = vld [vmem:[%s3251_s1 + $0xf0] sm:$0xff]  ;;  %v2616_v8 = vld [vmem:[%s3251_s1 + $0xe8] sm:$0xff] }
   0xf   : > { %851 = vmatpush.bf16.msra.mxu3 %v2618_v4  ;;  %v2595_v10 = vld [vmem:[%s3251_s1 + $0x60] sm:$0xff]  ;;  %v2594_v23 = vld [vmem:[%s3251_s1 + $0x58] sm:$0xff]  ;;  %v2593_v31 = vld [vmem:[%s3251_s1 + $0x50] sm:$0xff] }
  0x10   : > { %s2812_s11 = scalar_lea.vmem %s3250_s0, %s2687_s30  ;;  %v2603_v12 = vld [vmem:[%s3251_s1 + $0xa0] sm:$0xff]  ;;  %v2602_v25 = vld [vmem:[%s3251_s1 + $0x98] sm:$0xff]  ;;  %v2601_v32 = vld [vmem:[%s3251_s1 + $0x90] sm:$0xff] }
  0x11   : > { %2672 = vmatpush.bf16.msra.mxu1 %v2597_v2  ;;  %375 = vmatpush.bf16.msra.mxu0 %v2597_v2  ;;  %v504_v9 = vld [vmem:[%s2812_s11] sm:$0xf]  ;;  %v506_v11 = vld [vmem:[%s2812_s11 + $0x8] sm:$0xf]  ;;  %v505_v16 = vld [vmem:[%s2812_s11 + $0x4] sm:$0x1] }
  0x12   : > { %717 = vmatpush.bf16.msra.mxu2 %v2605_v3  ;;  %v524_v13 = vshrl.u32 %v504_v9, 16  ;;  %v527_v14 = vshll.u32 %v504_v9, 16  ;;  %v538_v15 = vshrl.u32 %v506_v11, 16  ;;  %v507_v17 = vld [vmem:[%s2812_s11 + $0xc] sm:$0x1]  ;;  %v541_v18 = vshll.u32 %v506_v11, 16  ;;  %vm2849_vm2 = vmor %vm520_vm0, %vm521_vm1 }
  0x13   : > { %852 = vmatpush.bf16.msra.mxu3 %v2617_v5  ;;  %v2615_v19 = vld [vmem:[%s3251_s1 + $0xe0] sm:$0xff]  ;;  %v533_v27 = vshll.u32 %v505_v16, 16  ;;  %v547_v28 = vshll.u32 %v507_v17, 16  ;;  %v2614_v30 = vld [vmem:[%s3251_s1 + $0xd8] sm:$0xff]  ;;  %v508_v37 = vld [vmem:[%s2812_s11 + $0x10] sm:$0xf] }
  0x14   : > { %v526_v20 = vrot.slane %v524_v13, 4  ;;  %v529_v21 = vrot.slane %v527_v14, 5  ;;  %v540_v22 = vrot.slane %v538_v15, 4  ;;  %v543_v24 = vrot.slane %v541_v18, 5  ;;  %v510_v39 = vld [vmem:[%s2812_s11 + $0x18] sm:$0xf] }
  0x15   : > { %2673 = vmatpush.bf16.msra.mxu1 %v2596_v6  ;;  %376 = vmatpush.bf16.msra.mxu0 %v2596_v6  ;;  %v535_v34 = vrot.slane %v533_v27, 5  ;;  %v549_v36 = vrot.slane %v547_v28, 5  ;;  %v2613_v40 = vld [vmem:[%s3251_s1 + $0xd0] sm:$0xff]  ;;  %v2592_v41 = vld [vmem:[%s3251_s1 + $0x48] sm:$0xff]  ;;  %v552_v42 = vshrl.u32 %v508_v37, 16  ;;  %v555_v43 = vshll.u32 %v508_v37, 16 }
  0x16   : > { %718 = vmatpush.bf16.msra.mxu2 %v2604_v7  ;;  %v530_v26 = vor.u32 %v529_v21, %v526_v20  ;;  %v544_v29 = vor.u32 %v543_v24, %v540_v22  ;;  %v2600_v44 = vld [vmem:[%s3251_s1 + $0x88] sm:$0xff]  ;;  %v566_v47 = vshrl.u32 %v510_v39, 16  ;;  %v569_v48 = vshll.u32 %v510_v39, 16  ;;  %v2591_v49 = vld [vmem:[%s3251_s1 + $0x40] sm:$0xff]  ;;  %v2589_v51 = vld [vmem:[%s2812_s11 + $0x6c] sm:$0xf0] }
  0x17   : > { %853 = vmatpush.bf16.msra.mxu3 %v2616_v8  ;;  %v2019_v50 = vld [vmem:[%s2812_s11 + $0x68] sm:$0xf]  ;;  %v2586_v52 = vld [vmem:[%s3251_s1 + $0x38] sm:$0xff]  ;;  %v2599_v54 = vld [vmem:[%s3251_s1 + $0x80] sm:$0xff]  ;;  %v554_v60 = vrot.slane %v552_v42, 4  ;;  %v557_v61 = vrot.slane %v555_v43, 5 }
  0x18   : > { %v531_v33 = vrot.slane %v530_v26, 4  ;;  %v545_v35 = vrot.slane %v544_v29, 4  ;;  %v2612_v53 = vld [vmem:[%s3251_s1 + $0xc8] sm:$0xff]  ;;  %v2587_v56 = vld [vmem:[%s2812_s11 + $0x4c] sm:$0xf0]  ;;  %v568_v62 = vrot.slane %v566_v47, 4  ;;  %v2020_v3 = vor.u32 %v2589_v51, %v2019_v50 }
  0x19   : > { %2674 = vmatpush.bf16.msra.mxu1 %v2595_v10  ;;  %377 = vmatpush.bf16.msra.mxu0 %v2595_v10  ;;  %v2011_v55 = vld [vmem:[%s2812_s11 + $0x48] sm:$0xf]  ;;  %v509_v59 = vld [vmem:[%s2812_s11 + $0x14] sm:$0x1]  ;;  %v571_v63 = vrot.slane %v569_v48, 5  ;;  %v2630_v0 = vld [vmem:[%s3251_s1 + $0x138] sm:$0xff]  ;;  %v558_v11 = vor.u32 %v557_v61, %v554_v60 }
  0x1a   : > { %719 = vmatpush.bf16.msra.mxu2 %v2603_v12  ;;  %v536_v45 = vsel %vm2849_vm2, %v531_v33, %v535_v34  ;;  %v550_v46 = vsel %vm2849_vm2, %v545_v35, %v549_v36  ;;  %v2650_v1 = vld [vmem:[%s3251_s1 + $0x1b8] sm:$0xff]  ;;  %v2012_v4 = vor.u32 %v2587_v56, %v2011_v55  ;;  %v2611_v6 = vld [vmem:[%s3251_s1 + $0xc0] sm:$0xff]  ;;  %v2179_v7 = vld [vmem:[%s2812_s11 + $0x90] sm:$0xf]  ;;  %v561_v9 = vshll.u32 %v509_v59, 16 }
  0x1b   : > { %854 = vmatpush.bf16.msra.mxu3 %v2615_v19  ;;  %v652_v57 = vunpack.c.l.b16 %v536_v45  ;;  %v653_v58 = vunpack.c.l.b16 %v550_v46  ;;  %v511_v2 = vld [vmem:[%s2812_s11 + $0x1c] sm:$0x1]  ;;  %v2607_v8 = vld [vmem:[%s2812_s11 + $0x94] sm:$0xf0]  ;;  %v2585_v10 = vld [vmem:[%s3251_s1 + $0x30] sm:$0xff]  ;;  %v572_v12 = vor.u32 %v571_v63, %v568_v62  ;;  %v559_v20 = vrot.slane %v558_v11, 4 }
  0x1c   : > { %v575_v13 = vshll.u32 %v511_v2, 16  ;;  %v2662_v14 = vld [vmem:[%s3251_s1 + $0x1f8] sm:$0xff]  ;;  %v2629_v15 = vld [vmem:[%s3251_s1 + $0x130] sm:$0xff]  ;;  %v2180_v17 = vor.u32 %v2607_v8, %v2179_v7  ;;  %v2584_v18 = vld [vmem:[%s3251_s1 + $0x28] sm:$0xff]  ;;  %v563_v19 = vrot.slane %v561_v9, 5 }
  0x1d   : > { %2675 = vmatpush.bf16.msra.mxu1 %v2594_v23  ;;  %378 = vmatpush.bf16.msra.mxu0 %v2594_v23  ;;  %v660_v5 = vpack.c.b16 %v653_v58, %v652_v57  ;;  %v2649_v16 = vld [vmem:[%s3251_s1 + $0x1b0] sm:$0xff]  ;;  %v573_v21 = vrot.slane %v572_v12, 4  ;;  %v512_v24 = vld [vmem:[%s2812_s11 + $0x20] sm:$0xf]  ;;  %v2648_v26 = vld [vmem:[%s3251_s1 + $0x1a8] sm:$0xff] }
  0x1e   : > { %720 = vmatpush.bf16.msra.mxu2 %v2602_v25  ;;  %v577_v22 = vrot.slane %v575_v13, 5  ;;  %v2661_v23 = vld [vmem:[%s3251_s1 + $0x1f0] sm:$0xff]  ;;  %v2628_v25 = vld [vmem:[%s3251_s1 + $0x128] sm:$0xff]  ;;  %v580_v28 = vshrl.u32 %v512_v24, 16  ;;  %v583_v29 = vshll.u32 %v512_v24, 16  ;;  %v2627_v36 = vld [vmem:[%s3251_s1 + $0x120] sm:$0xff] }
  0x1f   : > { %855 = vmatpush.bf16.msra.mxu3 %v2614_v30  ;;  %v514_v27 = vld [vmem:[%s2812_s11 + $0x28] sm:$0xf]  ;;  %v2583_v30 = vld [vmem:[%s3251_s1 + $0x20] sm:$0xff]  ;;  %v2023_v39 = vld [vmem:[%s2812_s11 + $0x78] sm:$0xf] }
  0x20   : > { %v594_v33 = vshrl.u32 %v514_v27, 16  ;;  %v597_v34 = vshll.u32 %v514_v27, 16  ;;  %v2660_v35 = vld [vmem:[%s3251_s1 + $0x1e8] sm:$0xff]  ;;  %v2647_v37 = vld [vmem:[%s3251_s1 + $0x1a0] sm:$0xff]  ;;  %v582_v45 = vrot.slane %v580_v28, 4  ;;  %v585_v46 = vrot.slane %v583_v29, 5 }
  0x21   : > { %2676 = vmatpush.bf16.msra.mxu1 %v2593_v31  ;;  %379 = vmatpush.bf16.msra.mxu0 %v2593_v31  ;;  %v564_v31 = vsel %vm2849_vm2, %v559_v20, %v563_v19  ;;  %v2588_v42 = vld [vmem:[%s2812_s11 + $0x5c] sm:$0xf0]  ;;  %v2582_v47 = vld [vmem:[%s3251_s1 + $0x18] sm:$0xff]  ;;  %v513_v51 = vld [vmem:[%s2812_s11 + $0x24] sm:$0x1] }
  0x22   : > { %721 = vmatpush.bf16.msra.mxu2 %v2601_v32  ;;  %v578_v32 = vsel %vm2849_vm2, %v573_v21, %v577_v22  ;;  %v654_v43 = vunpack.c.l.b16 %v564_v31  ;;  %v596_v48 = vrot.slane %v594_v33, 4  ;;  %v2626_v50 = vld [vmem:[%s3251_s1 + $0x118] sm:$0xff]  ;;  %v2183_v56 = vld [vmem:[%s2812_s11 + $0xa0] sm:$0xf]  ;;  %v2608_v57 = vld [vmem:[%s2812_s11 + $0xa4] sm:$0xf0]  ;;  %v586_v58 = vor.u32 %v585_v46, %v582_v45 }
  0x23   : > { %856 = vmatpush.bf16.msra.mxu3 %v2613_v40  ;;  %v2590_v40 = vld [vmem:[%s2812_s11 + $0x7c] sm:$0xf0]  ;;  %v2581_v59 = vld [vmem:[%s3251_s1 + $0x10] sm:$0xff]  ;;  %v589_v60 = vshll.u32 %v513_v51, 16  ;;  %v2580_v2 = vld [vmem:[%s3251_s1 + $0x8] sm:$0xff] }
  0x24   : > { %v2625_v63 = vld [vmem:[%s3251_s1 + $0x110] sm:$0xff]  ;;  %v2659_v7 = vld [vmem:[%s3251_s1 + $0x1e0] sm:$0xff]  ;;  %v2624_v9 = vld [vmem:[%s3251_s1 + $0x108] sm:$0xff] }
  0x25   : > { %2677 = vmatpush.bf16.msra.mxu1 %v2592_v41  ;;  %380 = vmatpush.bf16.msra.mxu0 %v2592_v41  ;;  %v2015_v41 = vld [vmem:[%s2812_s11 + $0x58] sm:$0xf]  ;;  %v516_v8 = vld [vmem:[%s2812_s11 + $0x30] sm:$0xf]  ;;  %v2623_v21 = vld [vmem:[%s3251_s1 + $0x100] sm:$0xff] }
  0x26   : > { %722 = vmatpush.bf16.msra.mxu2 %v2600_v44  ;;  %v655_v44 = vunpack.c.l.b16 %v578_v32  ;;  %v2645_v11 = vld [vmem:[%s3251_s1 + $0x190] sm:$0xff]  ;;  %v608_v12 = vshrl.u32 %v516_v8, 16  ;;  %v611_v13 = vshll.u32 %v516_v8, 16  ;;  %v2638_v20 = vld [vmem:[%s3251_s1 + $0x178] sm:$0xff]  ;;  %v2059_v22 = vld [vmem:[%s2812_s11] sm:$0xf] }
  0x27   : > { %857 = vmatpush.bf16.msra.mxu3 %v2612_v53  ;;  %v2024_v53 = vor.u32 %v2590_v40, %v2023_v39  ;;  %v2670_v24 = vld [vmem:[%s3251_s1 + $0x238] sm:$0xff]  ;;  %v2637_v33 = vld [vmem:[%s3251_s1 + $0x170] sm:$0xff] }
  0x28   : > { %v661_v55 = vpack.c.b16 %v655_v44, %v654_v43  ;;  %v610_v29 = vrot.slane %v608_v12, 4  ;;  %v2187_v40 = vld [vmem:[%s2812_s11 + $0xb0] sm:$0xf]  ;;  %v2632_v12 = vld [vmem:[%s3251_s1 + $0x148] sm:$0xff] }
  0x29   : > { %2678 = vmatpush.bf16.msra.mxu1 %v2591_v49  ;;  %381 = vmatpush.bf16.msra.mxu0 %v2591_v49  ;;  %v599_v49 = vrot.slane %v597_v34, 5  ;;  %v517_v34 = vld [vmem:[%s2812_s11 + $0x34] sm:$0x1] }
  0x2a   : > { %723 = vmatpush.bf16.msra.mxu2 %v2599_v54  ;;  %v2016_v54 = vor.u32 %v2588_v42, %v2015_v41  ;;  %v2609_v41 = vld [vmem:[%s2812_s11 + $0xb4] sm:$0xf0]  ;;  %v2669_v43 = vld [vmem:[%s3251_s1 + $0x230] sm:$0xff]  ;;  %v617_v44 = vshll.u32 %v517_v34, 16 }
  0x2b   : > { %858 = vmatpush.bf16.msra.mxu3 %v2611_v6  ;;  %v600_v61 = vor.u32 %v599_v49, %v596_v48  ;;  %v2644_v48 = vld [vmem:[%s3251_s1 + $0x188] sm:$0xff]  ;;  %v2188_v49 = vor.u32 %v2609_v41, %v2187_v40  ;;  %v2507_v34 = vld [vmem:[%s2812_s11 + $0x10] sm:$0xf] }
  0x2c   : > { %392 = vmatmul.bf16.vlgmr.msra.gmra.mxu1 %v2020_v3  ;;  %382 = vmatmul.bf16.vlgmr.msra.gmra.mxu0 %v2012_v4  ;;  %v587_v3 = vrot.slane %v586_v58, 4  ;;  %v591_v4 = vrot.slane %v589_v60, 5  ;;  %v619_v51 = vrot.slane %v617_v44, 5  ;;  %v2656_v58 = vld [vmem:[%s3251_s1 + $0x1c8] sm:$0xff]  ;;  %v2071_v44 = vld [vmem:[%s2812_s11 + $0x30] sm:$0xf] }
  0x2d   : > { %475 = vmatpush.bf16.msrb.mxu1 %v2586_v52  ;;  %986 = vmatpush.bf16.msrb.mxu0 %v2630_v0  ;;  %v515_v52 = vld [vmem:[%s2812_s11 + $0x2c] sm:$0x1]  ;;  %v2184_v0 = vor.u32 %v2608_v57, %v2183_v56  ;;  %v2635_v57 = vld [vmem:[%s3251_s1 + $0x160] sm:$0xff] }
  0x2e   : > { %1367 = vmatpush.bf16.msrb.mxu2 %v2650_v1  ;;  %859 = vmatmul.bf16.vlgmr.msra.gmra.mxu3 %v2180_v17  ;;  %v603_v62 = vshll.u32 %v515_v52, 16  ;;  %v2646_v1 = vld [vmem:[%s3251_s1 + $0x198] sm:$0xff]  ;;  %v2668_v56 = vld [vmem:[%s3251_s1 + $0x228] sm:$0xff] }
  0x2f   : > { %724 = vmatmul.bf16.vlgmr.msra.gmra.mxu2 %v660_v5  ;;  %1502 = vmatpush.bf16.msrb.mxu3 %v2662_v14  ;;  %v601_v5 = vrot.slane %v600_v61, 4  ;;  %v2658_v14 = vld [vmem:[%s3251_s1 + $0x1d8] sm:$0xff] }
  0x30   : > { %v605_v6 = vrot.slane %v603_v62, 5  ;;  %v2634_v62 = vld [vmem:[%s3251_s1 + $0x158] sm:$0xff] }
  0x31   : > { %476 = vmatpush.bf16.msrb.mxu1 %v2585_v10  ;;  %987 = vmatpush.bf16.msrb.mxu0 %v2629_v15  ;;  %v518_v10 = vld [vmem:[%s2812_s11 + $0x38] sm:$0xf]  ;;  %v2579_v15 = vld [vmem:[%s3251_s1] sm:$0xff] }
  0x32   : > { %1368 = vmatpush.bf16.msrb.mxu2 %v2649_v16  ;;  %v592_v16 = vsel %vm2849_vm2, %v587_v3, %v591_v4  ;;  %v606_v17 = vsel %vm2849_vm2, %v601_v5, %v605_v6  ;;  %v625_v19 = vshll.u32 %v518_v10, 16  ;;  %v2633_v5 = vld [vmem:[%s3251_s1 + $0x150] sm:$0xff] }
  0x33   : > { %1503 = vmatpush.bf16.msrb.mxu3 %v2661_v23  ;;  %v2575_v23 = vld [vmem:[%s2812_s11 + $0x4] sm:$0xf0]  ;;  %v656_v27 = vunpack.c.l.b16 %v592_v16  ;;  %v657_v28 = vunpack.c.l.b16 %v606_v17  ;;  %v2665_v16 = vld [vmem:[%s3251_s1 + $0x210] sm:$0xff]  ;;  %v2067_v17 = vld [vmem:[%s2812_s11 + $0x20] sm:$0xf] }
  0x34   : > { %v627_v32 = vrot.slane %v625_v19, 5  ;;  %v2577_v19 = vld [vmem:[%s2812_s11 + $0x24] sm:$0xf0] }
  0x35   : > { %477 = vmatpush.bf16.msrb.mxu1 %v2584_v18  ;;  %988 = vmatpush.bf16.msrb.mxu0 %v2628_v25  ;;  %v622_v18 = vshrl.u32 %v518_v10, 16  ;;  %v2251_v25 = vld [vmem:[%s2812_s11 + $0xd8] sm:$0xf]  ;;  %v662_v39 = vpack.c.b16 %v657_v28, %v656_v27  ;;  %v2610_v10 = vld [vmem:[%s2812_s11 + $0xc4] sm:$0xf0] }
  0x36   : > { %1369 = vmatpush.bf16.msrb.mxu2 %v2648_v26  ;;  %v2619_v26 = vld [vmem:[%s2812_s11 + $0xdc] sm:$0xf0]  ;;  %v2459_v27 = vld [vmem:[%s2812_s11 + $0x50] sm:$0xf]  ;;  %v2651_v28 = vld [vmem:[%s2812_s11 + $0x54] sm:$0xf0] }
  0x37   : > { %1504 = vmatpush.bf16.msrb.mxu3 %v2660_v35  ;;  %v624_v31 = vrot.slane %v622_v18, 4  ;;  %v519_v35 = vld [vmem:[%s2812_s11 + $0x3c] sm:$0x1]  ;;  %v2664_v18 = vld [vmem:[%s3251_s1 + $0x208] sm:$0xff] }
  0x38   : > { %v631_v46 = vshll.u32 %v519_v35, 16 }
  0x39   : > { %478 = vmatpush.bf16.msrb.mxu1 %v2583_v30  ;;  %989 = vmatpush.bf16.msrb.mxu0 %v2627_v36  ;;  %v613_v30 = vrot.slane %v611_v13, 5  ;;  %v2060_v36 = vor.u32 %v2575_v23, %v2059_v22  ;;  %v628_v45 = vor.u32 %v627_v32, %v624_v31  ;;  %v2655_v13 = vld [vmem:[%s3251_s1 + $0x1c0] sm:$0xff]  ;;  %v2387_v22 = vld [vmem:[%s2812_s11 + $0x8] sm:$0xf]  ;;  %v2639_v23 = vld [vmem:[%s2812_s11 + $0xc] sm:$0xf0] }
  0x3a   : > { %1370 = vmatpush.bf16.msrb.mxu2 %v2647_v37  ;;  %v2252_v37 = vor.u32 %v2619_v26, %v2251_v25  ;;  %v2388_v26 = vor.u32 %v2639_v23, %v2387_v22  ;;  %v2297_v31 = vld [vmem:[%s2812_s11 + $0x90] sm:$0xf]  ;;  %v2299_v32 = vld [vmem:[%s2812_s11 + $0x98] sm:$0xf] }
  0x3b   : > { %1505 = vmatpush.bf16.msrb.mxu3 %v2659_v7  ;;  %v614_v42 = vor.u32 %v613_v30, %v610_v29  ;;  %v629_v52 = vrot.slane %v628_v45, 4  ;;  %v2460_v29 = vor.u32 %v2651_v28, %v2459_v27  ;;  %v2663_v30 = vld [vmem:[%s3251_s1 + $0x200] sm:$0xff]  ;;  %v1040_v35 = vshrl.u32 %v2297_v31, 16  ;;  %v2578_v45 = vld [vmem:[%s2812_s11 + $0x34] sm:$0xf0] }
  0x3c   : > { %397 = vmatmul.bf16.gmra.mxu1 %v2024_v53  ;;  %387 = vmatmul.bf16.gmra.mxu0 %v2016_v54  ;;  %v633_v53 = vrot.slane %v631_v46, 5  ;;  %v2643_v54 = vld [vmem:[%s3251_s1 + $0x180] sm:$0xff]  ;;  %v2263_v46 = vld [vmem:[%s2812_s11 + $0x108] sm:$0xf] }
  0x3d   : > { %479 = vmatpush.bf16.msrb.mxu1 %v2582_v47  ;;  %990 = vmatpush.bf16.msrb.mxu0 %v2626_v50  ;;  %v2636_v47 = vld [vmem:[%s3251_s1 + $0x168] sm:$0xff]  ;;  %v615_v50 = vrot.slane %v614_v42, 4  ;;  %v1570_v42 = vshrl.u32 %v2507_v34, 16 }
  0x3e   : > { %1371 = vmatpush.bf16.msrb.mxu2 %v2646_v1  ;;  %864 = vmatmul.bf16.gmra.mxu3 %v2184_v0  ;;  %v634_v61 = vsel %vm2849_vm2, %v629_v52, %v633_v53  ;;  %v2576_v0 = vld [vmem:[%s2812_s11 + $0x14] sm:$0xf0]  ;;  %v2255_v1 = vld [vmem:[%s2812_s11 + $0xe8] sm:$0xf] }
  0x3f   : > { %729 = vmatmul.bf16.gmra.mxu2 %v661_v55  ;;  %1506 = vmatpush.bf16.msrb.mxu3 %v2658_v14  ;;  %v2657_v55 = vld [vmem:[%s3251_s1 + $0x1d0] sm:$0xff]  ;;  %v620_v60 = vsel %vm2849_vm2, %v615_v50, %v619_v51  ;;  %v659_v4 = vunpack.c.l.b16 %v634_v61  ;;  %v2666_v14 = vld [vmem:[%s3251_s1 + $0x218] sm:$0xff]  ;;  %v1042_v51 = vrot.slane %v1040_v35, 4 }
  0x40   : > { %v658_v3 = vunpack.c.l.b16 %v620_v60  ;;  %v2300_v50 = vld [vmem:[%s2812_s11 + $0x9c] sm:$0x1]  ;;  %v2506_v60 = vld [vmem:[%s2812_s11 + $0xc] sm:$0x1]  ;;  %v2508_v61 = vld [vmem:[%s2812_s11 + $0x14] sm:$0x1] }
  0x41   : > { %480 = vmatpush.bf16.msrb.mxu1 %v2581_v59  ;;  %991 = vmatpush.bf16.msrb.mxu0 %v2625_v63  ;;  %v2667_v59 = vld [vmem:[%s3251_s1 + $0x220] sm:$0xff]  ;;  %v2063_v63 = vld [vmem:[%s2812_s11 + $0x10] sm:$0xf] }
  0x42   : > { %1372 = vmatpush.bf16.msrb.mxu2 %v2645_v11  ;;  %v2064_v6 = vor.u32 %v2576_v0, %v2063_v63  ;;  %v663_v8 = vpack.c.b16 %v659_v4, %v658_v3  ;;  %v1063_v0 = vshll.u32 %v2300_v50, 16 }
  0x43   : > { %1507 = vmatpush.bf16.msrb.mxu3 %v2657_v55  ;;  %v2640_v55 = vld [vmem:[%s2812_s11 + $0x1c] sm:$0xf0] }
  0x45   : > { %481 = vmatpush.bf16.msrb.mxu1 %v2580_v2  ;;  %992 = vmatpush.bf16.msrb.mxu0 %v2624_v9  ;;  %v2620_v2 = vld [vmem:[%s2812_s11 + $0xec] sm:$0xf0]  ;;  %v2191_v9 = vld [vmem:[%s2812_s11 + $0xc0] sm:$0xf] }
  0x46   : > { %1373 = vmatpush.bf16.msrb.mxu2 %v2644_v48  ;;  %v2256_v7 = vor.u32 %v2620_v2, %v2255_v1  ;;  %v2192_v11 = vor.u32 %v2610_v10, %v2191_v9  ;;  %v2391_v48 = vld [vmem:[%s2812_s11 + $0x18] sm:$0xf]  ;;  %v1579_v10 = vshll.u32 %v2508_v61, 16 }
  0x47   : > { %1508 = vmatpush.bf16.msrb.mxu3 %v2656_v58  ;;  %v1572_v58 = vrot.slane %v1570_v42, 4  ;;  %v2392_v2 = vor.u32 %v2640_v55, %v2391_v48  ;;  %v2304_v42 = vld [vmem:[%s2812_s11 + $0xac] sm:$0x1] }
  0x48   : > { %v1581_v23 = vrot.slane %v1579_v10, 5 }
  0x49   : > { %482 = vmatpush.bf16.msrb.mxu1 %v2579_v15  ;;  %993 = vmatpush.bf16.msrb.mxu0 %v2623_v21  ;;  %v2631_v15 = vld [vmem:[%s3251_s1 + $0x140] sm:$0xff] }
  0x4a   : > { %1374 = vmatpush.bf16.msrb.mxu2 %v2643_v54  ;;  %v2621_v21 = vld [vmem:[%s2812_s11 + $0xfc] sm:$0xf0] }
  0x4b   : > { %1509 = vmatpush.bf16.msrb.mxu3 %v2655_v13  ;;  %v2301_v13 = vld [vmem:[%s2812_s11 + $0xa0] sm:$0xf] }
  0x4c   : > { %483 = vmatmul.bf16.vlgmr.msrb.gmra.mxu1 %v2060_v36  ;;  %994 = vmatmul.bf16.vlgmr.msrb.gmra.mxu0 %v2252_v37  ;;  %v1043_v36 = vshll.u32 %v2297_v31, 16  ;;  %v1054_v37 = vshrl.u32 %v2299_v32, 16 }
  0x4d   : > { %1232 = vmatpush.bf16.msra.mxu1 %v2638_v20  ;;  %1748 = vmatpush.bf16.msra.mxu0 %v2670_v24  ;;  %v2259_v20 = vld [vmem:[%s2812_s11 + $0xf8] sm:$0xf] }
  0x4e   : > { %869 = vmatmul.bf16.gmra.mxu3 %v2188_v49  ;;  %2679 = vmatpush.bf16.msra.mxu2 %v2670_v24  ;;  %v2068_v24 = vor.u32 %v2577_v19, %v2067_v17  ;;  %v2260_v25 = vor.u32 %v2621_v21, %v2259_v20  ;;  %v2298_v49 = vld [vmem:[%s2812_s11 + $0x94] sm:$0x1]  ;;  %v1045_v52 = vrot.slane %v1043_v36, 5  ;;  %v1056_v53 = vrot.slane %v1054_v37, 4  ;;  %v2511_v19 = vld [vmem:[%s2812_s11 + $0x20] sm:$0xf] }
  0x4f   : > { %734 = vmatmul.bf16.gmra.mxu2 %v662_v39  ;;  %v1057_v39 = vshll.u32 %v2299_v32, 16  ;;  %v1049_v63 = vshll.u32 %v2298_v49, 16  ;;  %v1601_v31 = vshll.u32 %v2511_v19, 16  ;;  %v2302_v36 = vld [vmem:[%s2812_s11 + $0xa4] sm:$0x1] }
  0x50   : > { %v1046_v3 = vor.u32 %v1045_v52, %v1042_v51  ;;  %v2510_v51 = vld [vmem:[%s2812_s11 + $0x1c] sm:$0x1]  ;;  %v2512_v52 = vld [vmem:[%s2812_s11 + $0x24] sm:$0x1] }
  0x51   : > { %1233 = vmatpush.bf16.msra.mxu1 %v2637_v33  ;;  %1749 = vmatpush.bf16.msra.mxu0 %v2669_v43  ;;  %v2505_v33 = vld [vmem:[%s2812_s11 + $0x8] sm:$0xf]  ;;  %v1059_v54 = vrot.slane %v1057_v39, 5 }
  0x52   : > { %2680 = vmatpush.bf16.msra.mxu2 %v2669_v43  ;;  %v1556_v40 = vshrl.u32 %v2505_v33, 16  ;;  %v1559_v41 = vshll.u32 %v2505_v33, 16  ;;  %v1573_v43 = vshll.u32 %v2507_v34, 16 }
  0x53   : > { %v1060_v4 = vor.u32 %v1059_v54, %v1056_v53  ;;  %v2395_v53 = vld [vmem:[%s2812_s11 + $0x28] sm:$0xf]  ;;  %v2641_v54 = vld [vmem:[%s2812_s11 + $0x2c] sm:$0xf0] }
  0x55   : > { %1234 = vmatpush.bf16.msra.mxu1 %v2636_v47  ;;  %1750 = vmatpush.bf16.msra.mxu0 %v2668_v56  ;;  %v2622_v47 = vld [vmem:[%s2812_s11 + $0x10c] sm:$0xf0] }
  0x56   : > { %2681 = vmatpush.bf16.msra.mxu2 %v2668_v56  ;;  %v1558_v56 = vrot.slane %v1556_v40, 4  ;;  %v2264_v1 = vor.u32 %v2622_v47, %v2263_v46  ;;  %v1603_v46 = vrot.slane %v1601_v31, 5 }
  0x59   : > { %1235 = vmatpush.bf16.msra.mxu1 %v2635_v57  ;;  %1751 = vmatpush.bf16.msra.mxu0 %v2667_v59  ;;  %v1561_v57 = vrot.slane %v1559_v41, 5 }
  0x5a   : > { %2682 = vmatpush.bf16.msra.mxu2 %v2667_v59  ;;  %v1575_v59 = vrot.slane %v1573_v43, 5 }
  0x5c   : > { %488 = vmatmul.bf16.gmra.mxu1 %v2064_v6  ;;  %999 = vmatmul.bf16.gmra.mxu0 %v2256_v7  ;;  %v2652_v6 = vld [vmem:[%s2812_s11 + $0x64] sm:$0xf0]  ;;  %v1562_v7 = vor.u32 %v1561_v57, %v1558_v56  ;;  %v1576_v9 = vor.u32 %v1575_v59, %v1572_v58  ;;  %v1077_v56 = vshll.u32 %v2302_v36, 16  ;;  %v1091_v58 = vshll.u32 %v2304_v42, 16  ;;  %v2306_v42 = vld [vmem:[%s2812_s11 + $0xb4] sm:$0x1] }
  0x5d   : > { %1236 = vmatpush.bf16.msra.mxu1 %v2634_v62  ;;  %1752 = vmatpush.bf16.msra.mxu0 %v2666_v14  ;;  %v2072_v62 = vor.u32 %v2578_v45, %v2071_v44 }
  0x5e   : > { %874 = vmatmul.bf16.gmra.mxu3 %v2192_v11  ;;  %2683 = vmatpush.bf16.msra.mxu2 %v2666_v14  ;;  %v1051_v11 = vrot.slane %v1049_v63, 5  ;;  %v2303_v14 = vld [vmem:[%s2812_s11 + $0xa8] sm:$0xf]  ;;  %v1563_v20 = vrot.slane %v1562_v7, 4  ;;  %v1577_v22 = vrot.slane %v1576_v9, 4  ;;  %v1093_v7 = vrot.slane %v1091_v58, 5 }
  0x5f   : > { %739 = vmatmul.bf16.gmra.mxu2 %v663_v8  ;;  %v1565_v8 = vshll.u32 %v2506_v60, 16  ;;  %v1085_v27 = vshll.u32 %v2303_v14, 16  ;;  %v1593_v60 = vshll.u32 %v2510_v51, 16  ;;  %v2399_v51 = vld [vmem:[%s2812_s11 + $0x38] sm:$0xf] }
  0x60   : > { %v1582_v35 = vsel %vm2849_vm2, %v1577_v22, %v1581_v23  ;;  %v2518_v58 = vld [vmem:[%s2812_s11 + $0x3c] sm:$0x1] }
  0x61   : > { %1237 = vmatpush.bf16.msra.mxu1 %v2633_v5  ;;  %1753 = vmatpush.bf16.msra.mxu0 %v2665_v16  ;;  %v2463_v5 = vld [vmem:[%s2812_s11 + $0x60] sm:$0xf]  ;;  %v1567_v21 = vrot.slane %v1565_v8, 5  ;;  %v1087_v41 = vrot.slane %v1085_v27, 5  ;;  %v1685_v50 = vunpack.c.l.b16 %v1582_v35  ;;  %v1595_v9 = vrot.slane %v1593_v60, 5 }
  0x62   : > { %2684 = vmatpush.bf16.msra.mxu2 %v2665_v16  ;;  %v1061_v16 = vrot.slane %v1060_v4, 4  ;;  %v2464_v17 = vor.u32 %v2652_v6, %v2463_v5  ;;  %v1079_v5 = vrot.slane %v1077_v56, 5  ;;  %v2642_v56 = vld [vmem:[%s2812_s11 + $0x3c] sm:$0xf0] }
  0x63   : > { %v1568_v34 = vsel %vm2849_vm2, %v1563_v20, %v1567_v21  ;;  %v2517_v21 = vld [vmem:[%s2812_s11 + $0x38] sm:$0xf] }
  0x64   : > { %v1684_v49 = vunpack.c.l.b16 %v1568_v34  ;;  %v1643_v34 = vshll.u32 %v2517_v21, 16 }
  0x65   : > { %1238 = vmatpush.bf16.msra.mxu1 %v2632_v12  ;;  %1754 = vmatpush.bf16.msra.mxu0 %v2664_v18  ;;  %v1065_v12 = vrot.slane %v1063_v0, 5 }
  0x66   : > { %2685 = vmatpush.bf16.msra.mxu2 %v2664_v18  ;;  %v2509_v18 = vld [vmem:[%s2812_s11 + $0x18] sm:$0xf]  ;;  %v1692_v0 = vpack.c.b16 %v1685_v50, %v1684_v49 }
  0x67   : > { %v1584_v28 = vshrl.u32 %v2509_v18, 16  ;;  %v1066_v33 = vsel %vm2849_vm2, %v1061_v16, %v1065_v12  ;;  %v2305_v12 = vld [vmem:[%s2812_s11 + $0xb0] sm:$0xf] }
  0x68   : > { %v1169_v48 = vunpack.c.l.b16 %v1066_v33  ;;  %v2515_v16 = vld [vmem:[%s2812_s11 + $0x30] sm:$0xf]  ;;  %v1099_v20 = vshll.u32 %v2305_v12, 16  ;;  %v1640_v33 = vshrl.u32 %v2517_v21, 16 }
  0x69   : > { %1239 = vmatpush.bf16.msra.mxu1 %v2631_v15  ;;  %1755 = vmatpush.bf16.msra.mxu0 %v2663_v30  ;;  %v1047_v15 = vrot.slane %v1046_v3, 4  ;;  %v1586_v43 = vrot.slane %v1584_v28, 4  ;;  %v2653_v3 = vld [vmem:[%s2812_s11 + $0x74] sm:$0xf0] }
  0x6a   : > { %2686 = vmatpush.bf16.msra.mxu2 %v2663_v30  ;;  %v1598_v30 = vshrl.u32 %v2511_v19, 16  ;;  %v1096_v19 = vshrl.u32 %v2305_v12, 16  ;;  %v1101_v36 = vrot.slane %v1099_v20, 5 }
  0x6b   : > { %v1052_v32 = vsel %vm2849_vm2, %v1047_v15, %v1051_v11  ;;  %v2513_v15 = vld [vmem:[%s2812_s11 + $0x28] sm:$0xf] }
  0x6c   : > { %493 = vmatmul.bf16.gmra.mxu1 %v2068_v24  ;;  %1004 = vmatmul.bf16.gmra.mxu0 %v2260_v25  ;;  %v1068_v24 = vshrl.u32 %v2301_v13, 16  ;;  %v1071_v25 = vshll.u32 %v2301_v13, 16  ;;  %v1600_v45 = vrot.slane %v1598_v30, 4  ;;  %v1168_v47 = vunpack.c.l.b16 %v1052_v32 }
  0x6d   : > { %v1612_v27 = vshrl.u32 %v2513_v15, 16  ;;  %v1615_v28 = vshll.u32 %v2513_v15, 16  ;;  %v1629_v30 = vshll.u32 %v2515_v16, 16  ;;  %v1098_v35 = vrot.slane %v1096_v19, 4 }
  0x6e   : > { %1510 = vmatmul.bf16.vlgmr.msrb.gmra.mxu3 %v2460_v29  ;;  %v1587_v29 = vshll.u32 %v2509_v18, 16  ;;  %v1070_v37 = vrot.slane %v1068_v24, 4  ;;  %v1073_v39 = vrot.slane %v1071_v25, 5  ;;  %v1604_v61 = vor.u32 %v1603_v46, %v1600_v45  ;;  %v2514_v46 = vld [vmem:[%s2812_s11 + $0x2c] sm:$0x1] }
  0x6f   : > { %1375 = vmatmul.bf16.vlgmr.msrb.gmra.mxu2 %v2388_v26  ;;  %v1082_v26 = vshrl.u32 %v2303_v14, 16  ;;  %v1176_v63 = vpack.c.b16 %v1169_v48, %v1168_v47  ;;  %v2307_v14 = vld [vmem:[%s2812_s11 + $0xb8] sm:$0xf]  ;;  %v1614_v47 = vrot.slane %v1612_v27, 4  ;;  %v1617_v48 = vrot.slane %v1615_v28, 5 }
  0x70   : > { %v1589_v44 = vrot.slane %v1587_v29, 5  ;;  %v1074_v55 = vor.u32 %v1073_v39, %v1070_v37  ;;  %v1605_v10 = vrot.slane %v1604_v61, 4  ;;  %v1110_v24 = vshrl.u32 %v2307_v14, 16  ;;  %v2311_v27 = vld [vmem:[%s2812_s11 + $0xc8] sm:$0xf] }
  0x71   : > { %v1084_v40 = vrot.slane %v1082_v26, 4  ;;  %v1113_v25 = vshll.u32 %v2307_v14, 16  ;;  %v2519_v26 = vld [vmem:[%s2812_s11 + $0x40] sm:$0xf]  ;;  %v1626_v29 = vshrl.u32 %v2515_v16, 16  ;;  %v1631_v50 = vrot.slane %v1629_v30, 5 }
  0x72   : > { %v1590_v59 = vor.u32 %v1589_v44, %v1586_v43  ;;  %v1075_v4 = vrot.slane %v1074_v55, 4  ;;  %v1654_v37 = vshrl.u32 %v2519_v26, 16  ;;  %v1657_v39 = vshll.u32 %v2519_v26, 16  ;;  %v2308_v43 = vld [vmem:[%s2812_s11 + $0xbc] sm:$0x1] }
  0x73   : > { %v1088_v57 = vor.u32 %v1087_v41, %v1084_v40  ;;  %v1112_v44 = vrot.slane %v1110_v24, 4  ;;  %v1115_v45 = vrot.slane %v1113_v25, 5  ;;  %v1628_v49 = vrot.slane %v1626_v29, 4  ;;  %v2309_v24 = vld [vmem:[%s2812_s11 + $0xc0] sm:$0xf] }
  0x74   : > { %v1591_v8 = vrot.slane %v1590_v59, 4  ;;  %v1656_v59 = vrot.slane %v1654_v37, 4  ;;  %v1659_v60 = vrot.slane %v1657_v39, 5  ;;  %v1105_v61 = vshll.u32 %v2306_v42, 16 }
  0x75   : > { %v1089_v6 = vrot.slane %v1088_v57, 4  ;;  %v1102_v57 = vor.u32 %v1101_v36, %v1098_v35  ;;  %v1138_v35 = vshrl.u32 %v2311_v27, 16  ;;  %v1141_v36 = vshll.u32 %v2311_v27, 16 }
  0x76   : > { %v1596_v22 = vsel %vm2849_vm2, %v1591_v8, %v1595_v9  ;;  %v2654_v8 = vld [vmem:[%s2812_s11 + $0x84] sm:$0xf0]  ;;  %v1660_v12 = vor.u32 %v1659_v60, %v1656_v59  ;;  %v1107_v14 = vrot.slane %v1105_v61, 5 }
  0x77   : > { %v1094_v18 = vsel %vm2849_vm2, %v1089_v6, %v1093_v7  ;;  %v1686_v40 = vunpack.c.l.b16 %v1596_v22  ;;  %v2400_v6 = vor.u32 %v2642_v56, %v2399_v51  ;;  %v2471_v7 = vld [vmem:[%s2812_s11 + $0x80] sm:$0xf] }
  0x78   : > { %v1171_v32 = vunpack.c.l.b16 %v1094_v18  ;;  %v2472_v18 = vor.u32 %v2654_v8, %v2471_v7  ;;  %v1661_v25 = vrot.slane %v1660_v12, 4 }
  0x7c   : > { %498 = vmatmul.bf16.gmra.mxu1 %v2072_v62  ;;  %1009 = vmatmul.bf16.gmra.mxu0 %v2264_v1  ;;  %v1607_v62 = vshll.u32 %v2512_v52, 16  ;;  %v2396_v1 = vor.u32 %v2641_v54, %v2395_v53  ;;  %v2516_v52 = vld [vmem:[%s2812_s11 + $0x34] sm:$0x1]  ;;  %v1642_v53 = vrot.slane %v1640_v33, 4  ;;  %v1645_v54 = vrot.slane %v1643_v34, 5 }
  0x7d   : > { %v1127_v34 = vshll.u32 %v2309_v24, 16 }
  0x7e   : > { %1515 = vmatmul.bf16.gmra.mxu3 %v2464_v17  ;;  %v1609_v11 = vrot.slane %v1607_v62, 5  ;;  %v1080_v17 = vsel %vm2849_vm2, %v1075_v4, %v1079_v5  ;;  %v1116_v62 = vor.u32 %v1115_v45, %v1112_v44  ;;  %v1632_v4 = vor.u32 %v1631_v50, %v1628_v49  ;;  %v2312_v50 = vld [vmem:[%s2812_s11 + $0xcc] sm:$0x1] }
  0x7f   : > { %1380 = vmatmul.bf16.gmra.mxu2 %v2392_v2  ;;  %v2467_v2 = vld [vmem:[%s2812_s11 + $0x70] sm:$0xf]  ;;  %v1170_v31 = vunpack.c.l.b16 %v1080_v17  ;;  %v1635_v5 = vshll.u32 %v2516_v52, 16  ;;  %v1646_v9 = vor.u32 %v1645_v54, %v1642_v53  ;;  %v1143_v49 = vrot.slane %v1141_v36, 5 }
  0x80   : > { %v2468_v13 = vor.u32 %v2653_v3, %v2467_v2  ;;  %v1610_v23 = vsel %vm2849_vm2, %v1605_v10, %v1609_v11  ;;  %v1618_v3 = vor.u32 %v1617_v48, %v1614_v47  ;;  %v1649_v10 = vshll.u32 %v2518_v58, 16 }
  0x81   : > { %v1687_v41 = vunpack.c.l.b16 %v1610_v23  ;;  %v1177_v55 = vpack.c.b16 %v1171_v32, %v1170_v31  ;;  %v1103_v11 = vrot.slane %v1102_v57, 4  ;;  %v1117_v15 = vrot.slane %v1116_v62, 4 }
  0x82   : > { %v1619_v19 = vrot.slane %v1618_v3, 4  ;;  %v1633_v20 = vrot.slane %v1632_v4, 4  ;;  %v1637_v21 = vrot.slane %v1635_v5, 5  ;;  %v1647_v22 = vrot.slane %v1646_v9, 4 }
  0x83   : > { %v1693_v2 = vpack.c.b16 %v1687_v41, %v1686_v40  ;;  %v1651_v23 = vrot.slane %v1649_v10, 5  ;;  %v1108_v28 = vsel %vm2849_vm2, %v1103_v11, %v1107_v14  ;;  %v1124_v32 = vshrl.u32 %v2309_v24, 16 }
  0x84   : > { %v1638_v31 = vsel %vm2849_vm2, %v1633_v20, %v1637_v21  ;;  %v1172_v39 = vunpack.c.l.b16 %v1108_v28  ;;  %v1129_v47 = vrot.slane %v1127_v34, 5  ;;  %v1140_v48 = vrot.slane %v1138_v35, 4 }
  0x85   : > { %v1652_v33 = vsel %vm2849_vm2, %v1647_v22, %v1651_v23  ;;  %v1689_v42 = vunpack.c.l.b16 %v1638_v31  ;;  %v1126_v44 = vrot.slane %v1124_v32, 4  ;;  %v1147_v59 = vshll.u32 %v2312_v50, 16 }
  0x86   : > { %v1144_v58 = vor.u32 %v1143_v49, %v1140_v48 }
  0x87   : > { %v1130_v57 = vor.u32 %v1129_v47, %v1126_v44 }
  0x88   : > { %v1145_v62 = vrot.slane %v1144_v58, 4 }
  0x89   : > { %v1131_v60 = vrot.slane %v1130_v57, 4 }
  0x8c   : > { %1240 = vmatmul.bf16.vlgmr.msra.gmra.mxu1 %v1176_v63  ;;  %1756 = vmatmul.bf16.vlgmr.msra.gmra.mxu0 %v1692_v0  ;;  %v1119_v63 = vshll.u32 %v2308_v43, 16  ;;  %v1621_v0 = vshll.u32 %v2514_v46, 16  ;;  %v1690_v43 = vunpack.c.l.b16 %v1652_v33  ;;  %v2310_v46 = vld [vmem:[%s2812_s11 + $0xc4] sm:$0x1] }
  0x8d   : > { %v1133_v53 = vshll.u32 %v2310_v46, 16 }
  0x8e   : > { %1520 = vmatmul.bf16.gmra.mxu3 %v2468_v13  ;;  %v1121_v16 = vrot.slane %v1119_v63, 5  ;;  %v1623_v17 = vrot.slane %v1621_v0, 5  ;;  %v1149_v63 = vrot.slane %v1147_v59, 5 }
  0x8f   : > { %1385 = vmatmul.bf16.gmra.mxu2 %v2396_v1  ;;  %v2520_v1 = vld [vmem:[%s2812_s11 + $0x44] sm:$0x1]  ;;  %v1135_v61 = vrot.slane %v1133_v53, 5  ;;  %s2574_s11 = sshll.u32 %s2794_s25, 6 }
  0x90   : > { %v1663_v13 = vshll.u32 %v2520_v1, 16  ;;  %v1122_v29 = vsel %vm2849_vm2, %v1117_v15, %v1121_v16  ;;  %v1624_v30 = vsel %vm2849_vm2, %v1619_v19, %v1623_v17  ;;  %v1150_v4 = vsel %vm2849_vm2, %v1145_v62, %v1149_v63  ;;  %s3187_s29 = scalar_lea.vmem %s3252_s2, %s2574_s11 }
  0x91   : > { %v1173_v40 = vunpack.c.l.b16 %v1122_v29  ;;  %v1688_v41 = vunpack.c.l.b16 %v1624_v30  ;;  %v1136_v3 = vsel %vm2849_vm2, %v1131_v60, %v1135_v61  ;;  %v1175_v7 = vunpack.c.l.b16 %v1150_v4 }
  0x92   : > { %v1665_v26 = vrot.slane %v1663_v13, 5 }
  0x93   : > { %v1178_v51 = vpack.c.b16 %v1173_v40, %v1172_v39  ;;  %v1694_v52 = vpack.c.b16 %v1689_v42, %v1688_v41 }
  0x94   : > { %v1666_v37 = vsel %vm2849_vm2, %v1661_v25, %v1665_v26 }
  0x95   : > { %v1691_v45 = vunpack.c.l.b16 %v1666_v37 }
  0x97   : > { %v1695_v56 = vpack.c.b16 %v1691_v45, %v1690_v43 }
  0x9c   : > { %1245 = vmatmul.bf16.gmra.mxu1 %v1177_v55  ;;  %1761 = vmatmul.bf16.gmra.mxu0 %v1693_v2 }
  0x9e   : > { %1525 = vmatmul.bf16.gmra.mxu3 %v2472_v18 }
  0x9f   : > { %1390 = vmatmul.bf16.gmra.mxu2 %v2400_v6  ;;  %v1174_v6 = vunpack.c.l.b16 %v1136_v3 }
  0xa1   : > { %v1179_v8 = vpack.c.b16 %v1175_v7, %v1174_v6 }
  0xa9   : > { %v393_v54 = vpop.f32.mrf.mxu1  ;;  %v383_v55 = vpop.f32.mrf.mxu0 }
  0xac   : > { %1250 = vmatmul.bf16.gmra.mxu1 %v1178_v51  ;;  %1766 = vmatmul.bf16.gmra.mxu0 %v1694_v52 }
  0xaf   : > { %1771 = vmatmul.bf16.vlgmr.msra.gmra.mxu2 %v1695_v56 }
  0xb1   : > { %v395_v1 = vpop.f32.mrf.mxu1  ;;  %v385_v2 = vpop.f32.mrf.mxu0 }
  0xb2   : > { %v725_v0 = vpop.f32.mrf.mxu2  ;;  %v860_v5 = vpop.f32.mrf.mxu3 }
  0xb9   : > { %v398_v10 = vpop.f32.mrf.mxu1  ;;  %v388_v11 = vpop.f32.mrf.mxu0 }
  0xba   : > { %v727_v9 = vpop.f32.mrf.mxu2  ;;  %v862_v12 = vpop.f32.mrf.mxu3 }
  0xbc   : > { %1255 = vmatmul.bf16.gmra.mxu1 %v1179_v8 }
  0xc1   : > { %v400_v14 = vpop.f32.mrf.mxu1  ;;  %v390_v15 = vpop.f32.mrf.mxu0 }
  0xc2   : > { %v730_v13 = vpop.f32.mrf.mxu2  ;;  %v3157_v16 = vpop.f32.mrf.mxu3 }
  0xc9   : > { %v484_v18 = vpop.f32.mrf.mxu1  ;;  %v995_v19 = vpop.f32.mrf.mxu0 }
  0xca   : > { %v732_v17 = vpop.f32.mrf.mxu2  ;;  %v485_v20 = vadd.f32 %v484_v18, %v383_v55  ;;  %v3159_v21 = vpop.f32.mrf.mxu3 }
  0xcc   : > { %v745_v38 = vadd.f32 %v725_v0, %v485_v20 }
  0xce   : > { %v880_v62 = vadd.f32 %v860_v5, %v745_v38 }
  0xd0   : > { %v1015_v0 = vadd.f32 %v995_v19, %v880_v62 }
  0xd1   : > { %v486_v23 = vpop.f32.mrf.mxu1  ;;  %v997_v24 = vpop.f32.mrf.mxu0 }
  0xd2   : > { %v735_v22 = vpop.f32.mrf.mxu2  ;;  %v487_v25 = vadd.f32 %v486_v23, %v385_v2  ;;  %v3161_v27 = vpop.f32.mrf.mxu3 }
  0xd4   : > { %v746_v26 = vadd.f32 %v727_v9, %v487_v25 }
  0xd6   : > { %v881_v7 = vadd.f32 %v862_v12, %v746_v26 }
  0xd8   : > { %v1016_v5 = vadd.f32 %v997_v24, %v881_v7 }
  0xd9   : > { %v489_v29 = vpop.f32.mrf.mxu1  ;;  %v1000_v30 = vpop.f32.mrf.mxu0 }
  0xda   : > { %v737_v28 = vpop.f32.mrf.mxu2  ;;  %v490_v31 = vadd.f32 %v489_v29, %v388_v11  ;;  %v3163_v34 = vpop.f32.mrf.mxu3 }
  0xdc   : > { %v747_v32 = vadd.f32 %v730_v13, %v490_v31 }
  0xde   : > { %v882_v12 = vadd.f32 %v3157_v16, %v747_v32 }
  0xe0   : > { %v1017_v20 = vadd.f32 %v1000_v30, %v882_v12 }
  0xe1   : > { %v491_v35 = vpop.f32.mrf.mxu1  ;;  %v1002_v36 = vpop.f32.mrf.mxu0 }
  0xe2   : > { %v740_v33 = vpop.f32.mrf.mxu2  ;;  %v492_v37 = vadd.f32 %v491_v35, %v390_v15  ;;  %v3167_v44 = vpop.f32.mrf.mxu3 }
  0xe4   : > { %v748_v39 = vadd.f32 %v732_v17, %v492_v37 }
  0xe6   : > { %v883_v25 = vadd.f32 %v3159_v21, %v748_v39 }
  0xe8   : > { %v1018_v16 = vadd.f32 %v1002_v36, %v883_v25 }
  0xe9   : > { %v494_v41 = vpop.f32.mrf.mxu1  ;;  %v3165_v42 = vpop.f32.mrf.mxu0 }
  0xea   : > { %v742_v40 = vpop.f32.mrf.mxu2  ;;  %v495_v43 = vadd.f32 %v494_v41, %v393_v54  ;;  %v3173_v51 = vpop.f32.mrf.mxu3 }
  0xec   : > { %v749_v45 = vadd.f32 %v735_v22, %v495_v43 }
  0xee   : > { %v884_v37 = vadd.f32 %v3161_v27, %v749_v45 }
  0xf1   : > { %v496_v47 = vpop.f32.mrf.mxu1  ;;  %v3169_v48 = vpop.f32.mrf.mxu0 }
  0xf2   : > { %v1376_v46 = vpop.f32.mrf.mxu2  ;;  %v497_v49 = vadd.f32 %v496_v47, %v395_v1  ;;  %v1511_v54 = vpop.f32.mrf.mxu3 }
  0xf4   : > { %v3171_v50 = vadd.f32 %v737_v28, %v497_v49 }
  0xf6   : > { %v885_v36 = vadd.f32 %v3163_v34, %v3171_v50 }
  0xf8   : > { %v1020_v27 = vadd.f32 %v3169_v48, %v885_v36 }
  0xf9   : > { %v499_v53 = vpop.f32.mrf.mxu1  ;;  %v3175_v55 = vpop.f32.mrf.mxu0 }
  0xfa   : > { %v1378_v52 = vpop.f32.mrf.mxu2  ;;  %v500_v56 = vadd.f32 %v499_v53, %v398_v10  ;;  %v1513_v1 = vpop.f32.mrf.mxu3 }
  0xfc   : > { %v3177_v57 = vadd.f32 %v740_v33, %v500_v56 }
 0x101   : > { %v501_v59 = vpop.f32.mrf.mxu1  ;;  %v3179_v60 = vpop.f32.mrf.mxu0 }
 0x102   : > { %v1381_v58 = vpop.f32.mrf.mxu2  ;;  %v502_v61 = vadd.f32 %v501_v59, %v400_v14  ;;  %v1516_v15 = vpop.f32.mrf.mxu3 }
 0x104   : > { %v3181_v63 = vadd.f32 %v742_v40, %v502_v61  ;;  %v886_v61 = vadd.f32 %v3167_v44, %v3177_v57 }
 0x106   : > { %v1021_v34 = vadd.f32 %v3175_v55, %v886_v61 }
 0x109   : > { %v1241_v2 = vpop.f32.mrf.mxu1  ;;  %v1757_v3 = vpop.f32.mrf.mxu0 }
 0x10a   : > { %v1261_v4 = vadd.f32 %v1241_v2, %v1015_v0  ;;  %v1383_v6 = vpop.f32.mrf.mxu2  ;;  %v1518_v28 = vpop.f32.mrf.mxu3 }
 0x10c   : > { %v1396_v8 = vadd.f32 %v1376_v46, %v1261_v4  ;;  %v1019_v46 = vadd.f32 %v3165_v42, %v884_v37  ;;  %v887_v4 = vadd.f32 %v3173_v51, %v3181_v63 }
 0x10e   : > { %v1531_v9 = vadd.f32 %v1511_v54, %v1396_v8  ;;  %v1022_v44 = vadd.f32 %v3179_v60, %v887_v4 }
 0x110   : > { %v3189_v10 = vadd.f32 %v1757_v3, %v1531_v9 }
 0x111   : > { %v1243_v11 = vpop.f32.mrf.mxu1  ;;  %v1759_v13 = vpop.f32.mrf.mxu0 }
 0x112   : > { %1785 = vst [vmem:[%s3187_s29] sm:$0xff] %v3189_v10  ;;  %v1262_v14 = vadd.f32 %v1243_v11, %v1016_v5  ;;  %v1386_v18 = vpop.f32.mrf.mxu2  ;;  %v1521_v43 = vpop.f32.mrf.mxu3 }
 0x114   : > { %v1397_v17 = vadd.f32 %v1378_v52, %v1262_v14 }
 0x116   : > { %v1532_v19 = vadd.f32 %v1513_v1, %v1397_v17 }
 0x118   : > { %v3194_v38 = vadd.f32 %v1759_v13, %v1532_v19 }
 0x119   : > { %v1246_v22 = vpop.f32.mrf.mxu1  ;;  %v1762_v23 = vpop.f32.mrf.mxu0 }
 0x11a   : > { %1786 = vst [vmem:[%s3187_s29 + $0x8] sm:$0xff] %v3194_v38  ;;  %v1263_v24 = vadd.f32 %v1246_v22, %v1017_v20  ;;  %v1388_v31 = vpop.f32.mrf.mxu2  ;;  %v1523_v54 = vpop.f32.mrf.mxu3 }
 0x11c   : > { %v1398_v26 = vadd.f32 %v1381_v58, %v1263_v24 }
 0x11e   : > { %v1533_v29 = vadd.f32 %v1516_v15, %v1398_v26 }
 0x120   : > { %v1779_v32 = vadd.f32 %v1762_v23, %v1533_v29 }
 0x121   : > { %v1248_v33 = vpop.f32.mrf.mxu1  ;;  %v1764_v35 = vpop.f32.mrf.mxu0 }
 0x122   : > { %1787 = vst [vmem:[%s3187_s29 + $0x10] sm:$0xff] %v1779_v32  ;;  %v1264_v30 = vadd.f32 %v1248_v33, %v1018_v16  ;;  %v1391_v39 = vpop.f32.mrf.mxu2  ;;  %v1526_v48 = vpop.f32.mrf.mxu3 }
 0x124   : > { %v1399_v40 = vadd.f32 %v1383_v6, %v1264_v30 }
 0x126   : > { %v1534_v41 = vadd.f32 %v1518_v28, %v1399_v40 }
 0x128   : > { %v1780_v21 = vadd.f32 %v1764_v35, %v1534_v41 }
 0x129   : > { %v1251_v47 = vpop.f32.mrf.mxu1  ;;  %v1767_v52 = vpop.f32.mrf.mxu0 }
 0x12a   : > { %1788 = vst [vmem:[%s3187_s29 + $0x18] sm:$0xff] %v1780_v21  ;;  %v1265_v49 = vadd.f32 %v1251_v47, %v1019_v46  ;;  %v1393_v42 = vpop.f32.mrf.mxu2  ;;  %v1528_v55 = vpop.f32.mrf.mxu3 }
 0x12c   : > { %v1400_v53 = vadd.f32 %v1386_v18, %v1265_v49 }
 0x12e   : > { %v1535_v56 = vadd.f32 %v1521_v43, %v1400_v53 }
 0x130   : > { %v1781_v45 = vadd.f32 %v1767_v52, %v1535_v56 }
 0x131   : > { %v1253_v58 = vpop.f32.mrf.mxu1  ;;  %v1769_v0 = vpop.f32.mrf.mxu0 }
 0x132   : > { %1789 = vst [vmem:[%s3187_s29 + $0x20] sm:$0xff] %v1781_v45  ;;  %v1266_v59 = vadd.f32 %v1253_v58, %v1020_v27  ;;  %v1772_v7 = vpop.f32.mrf.mxu2 }
 0x134   : > { %v1401_v62 = vadd.f32 %v1388_v31, %v1266_v59 }
 0x136   : > { %v1536_v1 = vadd.f32 %v1523_v54, %v1401_v62 }
 0x138   : > { %v1782_v50 = vadd.f32 %v1769_v0, %v1536_v1 }
 0x139   : > { %v1256_v2 = vpop.f32.mrf.mxu1 }
 0x13a   : > { %1790 = vst [vmem:[%s3187_s29 + $0x28] sm:$0xff] %v1782_v50  ;;  %v1267_v3 = vadd.f32 %v1256_v2, %v1021_v34  ;;  %v1774_v14 = vpop.f32.mrf.mxu2 }
 0x13c   : > { %v1402_v6 = vadd.f32 %v1391_v39, %v1267_v3 }
 0x13e   : > { %v1537_v8 = vadd.f32 %v1526_v48, %v1402_v6 }
 0x140   : > { %v1783_v57 = vadd.f32 %v1772_v7, %v1537_v8 }
 0x141   : > { %v1258_v9 = vpop.f32.mrf.mxu1 }
 0x142   : > { %1791 = vst [vmem:[%s3187_s29 + $0x30] sm:$0xff] %v1783_v57  ;;  %v1268_v5 = vadd.f32 %v1258_v9, %v1022_v44 }
 0x144   : > { %v1403_v11 = vadd.f32 %v1393_v42, %v1268_v5 }
 0x146   : > { %v1538_v13 = vadd.f32 %v1528_v55, %v1403_v11  ;;  %1796 = sbr.rel (%p2569_p5) target bundleno = 334 (0x14e), region = 32 }
 0x148   : > { %v1784_v15 = vadd.f32 %v1774_v14, %v1538_v13 }
 0x14a   : > { %1792 = vst [vmem:[%s3187_s29 + $0x38] sm:$0xff] %v1784_v15 }
 0x14b   : > { %v2737_v12 = vmov 0.0  }
 0x14c   : > { %1797 = vst [vmem:[%s3253_s3] sm:$0x1] %v2737_v12 }
 0x14d   : > { %1798 = vst [vmem:[%s3254_s4] sm:$0x1] %v2737_v12 }
 0x14e PF: > { %v1800_v51 = vadd.f32 %v3194_v38, %v3189_v10  ;;  %v1816_v60 = vmul.f32 %v3189_v10, %v3189_v10  ;;  %v1817_v63 = vmul.f32 %v3194_v38, %v3194_v38  ;;  %v1818_v17 = vmul.f32 %v1779_v32, %v1779_v32 }
 0x14f   : > { %v1819_v19 = vmul.f32 %v1780_v21, %v1780_v21  ;;  %v1820_v23 = vmul.f32 %v1781_v45, %v1781_v45  ;;  %v1821_v26 = vmul.f32 %v1782_v50, %v1782_v50  ;;  %v1822_v31 = vmul.f32 %v1783_v57, %v1783_v57 }
 0x150   : > { %v1801_v18 = vadd.f32 %v1800_v51, %v1779_v32  ;;  %v1824_v20 = vadd.f32 %v1817_v63, %v1816_v60  ;;  %v1823_v35 = vmul.f32 %v1784_v15, %v1784_v15 }
 0x152   : > { %v1802_v22 = vadd.f32 %v1801_v18, %v1780_v21  ;;  %v1825_v24 = vadd.f32 %v1824_v20, %v1818_v17 }
 0x153   : > { %v1799_v52 = vld [vmem:[%s3253_s3] sm:$0x1] }
 0x154   : > { %v1803_v25 = vadd.f32 %v1802_v22, %v1781_v45  ;;  %v1826_v28 = vadd.f32 %v1825_v24, %v1819_v19  ;;  %v1815_v56 = vld [vmem:[%s3254_s4] sm:$0x1] }
 0x156   : > { %v1804_v29 = vadd.f32 %v1803_v25, %v1782_v50  ;;  %v1827_v16 = vadd.f32 %v1826_v28, %v1820_v23 }
 0x158   : > { %v1805_v33 = vadd.f32 %v1804_v29, %v1783_v57  ;;  %v1828_v30 = vadd.f32 %v1827_v16, %v1821_v26 }
 0x15a   : > { %v1806_v10 = vadd.f32 %v1805_v33, %v1784_v15  ;;  %v1829_v37 = vadd.f32 %v1828_v30, %v1822_v31 }
 0x15c   : > { %v1807_v40 = vrot.slane %v1806_v10, 4  ;;  %v1830_v38 = vadd.f32 %v1829_v37, %v1823_v35 }
 0x15e   : > { %v1808_v41 = vadd.f32 %v1807_v40, %v1806_v10  ;;  %v1831_v32 = vrot.slane %v1830_v38, 4 }
 0x160   : > { %v1809_v43 = vrot.slane %v1808_v41, 2  ;;  %v1832_v46 = vadd.f32 %v1831_v32, %v1830_v38 }
 0x162   : > { %v1810_v21 = vadd.f32 %v1809_v43, %v1808_v41  ;;  %v1833_v39 = vrot.slane %v1832_v46, 2 }
 0x164   : > { %v1811_v47 = vrot.slane %v1810_v21, 1  ;;  %v1834_v49 = vadd.f32 %v1833_v39, %v1832_v46 }
 0x166   : > { %v1812_v36 = vadd.f32 %v1811_v47, %v1810_v21  ;;  %v1835_v53 = vrot.slane %v1834_v49, 1 }
 0x168   : > { %v1813_v27 = vadd.f32 %v1812_v36, %v1799_v52  ;;  %v1836_v45 = vadd.f32 %v1835_v53, %v1834_v49 }
 0x16a   : > { %1814 = vst [vmem:[%s3253_s3] sm:$0x1] %v1813_v27  ;;  %v1837_v54 = vadd.f32 %v1836_v45, %v1815_v56 }
 0x16c   : > { %1838 = vst [vmem:[%s3254_s4] sm:$0x1] %v1837_v54 }
 0x16d PF: > { %s15_s17 = sadd.s32 1, %s2735_s17   ;;  %s3257_s15 = smov %s2731_s16 }
 0x16e   : > { %p12_p6 = scmp.ge.s32.totalorder %s15_s17, 4   ;;  %s3258_s16 = smov %s3260_s18 }
 0x170   :  { %14 = sbr.rel (!%p12_p6) target bundleno = 2 (0x2), region = 102 }

// kernel: base_block_forward.6
= control target key start
LH: loop header
LB: loop body
LE: loop exit
PB: predicated region body
PF: predicated region fallthrough
CT: control target
= control target key end

     0   :  { %s2831_s15 = smov 0   ;;  %s2833_s16 = smov 0   ;;  %s3494_s0 = inlined_call_operand.vmem [shape: bf16[2,10,10,128], index: 0, kind: input, shape index: {}]   ;;  %s3495_s1 = inlined_call_operand.vmem [shape: bf16[9,128,128], index: 1, kind: input, shape index: {}]   ;;  %s3496_s2 = inlined_call_operand.vmem [shape: f32[2,64,128], index: 2, kind: output, shape index: {0}]   ;;  %s3497_s3 = inlined_call_operand.vmem [shape: f32[1,128], index: 3, kind: output, shape index: {1}]   ;;  %s3498_s4 = inlined_call_operand.vmem [shape: f32[1,128], index: 4, kind: output, shape index: {2}]  }
   0x1   :  { %s2835_s17 = smov 0  }
   0x2 LB: > { %s24_s18 = sadd.s32 1, %s2799_s16  ;;  %p2093_p0 = scmp.ge.s32.totalorder %s2803_s17, 1  ;;  %s2803_s17 = sphi %s2835_s17, %s15_s17   ;;  %s2799_s16 = sphi %s2833_s16, %s3504_s16   ;;  %s2795_s15 = sphi %s2831_s15, %s3503_s15  }
   0x3   : > { %p25_p1 = scmp.ge.s32.totalorder %s24_s18, 2  ;;  %p190_p2 = scmp.lt.s32.totalorder %s2803_s17, 3 }
   0x5   : > { %s3506_s18 = smov (%p25_p1, %s24_s18), 0  ;;  %p191_p3 = pnand %p2093_p0, %p190_p2 }
   0x6   : > { %p229_p4 = scmp.lt.s32.totalorder (!%p191_p3), %s2795_s15, 1  ;;  %p2649_p5 = scmp.ne.s32.totalorder (!%p191_p3), %s2795_s15, 0 }
   0x7   : > { %194 = sbr.rel (%p191_p3) target bundleno = 365 (0x16d), region = 28 }
   0xc   : > { %v2674_v0 = vld [vmem:[%s3495_s1 + $0x78] sm:$0xff]  ;;  %v2673_v2 = vld [vmem:[%s3495_s1 + $0x70] sm:$0xff]  ;;  %s2862_s25 = scalar_select %p229_p4, %s2795_s15, 1  ;;  %v2672_v6 = vld [vmem:[%s3495_s1 + $0x68] sm:$0xff]  ;;  %vm284_vm0 = vsmask.f32 3328 }
   0xd   : > { %v2682_v1 = vld [vmem:[%s3495_s1 + $0xb8] sm:$0xff]  ;;  %2739 = vmatpush.bf16.msra.mxu1 %v2674_v0  ;;  %480 = vmatpush.bf16.msra.mxu0 %v2674_v0  ;;  %v2681_v3 = vld [vmem:[%s3495_s1 + $0xb0] sm:$0xff]  ;;  %v2680_v7 = vld [vmem:[%s3495_s1 + $0xa8] sm:$0xff]  ;;  %vm285_vm1 = vsmask.f32 7440  ;;  %vm634_vm2 = vcmask 1042432  }
   0xe   : > { %750 = vmatpush.bf16.msra.mxu2 %v2682_v1  ;;  %v2694_v4 = vld [vmem:[%s3495_s1 + $0xf8] sm:$0xff]  ;;  %s2755_s30 = smul.u32 80, %s2862_s25  ;;  %v2693_v5 = vld [vmem:[%s3495_s1 + $0xf0] sm:$0xff]  ;;  %v2671_v11 = vld [vmem:[%s3495_s1 + $0x60] sm:$0xff]  ;;  %vm635_vm3 = vcmask 1046532  }
   0xf   : > { %885 = vmatpush.bf16.msra.mxu3 %v2694_v4  ;;  %v2679_v16 = vld [vmem:[%s3495_s1 + $0xa0] sm:$0xff]  ;;  %v2692_v17 = vld [vmem:[%s3495_s1 + $0xe8] sm:$0xff]  ;;  %v2670_v29 = vld [vmem:[%s3495_s1 + $0x58] sm:$0xff] }
  0x10   : > { %s2883_s13 = scalar_lea.vmem %s3494_s0, %s2755_s30  ;;  %v2691_v34 = vld [vmem:[%s3495_s1 + $0xe0] sm:$0xff]  ;;  %v2678_v44 = vld [vmem:[%s3495_s1 + $0x98] sm:$0xff]  ;;  %vm2921_vm4 = vmor %vm284_vm0, %vm285_vm1 }
  0x11   : > { %2740 = vmatpush.bf16.msra.mxu1 %v2673_v2  ;;  %481 = vmatpush.bf16.msra.mxu0 %v2673_v2  ;;  %v256_v8 = vld [vmem:[%s2883_s13 + $0x20] sm:$0xf]  ;;  %v257_v9 = vld [vmem:[%s2883_s13 + $0x28] sm:$0xf]  ;;  %v2888_v10 = vld [vmem:[%s2883_s13 + $0x24] sm:$0x1] }
  0x12   : > { %751 = vmatpush.bf16.msra.mxu2 %v2681_v3  ;;  %v2894_v12 = vld [vmem:[%s2883_s13 + $0x2c] sm:$0x1]  ;;  %v344_v13 = vshrl.u32 %v256_v8, 16  ;;  %v347_v14 = vshll.u32 %v256_v8, 16  ;;  %v358_v15 = vshrl.u32 %v257_v9, 16  ;;  %v361_v18 = vshll.u32 %v257_v9, 16  ;;  %vm2930_vm5 = vmor %vm634_vm2, %vm635_vm3 }
  0x13   : > { %886 = vmatpush.bf16.msra.mxu3 %v2693_v5  ;;  %v252_v19 = vld [vmem:[%s2883_s13] sm:$0xf]  ;;  %v353_v22 = vshll.u32 %v2888_v10, 16  ;;  %v253_v24 = vld [vmem:[%s2883_s13 + $0x8] sm:$0xf]  ;;  %v367_v26 = vshll.u32 %v2894_v12, 16 }
  0x14   : > { %v346_v20 = vrot.slane %v344_v13, 4  ;;  %v349_v21 = vrot.slane %v347_v14, 5  ;;  %v360_v23 = vrot.slane %v358_v15, 4  ;;  %v363_v25 = vrot.slane %v361_v18, 5  ;;  %v276_v27 = vld [vmem:[%s2883_s13 + $0x4] sm:$0x1] }
  0x15   : > { %2741 = vmatpush.bf16.msra.mxu1 %v2672_v6  ;;  %482 = vmatpush.bf16.msra.mxu0 %v2672_v6  ;;  %v277_v28 = vld [vmem:[%s2883_s13 + $0xc] sm:$0x1]  ;;  %v288_v31 = vshrl.u32 %v252_v19, 16  ;;  %v291_v32 = vshll.u32 %v252_v19, 16  ;;  %v297_v35 = vshll.u32 %v276_v27, 16  ;;  %v302_v36 = vshrl.u32 %v253_v24, 16 }
  0x16   : > { %752 = vmatpush.bf16.msra.mxu2 %v2680_v7  ;;  %v350_v30 = vor.u32 %v349_v21, %v346_v20  ;;  %v364_v33 = vor.u32 %v363_v25, %v360_v23  ;;  %v305_v37 = vshll.u32 %v253_v24, 16  ;;  %v610_v38 = vld [vmem:[%s2883_s13] sm:$0xe]  ;;  %v355_v39 = vrot.slane %v353_v22, 5  ;;  %v611_v43 = vld [vmem:[%s2883_s13 + $0x8] sm:$0xe] }
  0x17   : > { %887 = vmatpush.bf16.msra.mxu3 %v2692_v17  ;;  %v290_v40 = vrot.slane %v288_v31, 4  ;;  %v293_v41 = vrot.slane %v291_v32, 5  ;;  %v311_v42 = vshll.u32 %v277_v28, 16  ;;  %v369_v46 = vrot.slane %v367_v26, 5  ;;  %v2690_v56 = vld [vmem:[%s3495_s1 + $0xd8] sm:$0xff]  ;;  %v2669_v60 = vld [vmem:[%s3495_s1 + $0x50] sm:$0xff] }
  0x18   : > { %v351_v45 = vrot.slane %v350_v30, 4  ;;  %v304_v47 = vrot.slane %v302_v36, 4  ;;  %v307_v48 = vrot.slane %v305_v37, 5  ;;  %v365_v50 = vrot.slane %v364_v33, 4  ;;  %v258_v59 = vld [vmem:[%s2883_s13 + $0x30] sm:$0xf] }
  0x19   : > { %2742 = vmatpush.bf16.msra.mxu1 %v2671_v11  ;;  %483 = vmatpush.bf16.msra.mxu0 %v2671_v11  ;;  %v294_v51 = vor.u32 %v293_v41, %v290_v40  ;;  %v2193_v52 = vrot.slane %v610_v38, 9  ;;  %v639_v53 = vrot.slane %v276_v27, 5  ;;  %v299_v54 = vrot.slane %v297_v35, 5  ;;  %v2677_v0 = vld [vmem:[%s3495_s1 + $0x90] sm:$0xff]  ;;  %v259_v3 = vld [vmem:[%s2883_s13 + $0x38] sm:$0xf] }
  0x1a   : > { %753 = vmatpush.bf16.msra.mxu2 %v2679_v16  ;;  %v308_v55 = vor.u32 %v307_v48, %v304_v47  ;;  %v2194_v58 = vrot.slane %v611_v43, 9  ;;  %v313_v62 = vrot.slane %v311_v42, 5  ;;  %v643_v63 = vrot.slane %v277_v28, 5  ;;  %v254_v7 = vld [vmem:[%s2883_s13 + $0x10] sm:$0xf]  ;;  %v2668_v14 = vld [vmem:[%s3495_s1 + $0x48] sm:$0xff] }
  0x1b   : > { %888 = vmatpush.bf16.msra.mxu3 %v2691_v34  ;;  %v295_v61 = vrot.slane %v294_v51, 4  ;;  %v356_v1 = vsel %vm2921_vm4, %v351_v45, %v355_v39  ;;  %v370_v4 = vsel %vm2921_vm4, %v365_v50, %v369_v46  ;;  %v640_v5 = vsel %vm2930_vm5, %v2193_v52, %v639_v53  ;;  %v2689_v11 = vld [vmem:[%s3495_s1 + $0xd0] sm:$0xff]  ;;  %v2676_v19 = vld [vmem:[%s3495_s1 + $0x88] sm:$0xff]  ;;  %v255_v22 = vld [vmem:[%s2883_s13 + $0x18] sm:$0xf] }
  0x1c   : > { %v309_v2 = vrot.slane %v308_v55, 4  ;;  %v372_v6 = vshrl.u32 %v258_v59, 16  ;;  %v644_v9 = vsel %vm2930_vm5, %v2194_v58, %v643_v63  ;;  %v375_v13 = vshll.u32 %v258_v59, 16  ;;  %v2667_v24 = vld [vmem:[%s3495_s1 + $0x40] sm:$0xff]  ;;  %v2688_v31 = vld [vmem:[%s3495_s1 + $0xc8] sm:$0xff]  ;;  %v2702_v45 = vld [vmem:[%s3495_s1 + $0x138] sm:$0xff] }
  0x1d   : > { %2743 = vmatpush.bf16.msra.mxu1 %v2670_v29  ;;  %484 = vmatpush.bf16.msra.mxu0 %v2670_v29  ;;  %v300_v8 = vsel %vm2921_vm4, %v295_v61, %v299_v54  ;;  %v2959_v15 = vunpack.c.l.b16 %v356_v1  ;;  %v386_v17 = vshrl.u32 %v259_v3, 16  ;;  %v421_v18 = vunpack.c.l.b16 %v370_v4  ;;  %v2666_v29 = vld [vmem:[%s3495_s1 + $0x38] sm:$0xff]  ;;  %v2977_v32 = vld [vmem:[%s2883_s13 + $0x34] sm:$0x1]  ;;  %v2675_v42 = vld [vmem:[%s3495_s1 + $0x80] sm:$0xff] }
  0x1e   : > { %754 = vmatpush.bf16.msra.mxu2 %v2678_v44  ;;  %v314_v16 = vsel %vm2921_vm4, %v309_v2, %v313_v62  ;;  %v686_v20 = vunpack.c.l.b16 %v640_v5  ;;  %v389_v21 = vshll.u32 %v259_v3, 16  ;;  %v316_v23 = vshrl.u32 %v254_v7, 16  ;;  %v2980_v36 = vld [vmem:[%s2883_s13 + $0x3c] sm:$0x1]  ;;  %v2987_v43 = vld [vmem:[%s2883_s13 + $0x14] sm:$0x1] }
  0x1f   : > { %889 = vmatpush.bf16.msra.mxu3 %v2690_v56  ;;  %v416_v25 = vunpack.c.l.b16 %v300_v8  ;;  %v687_v26 = vunpack.c.l.b16 %v644_v9  ;;  %v374_v27 = vrot.slane %v372_v6, 4  ;;  %v319_v28 = vshll.u32 %v254_v7, 16  ;;  %v2990_v44 = vld [vmem:[%s2883_s13 + $0x1c] sm:$0x1]  ;;  %v2687_v56 = vld [vmem:[%s3495_s1 + $0xc0] sm:$0xff]  ;;  %v2701_v1 = vld [vmem:[%s3495_s1 + $0x130] sm:$0xff] }
  0x20   : > { %v417_v30 = vunpack.c.l.b16 %v314_v16  ;;  %v377_v33 = vrot.slane %v375_v13, 5  ;;  %v388_v34 = vrot.slane %v386_v17, 4  ;;  %v391_v35 = vrot.slane %v389_v21, 5  ;;  %v2722_v48 = vld [vmem:[%s3495_s1 + $0x1b8] sm:$0xff]  ;;  %v2275_v62 = vld [vmem:[%s2883_s13 + $0x8] sm:$0xf] }
  0x21   : > { %2744 = vmatpush.bf16.msra.mxu1 %v2669_v60  ;;  %485 = vmatpush.bf16.msra.mxu0 %v2669_v60  ;;  %v318_v37 = vrot.slane %v316_v23, 4  ;;  %v321_v38 = vrot.slane %v319_v28, 5  ;;  %v330_v39 = vshrl.u32 %v255_v22, 16  ;;  %v333_v40 = vshll.u32 %v255_v22, 16  ;;  %v2683_v63 = vld [vmem:[%s2883_s13 + $0xc] sm:$0xf0] }
  0x22   : > { %755 = vmatpush.bf16.msra.mxu2 %v2677_v0  ;;  %v426_v41 = vpack.c.b16 %v421_v18, %v2959_v15  ;;  %v694_v46 = vpack.c.b16 %v687_v26, %v686_v20  ;;  %v381_v47 = vshll.u32 %v2977_v32, 16  ;;  %v424_v52 = vpack.c.b16 %v417_v30, %v416_v25  ;;  %v2665_v0 = vld [vmem:[%s3495_s1 + $0x30] sm:$0xff]  ;;  %v2730_v2 = vld [vmem:[%s3495_s1 + $0x1f8] sm:$0xff]  ;;  %v2321_v13 = vld [vmem:[%s2883_s13 + $0x8] sm:$0xf] }
  0x23   : > { %890 = vmatpush.bf16.msra.mxu3 %v2689_v11  ;;  %v332_v50 = vrot.slane %v330_v39, 4  ;;  %v335_v51 = vrot.slane %v333_v40, 5  ;;  %v378_v53 = vor.u32 %v377_v33, %v374_v27  ;;  %v392_v54 = vor.u32 %v391_v35, %v388_v34  ;;  %v612_v4 = vld [vmem:[%s2883_s13 + $0x10] sm:$0xe]  ;;  %v613_v5 = vld [vmem:[%s2883_s13 + $0x18] sm:$0xe] }
  0x24   : > { %v395_v55 = vshll.u32 %v2980_v36, 16  ;;  %v322_v58 = vor.u32 %v321_v38, %v318_v37  ;;  %v325_v59 = vshll.u32 %v2987_v43, 16  ;;  %v339_v61 = vshll.u32 %v2990_v44, 16  ;;  %v2721_v6 = vld [vmem:[%s3495_s1 + $0x1b0] sm:$0xff]  ;;  %v2700_v25 = vld [vmem:[%s3495_s1 + $0x128] sm:$0xff]  ;;  %v2663_v37 = vld [vmem:[%s3495_s1 + $0x20] sm:$0xff] }
  0x25   : > { %2745 = vmatpush.bf16.msra.mxu1 %v2668_v14  ;;  %486 = vmatpush.bf16.msra.mxu0 %v2668_v14  ;;  %v336_v60 = vor.u32 %v335_v51, %v332_v50  ;;  %v383_v3 = vrot.slane %v381_v47, 5  ;;  %v379_v7 = vrot.slane %v378_v53, 4  ;;  %v393_v8 = vrot.slane %v392_v54, 4  ;;  %v2323_v18 = vld [vmem:[%s2883_s13 + $0x10] sm:$0xf]  ;;  %v2720_v26 = vld [vmem:[%s3495_s1 + $0x1a8] sm:$0xff] }
  0x26   : > { %756 = vmatpush.bf16.msra.mxu2 %v2676_v19  ;;  %v397_v9 = vrot.slane %v395_v55, 5  ;;  %v2276_v11 = vor.u32 %v2683_v63, %v2275_v62  ;;  %v323_v14 = vrot.slane %v322_v58, 4  ;;  %v327_v15 = vrot.slane %v325_v59, 5  ;;  %v2664_v19 = vld [vmem:[%s3495_s1 + $0x28] sm:$0xff]  ;;  %v2662_v55 = vld [vmem:[%s3495_s1 + $0x18] sm:$0xff] }
  0x27   : > { %891 = vmatpush.bf16.msra.mxu3 %v2688_v31  ;;  %v337_v16 = vrot.slane %v336_v60, 4  ;;  %v341_v17 = vrot.slane %v339_v61, 5  ;;  %v2195_v20 = vrot.slane %v612_v4, 9  ;;  %v647_v21 = vrot.slane %v2987_v43, 5  ;;  %v2728_v40 = vld [vmem:[%s3495_s1 + $0x1e8] sm:$0xff]  ;;  %v2699_v43 = vld [vmem:[%s3495_s1 + $0x120] sm:$0xff] }
  0x28   : > { %v2196_v22 = vrot.slane %v613_v5, 9  ;;  %v651_v23 = vrot.slane %v2990_v44, 5  ;;  %v384_v27 = vsel %vm2921_vm4, %v379_v7, %v383_v3  ;;  %v398_v28 = vsel %vm2921_vm4, %v393_v8, %v397_v9  ;;  %v2719_v44 = vld [vmem:[%s3495_s1 + $0x1a0] sm:$0xff]  ;;  %v3062_v47 = vld [vmem:[%s2883_s13 + $0xc] sm:$0x1]  ;;  %v2698_v58 = vld [vmem:[%s3495_s1 + $0x118] sm:$0xff] }
  0x29   : > { %2746 = vmatpush.bf16.msra.mxu1 %v2667_v24  ;;  %487 = vmatpush.bf16.msra.mxu0 %v2667_v24  ;;  %v2729_v24 = vld [vmem:[%s3495_s1 + $0x1f0] sm:$0xff]  ;;  %v942_v30 = vshll.u32 %v2321_v13, 16  ;;  %v328_v31 = vsel %vm2921_vm4, %v323_v14, %v327_v15  ;;  %v342_v33 = vsel %vm2921_vm4, %v337_v16, %v341_v17  ;;  %v953_v34 = vshrl.u32 %v2323_v18, 16  ;;  %v2279_v62 = vld [vmem:[%s2883_s13 + $0x18] sm:$0xf] }
  0x2a   : > { %757 = vmatpush.bf16.msra.mxu2 %v2675_v42  ;;  %v956_v35 = vshll.u32 %v2323_v18, 16  ;;  %v648_v38 = vsel %vm2930_vm5, %v2195_v20, %v647_v21  ;;  %v652_v39 = vsel %vm2930_vm5, %v2196_v22, %v651_v23  ;;  %v423_v42 = vunpack.c.l.b16 %v398_v28  ;;  %v2684_v63 = vld [vmem:[%s2883_s13 + $0x1c] sm:$0xf0]  ;;  %v615_v5 = vld [vmem:[%s2883_s13 + $0x28] sm:$0xe]  ;;  %v2697_v7 = vld [vmem:[%s3495_s1 + $0x110] sm:$0xff] }
  0x2b   : > { %892 = vmatpush.bf16.msra.mxu3 %v2687_v56  ;;  %v944_v50 = vrot.slane %v942_v30, 5  ;;  %v688_v51 = vunpack.c.l.b16 %v648_v38  ;;  %v955_v53 = vrot.slane %v953_v34, 4  ;;  %v3068_v56 = vld [vmem:[%s2883_s13 + $0x14] sm:$0x1]  ;;  %v948_v59 = vshll.u32 %v3062_v47, 16  ;;  %v2718_v17 = vld [vmem:[%s3495_s1 + $0x198] sm:$0xff] }
  0x2c   : > { %498 = vmatmul.bf16.vlgmr.msra.gmra.mxu1 %v426_v41  ;;  %488 = vmatmul.bf16.vlgmr.msra.gmra.mxu0 %v424_v52  ;;  %v422_v41 = vunpack.c.l.b16 %v384_v27  ;;  %v689_v52 = vunpack.c.l.b16 %v652_v39  ;;  %v958_v54 = vrot.slane %v956_v35, 5  ;;  %v962_v4 = vshll.u32 %v3068_v56, 16  ;;  %v2325_v20 = vld [vmem:[%s2883_s13 + $0x18] sm:$0xf]  ;;  %v2727_v21 = vld [vmem:[%s3495_s1 + $0x1e0] sm:$0xff]  ;;  %v2717_v23 = vld [vmem:[%s3495_s1 + $0x190] sm:$0xff] }
  0x2d   : > { %581 = vmatpush.bf16.msrb.mxu1 %v2666_v29  ;;  %1131 = vmatpush.bf16.msrb.mxu0 %v2702_v45  ;;  %v939_v29 = vshrl.u32 %v2321_v13, 16  ;;  %v418_v45 = vunpack.c.l.b16 %v328_v31  ;;  %v2280_v8 = vor.u32 %v2684_v63, %v2279_v62  ;;  %v950_v9 = vrot.slane %v948_v59, 5  ;;  %v2327_v22 = vld [vmem:[%s2883_s13 + $0x20] sm:$0xf]  ;;  %v2655_v39 = vld [vmem:[%s2883_s13 + $0x4] sm:$0xf0] }
  0x2e   : > { %1440 = vmatpush.bf16.msrb.mxu2 %v2722_v48  ;;  %893 = vmatmul.bf16.vlgmr.msra.gmra.mxu3 %v2276_v11  ;;  %v427_v60 = vpack.c.b16 %v423_v42, %v422_v41  ;;  %v959_v3 = vor.u32 %v958_v54, %v955_v53  ;;  %v655_v14 = vrot.slane %v2888_v10, 5  ;;  %v2198_v15 = vrot.slane %v615_v5, 9  ;;  %v2660_v10 = vld [vmem:[%s3495_s1 + $0x8] sm:$0xff]  ;;  %v2659_v34 = vld [vmem:[%s3495_s1] sm:$0xff]  ;;  %v2709_v53 = vld [vmem:[%s3495_s1 + $0x170] sm:$0xff] }
  0x2f   : > { %758 = vmatmul.bf16.vlgmr.msra.gmra.mxu2 %v694_v46  ;;  %1686 = vmatpush.bf16.msrb.mxu3 %v2730_v2  ;;  %v419_v46 = vunpack.c.l.b16 %v342_v33  ;;  %v941_v48 = vrot.slane %v939_v29, 4  ;;  %v695_v2 = vpack.c.b16 %v689_v52, %v688_v51  ;;  %v659_v16 = vrot.slane %v2894_v12, 5  ;;  %v2696_v12 = vld [vmem:[%s3495_s1 + $0x108] sm:$0xff]  ;;  %v2147_v35 = vld [vmem:[%s2883_s13] sm:$0xf] }
  0x30   : > { %v960_v18 = vrot.slane %v959_v3, 4  ;;  %v967_v28 = vshrl.u32 %v2325_v20, 16  ;;  %v970_v30 = vshll.u32 %v2325_v20, 16  ;;  %v981_v31 = vshrl.u32 %v2327_v22, 16  ;;  %v2695_v38 = vld [vmem:[%s3495_s1 + $0x100] sm:$0xff] }
  0x31   : > { %582 = vmatpush.bf16.msrb.mxu1 %v2665_v0  ;;  %1132 = vmatpush.bf16.msrb.mxu0 %v2701_v1  ;;  %v425_v61 = vpack.c.b16 %v419_v46, %v418_v45  ;;  %v945_v0 = vor.u32 %v944_v50, %v941_v48  ;;  %v614_v1 = vld [vmem:[%s2883_s13 + $0x20] sm:$0xe]  ;;  %v660_v27 = vsel %vm2930_vm5, %v2198_v15, %v659_v16  ;;  %v984_v33 = vshll.u32 %v2327_v22, 16  ;;  %v3132_v45 = vld [vmem:[%s3495_s1 + $0x238] sm:$0xff]  ;;  %v3135_v46 = vld [vmem:[%s2883_s13 + $0x24] sm:$0x1] }
  0x32   : > { %1441 = vmatpush.bf16.msrb.mxu2 %v2721_v6  ;;  %v2661_v6 = vld [vmem:[%s3495_s1 + $0x10] sm:$0xff]  ;;  %v2197_v11 = vrot.slane %v614_v1, 9  ;;  %v969_v48 = vrot.slane %v967_v28, 4  ;;  %v972_v50 = vrot.slane %v970_v30, 5  ;;  %v983_v51 = vrot.slane %v981_v31, 4  ;;  %v2715_v22 = vld [vmem:[%s3495_s1 + $0x180] sm:$0xff] }
  0x33   : > { %1687 = vmatpush.bf16.msrb.mxu3 %v2729_v24  ;;  %v946_v13 = vrot.slane %v945_v0, 4  ;;  %v2726_v24 = vld [vmem:[%s3495_s1 + $0x1d8] sm:$0xff]  ;;  %v986_v52 = vrot.slane %v984_v33, 5  ;;  %v2148_v54 = vor.u32 %v2655_v39, %v2147_v35  ;;  %v990_v59 = vshll.u32 %v3135_v46, 16  ;;  %v2685_v62 = vld [vmem:[%s2883_s13 + $0x2c] sm:$0xf0] }
  0x34   : > { %v973_v63 = vor.u32 %v972_v50, %v969_v48  ;;  %v3148_v1 = vld [vmem:[%s3495_s1 + $0x230] sm:$0xff]  ;;  %v2329_v3 = vld [vmem:[%s2883_s13 + $0x28] sm:$0xf]  ;;  %v617_v5 = vld [vmem:[%s2883_s13 + $0x38] sm:$0xe]  ;;  %v663_v20 = vrot.slane %v2977_v32, 5 }
  0x35   : > { %583 = vmatpush.bf16.msrb.mxu1 %v2664_v19  ;;  %1133 = vmatpush.bf16.msrb.mxu0 %v2700_v25  ;;  %v964_v19 = vrot.slane %v962_v4, 5  ;;  %v951_v25 = vsel %vm2921_vm4, %v946_v13, %v950_v9  ;;  %v987_v0 = vor.u32 %v986_v52, %v983_v51  ;;  %v616_v4 = vld [vmem:[%s2883_s13 + $0x30] sm:$0xe]  ;;  %v992_v9 = vrot.slane %v990_v59, 5  ;;  %v2724_v32 = vld [vmem:[%s3495_s1 + $0x1c8] sm:$0xff]  ;;  %v3188_v28 = vld [vmem:[%s3495_s1 + $0x220] sm:$0xff] }
  0x36   : > { %1442 = vmatpush.bf16.msrb.mxu2 %v2720_v26  ;;  %v656_v26 = vsel %vm2930_vm5, %v2197_v11, %v655_v14  ;;  %v2331_v11 = vld [vmem:[%s2883_s13 + $0x30] sm:$0xf]  ;;  %v974_v13 = vrot.slane %v973_v63, 4  ;;  %v995_v15 = vshrl.u32 %v2329_v3, 16  ;;  %v998_v16 = vshll.u32 %v2329_v3, 16  ;;  %v2706_v31 = vld [vmem:[%s3495_s1 + $0x158] sm:$0xff] }
  0x37   : > { %1688 = vmatpush.bf16.msrb.mxu3 %v2728_v40  ;;  %v965_v29 = vsel %vm2921_vm4, %v960_v18, %v964_v19  ;;  %v1067_v40 = vunpack.c.l.b16 %v951_v25  ;;  %v690_v42 = vunpack.c.l.b16 %v656_v26  ;;  %v988_v14 = vrot.slane %v987_v0, 4  ;;  %v3167_v18 = vld [vmem:[%s3495_s1 + $0x228] sm:$0xff]  ;;  %v3201_v39 = vld [vmem:[%s2883_s13 + $0x34] sm:$0x1]  ;;  %v2523_v51 = vld [vmem:[%s2883_s13 + $0x18] sm:$0xf] }
  0x38   : > { %v1068_v41 = vunpack.c.l.b16 %v965_v29  ;;  %v2199_v19 = vrot.slane %v616_v4, 9  ;;  %v997_v26 = vrot.slane %v995_v15, 4  ;;  %v3198_v33 = vld [vmem:[%s2883_s13 + $0x2c] sm:$0x1]  ;;  %v1018_v59 = vshll.u32 %v3201_v39, 16 }
  0x39   : > { %584 = vmatpush.bf16.msrb.mxu1 %v2663_v37  ;;  %1134 = vmatpush.bf16.msrb.mxu0 %v2699_v43  ;;  %v2710_v37 = vld [vmem:[%s3495_s1 + $0x178] sm:$0xff]  ;;  %v691_v43 = vunpack.c.l.b16 %v660_v27  ;;  %v993_v25 = vsel %vm2921_vm4, %v988_v14, %v992_v9  ;;  %v1000_v27 = vrot.slane %v998_v16, 5  ;;  %v1004_v52 = vshll.u32 %v3198_v33, 16  ;;  %v2686_v63 = vld [vmem:[%s2883_s13 + $0x3c] sm:$0xf0] }
  0x3a   : > { %1443 = vmatpush.bf16.msrb.mxu2 %v2719_v44  ;;  %v3127_v44 = vld [vmem:[%s2883_s13 + $0x1c] sm:$0x1]  ;;  %v664_v29 = vsel %vm2930_vm5, %v2199_v19, %v663_v20  ;;  %v2333_v0 = vld [vmem:[%s2883_s13 + $0x38] sm:$0xf]  ;;  %v1020_v15 = vrot.slane %v1018_v59, 5  ;;  %v2723_v19 = vld [vmem:[%s3495_s1 + $0x1c0] sm:$0xff] }
  0x3b   : > { %1689 = vmatpush.bf16.msrb.mxu3 %v2727_v21  ;;  %v2200_v21 = vrot.slane %v617_v5, 9  ;;  %v1001_v50 = vor.u32 %v1000_v27, %v997_v26  ;;  %v3219_v5 = vld [vmem:[%s2883_s13 + $0x14] sm:$0x1]  ;;  %v2335_v16 = vld [vmem:[%s2883_s13 + $0x40] sm:$0xf]  ;;  %v1026_v20 = vshll.u32 %v2333_v0, 16 }
  0x3c   : > { %503 = vmatmul.bf16.gmra.mxu1 %v427_v60  ;;  %493 = vmatmul.bf16.gmra.mxu0 %v425_v61  ;;  %v696_v60 = vpack.c.b16 %v691_v43, %v690_v42  ;;  %v2283_v61 = vld [vmem:[%s2883_s13 + $0x28] sm:$0xf]  ;;  %v2656_v42 = vld [vmem:[%s2883_s13 + $0x14] sm:$0xf0]  ;;  %v692_v43 = vunpack.c.l.b16 %v664_v29  ;;  %v3241_v27 = vld [vmem:[%s3495_s1 + $0x210] sm:$0xff] }
  0x3d   : > { %585 = vmatpush.bf16.msrb.mxu1 %v2662_v55  ;;  %1135 = vmatpush.bf16.msrb.mxu0 %v2698_v58  ;;  %v1075_v55 = vpack.c.b16 %v1068_v41, %v1067_v40  ;;  %v976_v58 = vshll.u32 %v3127_v44, 16  ;;  %v2521_v40 = vld [vmem:[%s2883_s13 + $0x10] sm:$0xf]  ;;  %v1002_v4 = vrot.slane %v1001_v50, 4  ;;  %v2385_v29 = vld [vmem:[%s2883_s13 + $0x8] sm:$0xe] }
  0x3e   : > { %1444 = vmatpush.bf16.msrb.mxu2 %v2718_v17  ;;  %898 = vmatmul.bf16.gmra.mxu3 %v2280_v8  ;;  %v2725_v17 = vld [vmem:[%s3495_s1 + $0x1d0] sm:$0xff] }
  0x3f   : > { %763 = vmatmul.bf16.gmra.mxu2 %v695_v2  ;;  %1690 = vmatpush.bf16.msrb.mxu3 %v2726_v24  ;;  %v2708_v2 = vld [vmem:[%s3495_s1 + $0x168] sm:$0xff]  ;;  %v978_v8 = vrot.slane %v976_v58, 5  ;;  %v1012_v24 = vshll.u32 %v2331_v11, 16  ;;  %v2151_v41 = vld [vmem:[%s2883_s13 + $0x10] sm:$0xf] }
  0x41   : > { %586 = vmatpush.bf16.msrb.mxu1 %v2661_v6  ;;  %1136 = vmatpush.bf16.msrb.mxu0 %v2697_v7  ;;  %v2716_v6 = vld [vmem:[%s3495_s1 + $0x188] sm:$0xff]  ;;  %v2284_v7 = vor.u32 %v2685_v62, %v2283_v61  ;;  %v1014_v35 = vrot.slane %v1012_v24, 5  ;;  %v2152_v61 = vor.u32 %v2656_v42, %v2151_v41  ;;  %v3254_v42 = vld [vmem:[%s2883_s13 + $0x3c] sm:$0x1] }
  0x42   : > { %1445 = vmatpush.bf16.msrb.mxu2 %v2717_v23  ;;  %v1009_v23 = vshrl.u32 %v2331_v11, 16 }
  0x43   : > { %1691 = vmatpush.bf16.msrb.mxu3 %v2725_v17  ;;  %v1023_v17 = vshrl.u32 %v2333_v0, 16 }
  0x45   : > { %587 = vmatpush.bf16.msrb.mxu1 %v2660_v10  ;;  %1137 = vmatpush.bf16.msrb.mxu0 %v2696_v12  ;;  %v667_v10 = vrot.slane %v2980_v36, 5  ;;  %v2707_v12 = vld [vmem:[%s3495_s1 + $0x160] sm:$0xff]  ;;  %v979_v36 = vsel %vm2921_vm4, %v974_v13, %v978_v8 }
  0x46   : > { %1446 = vmatpush.bf16.msrb.mxu2 %v2716_v6  ;;  %v1006_v6 = vrot.slane %v1004_v52, 5 }
  0x47   : > { %v668_v30 = vsel %vm2930_vm5, %v2200_v21, %v667_v10  ;;  %1692 = vmatpush.bf16.msrb.mxu3 %v2724_v32  ;;  %v1503_v10 = vshll.u32 %v3219_v5, 16  ;;  %v1198_v32 = vrot.slane %v3068_v56, 5  ;;  %v1025_v56 = vrot.slane %v1023_v17, 4 }
  0x48   : > { %v693_v48 = vunpack.c.l.b16 %v668_v30 }
  0x49   : > { %588 = vmatpush.bf16.msrb.mxu1 %v2659_v34  ;;  %1138 = vmatpush.bf16.msrb.mxu0 %v2695_v38  ;;  %v1011_v34 = vrot.slane %v1009_v23, 4  ;;  %v1070_v38 = vunpack.c.l.b16 %v993_v25  ;;  %v1194_v23 = vrot.slane %v3062_v47, 5  ;;  %v1040_v25 = vshll.u32 %v2335_v16, 16 }
  0x4a   : > { %1447 = vmatpush.bf16.msrb.mxu2 %v2715_v22  ;;  %v697_v3 = vpack.c.b16 %v693_v48, %v692_v43  ;;  %v1007_v47 = vsel %vm2921_vm4, %v1002_v4, %v1006_v6  ;;  %v2475_v4 = vld [vmem:[%s2883_s13 + $0x10] sm:$0xf] }
  0x4b   : > { %v1015_v58 = vor.u32 %v1014_v35, %v1011_v34  ;;  %1693 = vmatpush.bf16.msrb.mxu3 %v2723_v19  ;;  %v2386_v34 = vld [vmem:[%s2883_s13 + $0x10] sm:$0xe]  ;;  %v2393_v35 = vrot.slane %v2385_v29, 9  ;;  %v1042_v52 = vrot.slane %v1040_v25, 5 }
  0x4c   : > { %589 = vmatmul.bf16.vlgmr.msrb.gmra.mxu1 %v2148_v54  ;;  %1139 = vmatmul.bf16.vlgmr.msrb.gmra.mxu0 %v1075_v55  ;;  %v1497_v54 = vshll.u32 %v2521_v40, 16  ;;  %v1508_v55 = vshrl.u32 %v2523_v51, 16  ;;  %v2394_v41 = vrot.slane %v2386_v34, 9  ;;  %v2731_v34 = vld [vmem:[%s3495_s1 + $0x200] sm:$0xff] }
  0x4d   : > { %1305 = vmatpush.bf16.msra.mxu1 %v2710_v37  ;;  %1860 = vmatpush.bf16.msra.mxu0 %v3132_v45  ;;  %v1069_v37 = vunpack.c.l.b16 %v979_v36  ;;  %v1016_v14 = vrot.slane %v1015_v58, 4  ;;  %v1037_v36 = vshrl.u32 %v2335_v16, 16  ;;  %v1195_v50 = vsel %vm2930_vm5, %v2393_v35, %v1194_v23  ;;  %v3286_v23 = vld [vmem:[%s2883_s13 + $0x2c] sm:$0x1] }
  0x4e   : > { %903 = vmatmul.bf16.gmra.mxu3 %v2284_v7  ;;  %2747 = vmatpush.bf16.msra.mxu2 %v3132_v45  ;;  %v2287_v45 = vld [vmem:[%s2883_s13 + $0x38] sm:$0xf]  ;;  %v3222_v7 = vld [vmem:[%s2883_s13 + $0x1c] sm:$0x1]  ;;  %v1499_v9 = vrot.slane %v1497_v54, 5  ;;  %v1510_v11 = vrot.slane %v1508_v55, 4  ;;  %v1241_v54 = vunpack.c.l.b16 %v1195_v50  ;;  %v1071_v58 = vunpack.c.l.b16 %v1007_v47 }
  0x4f   : > { %768 = vmatmul.bf16.gmra.mxu2 %v696_v60  ;;  %v2705_v60 = vld [vmem:[%s3495_s1 + $0x150] sm:$0xff]  ;;  %v1076_v62 = vpack.c.b16 %v1070_v38, %v1069_v37  ;;  %v2288_v13 = vor.u32 %v2686_v63, %v2287_v45  ;;  %v1517_v24 = vshll.u32 %v3222_v7, 16  ;;  %v1021_v30 = vsel %vm2921_vm4, %v1016_v14, %v1020_v15  ;;  %v2155_v55 = vld [vmem:[%s2883_s13 + $0x20] sm:$0xf]  ;;  %v2657_v45 = vld [vmem:[%s2883_s13 + $0x24] sm:$0xf0] }
  0x50   : > { %v1028_v37 = vrot.slane %v1026_v20, 5  ;;  %v1072_v59 = vunpack.c.l.b16 %v1021_v30  ;;  %v1032_v63 = vshll.u32 %v3254_v42, 16  ;;  %v2156_v17 = vor.u32 %v2657_v45, %v2155_v55  ;;  %v2159_v55 = vld [vmem:[%s2883_s13 + $0x30] sm:$0xf] }
  0x51   : > { %1306 = vmatpush.bf16.msra.mxu1 %v2709_v53  ;;  %1861 = vmatpush.bf16.msra.mxu0 %v3148_v1  ;;  %v1494_v53 = vshrl.u32 %v2521_v40, 16  ;;  %v1505_v40 = vrot.slane %v1503_v10, 5  ;;  %v1519_v48 = vrot.slane %v1517_v24, 5 }
  0x52   : > { %2748 = vmatpush.bf16.msra.mxu2 %v3148_v1  ;;  %v2704_v1 = vld [vmem:[%s3495_s1 + $0x148] sm:$0xff] }
  0x53   : > { %v1496_v8 = vrot.slane %v1494_v53, 4  ;;  %v1199_v53 = vsel %vm2930_vm5, %v2394_v41, %v1198_v32 }
  0x55   : > { %1307 = vmatpush.bf16.msra.mxu1 %v2708_v2  ;;  %1862 = vmatpush.bf16.msra.mxu0 %v3167_v18  ;;  %v1511_v2 = vshll.u32 %v2523_v51, 16  ;;  %v1500_v21 = vor.u32 %v1499_v9, %v1496_v8  ;;  %v1039_v51 = vrot.slane %v1037_v36, 4 }
  0x56   : > { %2749 = vmatpush.bf16.msra.mxu2 %v3167_v18  ;;  %v2732_v18 = vld [vmem:[%s3495_s1 + $0x208] sm:$0xff] }
  0x57   : > { %v1513_v22 = vrot.slane %v1511_v2, 5  ;;  %v1501_v38 = vrot.slane %v1500_v21, 4  ;;  %v2525_v2 = vld [vmem:[%s2883_s13 + $0x20] sm:$0xf] }
  0x58   : > { %v1522_v9 = vshrl.u32 %v2525_v2, 16 }
  0x59   : > { %1308 = vmatpush.bf16.msra.mxu1 %v2707_v12  ;;  %1863 = vmatpush.bf16.msra.mxu0 %v3188_v28  ;;  %v2734_v12 = vld [vmem:[%s3495_s1 + $0x218] sm:$0xff]  ;;  %v1514_v26 = vor.u32 %v1513_v22, %v1510_v11  ;;  %v1506_v0 = vsel %vm2921_vm4, %v1501_v38, %v1505_v40  ;;  %v1525_v11 = vshll.u32 %v2525_v2, 16  ;;  %v3283_v22 = vld [vmem:[%s2883_s13 + $0x24] sm:$0x1]  ;;  %v2388_v38 = vld [vmem:[%s2883_s13 + $0x20] sm:$0xe] }
  0x5a   : > { %2750 = vmatpush.bf16.msra.mxu2 %v3188_v28  ;;  %v1043_v28 = vor.u32 %v1042_v52, %v1039_v51  ;;  %v1524_v19 = vrot.slane %v1522_v9, 4  ;;  %v1622_v21 = vunpack.c.l.b16 %v1506_v0  ;;  %v1202_v52 = vrot.slane %v3127_v44, 5 }
  0x5b   : > { %v1515_v43 = vrot.slane %v1514_v26, 4  ;;  %v1527_v20 = vrot.slane %v1525_v11, 5  ;;  %v1034_v26 = vrot.slane %v1032_v63, 5  ;;  %v2585_v63 = vld [vmem:[%s2883_s13 + $0x10] sm:$0xe] }
  0x5c   : > { %594 = vmatmul.bf16.gmra.mxu1 %v2152_v61  ;;  %1144 = vmatmul.bf16.gmra.mxu0 %v1076_v62  ;;  %v1242_v61 = vunpack.c.l.b16 %v1199_v53  ;;  %v1029_v62 = vor.u32 %v1028_v37, %v1025_v56  ;;  %v1044_v29 = vrot.slane %v1043_v28, 4  ;;  %v1531_v56 = vshll.u32 %v3283_v22, 16  ;;  %v2387_v37 = vld [vmem:[%s2883_s13 + $0x18] sm:$0xe] }
  0x5d   : > { %1309 = vmatpush.bf16.msra.mxu1 %v2706_v31  ;;  %1864 = vmatpush.bf16.msra.mxu0 %v2734_v12  ;;  %v2703_v31 = vld [vmem:[%s3495_s1 + $0x140] sm:$0xff]  ;;  %v1520_v6 = vsel %vm2921_vm4, %v1515_v43, %v1519_v48  ;;  %v1528_v30 = vor.u32 %v1527_v20, %v1524_v19  ;;  %v2395_v50 = vrot.slane %v2387_v37, 9  ;;  %v2396_v53 = vrot.slane %v2388_v38, 9 }
  0x5e   : > { %908 = vmatmul.bf16.gmra.mxu3 %v2288_v13  ;;  %v3278_v8 = vpack.c.b16 %v1242_v61, %v1241_v54  ;;  %v2711_v13 = vld [vmem:[%s2883_s13 + $0x14] sm:$0xf0]  ;;  %2751 = vmatpush.bf16.msra.mxu2 %v2734_v12  ;;  %v1623_v10 = vunpack.c.l.b16 %v1520_v6  ;;  %v1030_v25 = vrot.slane %v1029_v62, 4  ;;  %v1545_v12 = vshll.u32 %v3286_v23, 16 }
  0x5f   : > { %773 = vmatmul.bf16.gmra.mxu2 %v697_v3  ;;  %v2527_v3 = vld [vmem:[%s2883_s13 + $0x28] sm:$0xf]  ;;  %v2476_v36 = vor.u32 %v2711_v13, %v2475_v4  ;;  %v1533_v43 = vrot.slane %v1531_v56, 5  ;;  %v1206_v54 = vrot.slane %v3135_v46, 5  ;;  %v1749_v62 = vrot.slane %v3219_v5, 5 }
  0x60   : > { %v1536_v15 = vshrl.u32 %v2527_v3, 16  ;;  %v1539_v16 = vshll.u32 %v2527_v3, 16  ;;  %v1035_v40 = vsel %vm2921_vm4, %v1030_v25, %v1034_v26  ;;  %v1547_v48 = vrot.slane %v1545_v12, 5  ;;  %v2586_v3 = vld [vmem:[%s2883_s13 + $0x18] sm:$0xe] }
  0x61   : > { %1310 = vmatpush.bf16.msra.mxu1 %v2705_v60  ;;  %1865 = vmatpush.bf16.msra.mxu0 %v3241_v27  ;;  %v3267_v60 = vld [vmem:[%s2883_s13 + $0x44] sm:$0x1]  ;;  %v1073_v45 = vunpack.c.l.b16 %v1035_v40  ;;  %v1207_v61 = vsel %vm2930_vm5, %v2396_v53, %v1206_v54  ;;  %v2529_v4 = vld [vmem:[%s2883_s13 + $0x30] sm:$0xf]  ;;  %v2531_v6 = vld [vmem:[%s2883_s13 + $0x38] sm:$0xf] }
  0x62   : > { %v1046_v14 = vshll.u32 %v3267_v60, 16  ;;  %v1538_v24 = vrot.slane %v1536_v15, 4  ;;  %v1541_v32 = vrot.slane %v1539_v16, 5  ;;  %2752 = vmatpush.bf16.msra.mxu2 %v3241_v27  ;;  %v1529_v27 = vrot.slane %v1528_v30, 4  ;;  %v2479_v16 = vld [vmem:[%s2883_s13 + $0x20] sm:$0xf] }
  0x63   : > { %v1244_v0 = vunpack.c.l.b16 %v1207_v61  ;;  %v1550_v11 = vshrl.u32 %v2529_v4, 16  ;;  %v1553_v13 = vshll.u32 %v2529_v4, 16  ;;  %v1564_v5 = vshrl.u32 %v2531_v6, 16  ;;  %v2389_v53 = vld [vmem:[%s2883_s13 + $0x28] sm:$0xe] }
  0x64   : > { %v1048_v47 = vrot.slane %v1046_v14, 5  ;;  %v1542_v35 = vor.u32 %v1541_v32, %v1538_v24  ;;  %v1534_v46 = vsel %vm2921_vm4, %v1529_v27, %v1533_v43  ;;  %v1753_v15 = vrot.slane %v3222_v7, 5  ;;  %v2390_v54 = vld [vmem:[%s2883_s13 + $0x30] sm:$0xe]  ;;  %v2587_v4 = vld [vmem:[%s2883_s13 + $0x20] sm:$0xe] }
  0x65   : > { %1311 = vmatpush.bf16.msra.mxu1 %v2704_v1  ;;  %1866 = vmatpush.bf16.msra.mxu0 %v2732_v18  ;;  %v1077_v1 = vpack.c.b16 %v1072_v59, %v1071_v58  ;;  %v1203_v59 = vsel %vm2930_vm5, %v2395_v50, %v1202_v52  ;;  %v1624_v19 = vunpack.c.l.b16 %v1534_v46  ;;  %v1552_v24 = vrot.slane %v1550_v11, 4  ;;  %v2483_v50 = vld [vmem:[%s2883_s13 + $0x30] sm:$0xf]  ;;  %v2588_v11 = vld [vmem:[%s2883_s13 + $0x28] sm:$0xe] }
  0x66   : > { %v1049_v41 = vsel %vm2921_vm4, %v1044_v29, %v1048_v47  ;;  %2753 = vmatpush.bf16.msra.mxu2 %v2732_v18  ;;  %v1543_v51 = vrot.slane %v1542_v35, 4  ;;  %v2658_v18 = vld [vmem:[%s2883_s13 + $0x34] sm:$0xf0]  ;;  %v1243_v44 = vunpack.c.l.b16 %v1203_v59  ;;  %v1555_v32 = vrot.slane %v1553_v13, 5  ;;  %v3323_v29 = vld [vmem:[%s2883_s13 + $0x34] sm:$0x1] }
  0x67   : > { %v1074_v58 = vunpack.c.l.b16 %v1049_v41  ;;  %v2160_v28 = vor.u32 %v2658_v18, %v2159_v55  ;;  %v3326_v47 = vld [vmem:[%s2883_s13 + $0x3c] sm:$0x1]  ;;  %v2533_v55 = vld [vmem:[%s2883_s13 + $0x40] sm:$0xf]  ;;  %v2398_v59 = vrot.slane %v2390_v54, 9  ;;  %v1214_v61 = vrot.slane %v3201_v39, 5 }
  0x68   : > { %v1548_v2 = vsel %vm2921_vm4, %v1543_v51, %v1547_v48  ;;  %v3317_v9 = vpack.c.b16 %v1244_v0, %v1243_v44  ;;  %v1556_v12 = vor.u32 %v1555_v32, %v1552_v24  ;;  %v1573_v35 = vshll.u32 %v3326_v47, 16  ;;  %v2535_v18 = vld [vmem:[%s2883_s13 + $0x48] sm:$0xf] }
  0x69   : > { %1312 = vmatpush.bf16.msra.mxu1 %v2703_v31  ;;  %v1630_v31 = vpack.c.b16 %v1623_v10, %v1622_v21  ;;  %1867 = vmatpush.bf16.msra.mxu0 %v2731_v34  ;;  %v1078_v14 = vpack.c.b16 %v1074_v58, %v1073_v45  ;;  %v1625_v20 = vunpack.c.l.b16 %v1548_v2  ;;  %v2593_v21 = vrot.slane %v2585_v63, 9 }
  0x6a   : > { %2754 = vmatpush.bf16.msra.mxu2 %v2731_v34  ;;  %v2594_v10 = vrot.slane %v2586_v3, 9  ;;  %v1557_v40 = vrot.slane %v1556_v12, 4  ;;  %v1575_v43 = vrot.slane %v1573_v35, 5  ;;  %v2397_v45 = vrot.slane %v2389_v53, 9 }
  0x6b   : > { %v1631_v30 = vpack.c.b16 %v1625_v20, %v1624_v19  ;;  %v1750_v7 = vsel %vm2930_vm5, %v2593_v21, %v1749_v62  ;;  %v1210_v58 = vrot.slane %v3198_v33, 5  ;;  %v2713_v62 = vld [vmem:[%s2883_s13 + $0x34] sm:$0xf0]  ;;  %v1578_v63 = vshrl.u32 %v2533_v55, 16 }
  0x6c   : > { %599 = vmatmul.bf16.gmra.mxu1 %v2156_v17  ;;  %1149 = vmatmul.bf16.gmra.mxu0 %v1077_v1  ;;  %v2712_v17 = vld [vmem:[%s2883_s13 + $0x24] sm:$0xf0]  ;;  %v1567_v1 = vshll.u32 %v2531_v6, 16  ;;  %v1754_v56 = vsel %vm2930_vm5, %v2594_v10, %v1753_v15  ;;  %v1796_v37 = vunpack.c.l.b16 %v1750_v7  ;;  %v1581_v44 = vshll.u32 %v2533_v55, 16  ;;  %v3353_v15 = vld [vmem:[%s2883_s13 + $0x44] sm:$0x1] }
  0x6d   : > { %v2480_v26 = vor.u32 %v2712_v17, %v2479_v16  ;;  %v1797_v38 = vunpack.c.l.b16 %v1754_v56  ;;  %v1592_v0 = vshrl.u32 %v2535_v18, 16  ;;  %v1595_v46 = vshll.u32 %v2535_v18, 16  ;;  %v3356_v16 = vld [vmem:[%s2883_s13 + $0x4c] sm:$0x1] }
  0x6e   : > { %1694 = vmatmul.bf16.vlgmr.msrb.gmra.mxu3 %v1630_v31  ;;  %v1569_v25 = vrot.slane %v1567_v1, 5  ;;  %v1559_v31 = vshll.u32 %v3323_v29, 16  ;;  %v1211_v6 = vsel %vm2930_vm5, %v2397_v45, %v1210_v58  ;;  %v1215_v33 = vsel %vm2930_vm5, %v2398_v59, %v1214_v61  ;;  %v2590_v61 = vld [vmem:[%s2883_s13 + $0x38] sm:$0xe] }
  0x6f   : > { %1448 = vmatmul.bf16.vlgmr.msrb.gmra.mxu2 %v2476_v36  ;;  %v1566_v36 = vrot.slane %v1564_v5, 4  ;;  %v1804_v48 = vpack.c.b16 %v1797_v38, %v1796_v37  ;;  %v1245_v13 = vunpack.c.l.b16 %v1211_v6  ;;  %v1246_v39 = vunpack.c.l.b16 %v1215_v33  ;;  %v2391_v38 = vld [vmem:[%s2883_s13 + $0x38] sm:$0xe] }
  0x70   : > { %v1561_v41 = vrot.slane %v1559_v31, 5  ;;  %v1580_v5 = vrot.slane %v1578_v63, 4  ;;  %v1594_v17 = vrot.slane %v1592_v0, 4  ;;  %v1597_v1 = vrot.slane %v1595_v46, 5  ;;  %v2592_v63 = vld [vmem:[%s2883_s13 + $0x48] sm:$0xe] }
  0x71   : > { %v1570_v34 = vor.u32 %v1569_v25, %v1566_v36  ;;  %v2595_v19 = vrot.slane %v2587_v4, 9  ;;  %v3358_v20 = vpack.c.b16 %v1246_v39, %v1245_v13  ;;  %v1757_v10 = vrot.slane %v3283_v22, 5 }
  0x72   : > { %v1562_v51 = vsel %vm2921_vm4, %v1557_v40, %v1561_v41  ;;  %v2596_v24 = vrot.slane %v2588_v11, 9  ;;  %v1761_v32 = vrot.slane %v3286_v23, 5  ;;  %v1587_v25 = vshll.u32 %v3353_v15, 16  ;;  %v2392_v40 = vld [vmem:[%s2883_s13 + $0x40] sm:$0xe] }
  0x73   : > { %v1571_v27 = vrot.slane %v1570_v34, 4  ;;  %v1626_v2 = vunpack.c.l.b16 %v1562_v51  ;;  %v1758_v7 = vsel %vm2930_vm5, %v2595_v19, %v1757_v10  ;;  %v2399_v41 = vrot.slane %v2391_v38, 9  ;;  %v2714_v51 = vld [vmem:[%s2883_s13 + $0x44] sm:$0xf0] }
  0x74   : > { %v1762_v22 = vsel %vm2930_vm5, %v2596_v24, %v1761_v32  ;;  %v1589_v23 = vrot.slane %v1587_v25, 5  ;;  %v1798_v31 = vunpack.c.l.b16 %v1758_v7  ;;  %v1765_v0 = vrot.slane %v3323_v29, 5 }
  0x75   : > { %v1576_v52 = vsel %vm2921_vm4, %v1571_v27, %v1575_v43  ;;  %v1799_v34 = vunpack.c.l.b16 %v1762_v22  ;;  %v1218_v27 = vrot.slane %v3254_v42, 5  ;;  %v2400_v43 = vrot.slane %v2392_v40, 9  ;;  %v2589_v42 = vld [vmem:[%s2883_s13 + $0x30] sm:$0xe] }
  0x76   : > { %v1627_v3 = vunpack.c.l.b16 %v1576_v52  ;;  %v2598_v46 = vrot.slane %v2590_v61, 9  ;;  %v1777_v4 = vrot.slane %v3356_v16, 5  ;;  %v2600_v33 = vrot.slane %v2592_v63, 9 }
  0x77   : > { %v1805_v52 = vpack.c.b16 %v1799_v34, %v1798_v31  ;;  %v1219_v53 = vsel %vm2930_vm5, %v2399_v41, %v1218_v27 }
  0x78   : > { %v1632_v21 = vpack.c.b16 %v1627_v3, %v1626_v2  ;;  %v1247_v45 = vunpack.c.l.b16 %v1219_v53  ;;  %v1769_v2 = vrot.slane %v3326_v47, 5  ;;  %v1773_v3 = vrot.slane %v3353_v15, 5 }
  0x79   : > { %v1778_v29 = vsel %vm2930_vm5, %v2600_v33, %v1777_v4 }
  0x7c   : > { %604 = vmatmul.bf16.gmra.mxu1 %v2160_v28  ;;  %1154 = vmatmul.bf16.gmra.mxu0 %v1078_v14  ;;  %v1583_v28 = vrot.slane %v1581_v44, 5  ;;  %v2484_v14 = vor.u32 %v2713_v62, %v2483_v50  ;;  %v2487_v50 = vld [vmem:[%s2883_s13 + $0x40] sm:$0xf]  ;;  %v2597_v44 = vrot.slane %v2589_v42, 9 }
  0x7d   : > { %v2488_v59 = vor.u32 %v2714_v51, %v2487_v50  ;;  %v2591_v62 = vld [vmem:[%s2883_s13 + $0x40] sm:$0xe]  ;;  %s2654_s13 = sshll.u32 %s2862_s25, 6 }
  0x7e   : > { %1699 = vmatmul.bf16.gmra.mxu3 %v1631_v30  ;;  %v1584_v36 = vor.u32 %v1583_v28, %v1580_v5  ;;  %v1601_v30 = vshll.u32 %v3356_v16, 16  ;;  %v2599_v6 = vrot.slane %v2591_v62, 9  ;;  %v1766_v11 = vsel %vm2930_vm5, %v2597_v44, %v1765_v0  ;;  %s3431_s29 = scalar_lea.vmem %s3496_s2, %s2654_s13 }
  0x7f   : > { %1453 = vmatmul.bf16.gmra.mxu2 %v2480_v26  ;;  %v1598_v26 = vor.u32 %v1597_v1, %v1594_v17  ;;  %v1800_v47 = vunpack.c.l.b16 %v1766_v11  ;;  %v1803_v28 = vunpack.c.l.b16 %v1778_v29 }
  0x80   : > { %v1603_v12 = vrot.slane %v1601_v30, 5  ;;  %v1774_v13 = vsel %vm2930_vm5, %v2599_v6, %v1773_v3 }
  0x81   : > { %v1599_v56 = vrot.slane %v1598_v26, 4  ;;  %v1802_v5 = vunpack.c.l.b16 %v1774_v13 }
  0x83   : > { %v1604_v37 = vsel %vm2921_vm4, %v1599_v56, %v1603_v12  ;;  %v1807_v17 = vpack.c.b16 %v1803_v28, %v1802_v5 }
  0x84   : > { %v1629_v55 = vunpack.c.l.b16 %v1604_v37 }
  0x8c   : > { %1313 = vmatmul.bf16.vlgmr.msra.gmra.mxu1 %v3278_v8  ;;  %1868 = vmatmul.bf16.vlgmr.msra.gmra.mxu0 %v1804_v48  ;;  %v1585_v8 = vrot.slane %v1584_v36, 4  ;;  %v1222_v48 = vrot.slane %v3267_v60, 5 }
  0x8e   : > { %1704 = vmatmul.bf16.gmra.mxu3 %v1632_v21  ;;  %v1590_v35 = vsel %vm2921_vm4, %v1585_v8, %v1589_v23  ;;  %v1223_v49 = vsel %vm2930_vm5, %v2400_v43, %v1222_v48 }
  0x8f   : > { %1458 = vmatmul.bf16.gmra.mxu2 %v2484_v14  ;;  %v1628_v54 = vunpack.c.l.b16 %v1590_v35  ;;  %v1248_v58 = vunpack.c.l.b16 %v1223_v49 }
  0x91   : > { %v1252_v18 = vpack.c.b16 %v1248_v58, %v1247_v45  ;;  %v1633_v60 = vpack.c.b16 %v1629_v55, %v1628_v54 }
  0x9c   : > { %1318 = vmatmul.bf16.gmra.mxu1 %v3317_v9  ;;  %1873 = vmatmul.bf16.gmra.mxu0 %v1805_v52  ;;  %v1770_v9 = vsel %vm2930_vm5, %v2598_v46, %v1769_v2 }
  0x9d   : > { %v1801_v39 = vunpack.c.l.b16 %v1770_v9 }
  0x9e   : > { %1709 = vmatmul.bf16.gmra.mxu3 %v1633_v60 }
  0x9f   : > { %1463 = vmatmul.bf16.gmra.mxu2 %v2488_v59  ;;  %v1806_v14 = vpack.c.b16 %v1801_v39, %v1800_v47 }
  0xa9   : > { %v499_v15 = vpop.f32.mrf.mxu1  ;;  %v489_v16 = vpop.f32.mrf.mxu0 }
  0xac   : > { %1323 = vmatmul.bf16.gmra.mxu1 %v3358_v20  ;;  %1878 = vmatmul.bf16.gmra.mxu0 %v1806_v14 }
  0xaf   : > { %1883 = vmatmul.bf16.vlgmr.msra.gmra.mxu2 %v1807_v17 }
  0xb1   : > { %v501_v19 = vpop.f32.mrf.mxu1  ;;  %v491_v21 = vpop.f32.mrf.mxu0 }
  0xb2   : > { %v759_v1 = vpop.f32.mrf.mxu2  ;;  %v894_v10 = vpop.f32.mrf.mxu3 }
  0xb9   : > { %v504_v32 = vpop.f32.mrf.mxu1  ;;  %v494_v57 = vpop.f32.mrf.mxu0 }
  0xba   : > { %v761_v24 = vpop.f32.mrf.mxu2  ;;  %v896_v36 = vpop.f32.mrf.mxu3 }
  0xbc   : > { %1328 = vmatmul.bf16.gmra.mxu1 %v1252_v18 }
  0xc1   : > { %v506_v26 = vpop.f32.mrf.mxu1  ;;  %v496_v30 = vpop.f32.mrf.mxu0 }
  0xc2   : > { %v764_v25 = vpop.f32.mrf.mxu2  ;;  %v3401_v7 = vpop.f32.mrf.mxu3 }
  0xc9   : > { %v590_v8 = vpop.f32.mrf.mxu1  ;;  %v1140_v23 = vpop.f32.mrf.mxu0 }
  0xca   : > { %v766_v22 = vpop.f32.mrf.mxu2  ;;  %v591_v20 = vadd.f32 %v590_v8, %v489_v16  ;;  %v3403_v12 = vpop.f32.mrf.mxu3 }
  0xcc   : > { %v779_v56 = vadd.f32 %v759_v1, %v591_v20 }
  0xce   : > { %v914_v39 = vadd.f32 %v894_v10, %v779_v56 }
  0xd0   : > { %v1160_v28 = vadd.f32 %v1140_v23, %v914_v39 }
  0xd1   : > { %v592_v34 = vpop.f32.mrf.mxu1  ;;  %v1142_v35 = vpop.f32.mrf.mxu0 }
  0xd2   : > { %v769_v31 = vpop.f32.mrf.mxu2  ;;  %v593_v37 = vadd.f32 %v592_v34, %v491_v21  ;;  %v3405_v40 = vpop.f32.mrf.mxu3 }
  0xd4   : > { %v780_v38 = vadd.f32 %v761_v24, %v593_v37 }
  0xd9   : > { %v595_v27 = vpop.f32.mrf.mxu1  ;;  %v1145_v43 = vpop.f32.mrf.mxu0 }
  0xda   : > { %v771_v41 = vpop.f32.mrf.mxu2  ;;  %v596_v48 = vadd.f32 %v595_v27, %v494_v57  ;;  %v3407_v52 = vpop.f32.mrf.mxu3 }
  0xdc   : > { %v781_v50 = vadd.f32 %v764_v25, %v596_v48 }
  0xe1   : > { %v597_v53 = vpop.f32.mrf.mxu1  ;;  %v1147_v49 = vpop.f32.mrf.mxu0 }
  0xe2   : > { %v774_v51 = vpop.f32.mrf.mxu2  ;;  %v598_v54 = vadd.f32 %v597_v53, %v496_v30  ;;  %v3411_v61 = vpop.f32.mrf.mxu3 }
  0xe4   : > { %v782_v55 = vadd.f32 %v766_v22, %v598_v54 }
  0xe6   : > { %v917_v37 = vadd.f32 %v3403_v12, %v782_v55 }
  0xe9   : > { %v600_v58 = vpop.f32.mrf.mxu1  ;;  %v3409_v59 = vpop.f32.mrf.mxu0 }
  0xea   : > { %v776_v45 = vpop.f32.mrf.mxu2  ;;  %v601_v42 = vadd.f32 %v600_v58, %v499_v15  ;;  %v3417_v46 = vpop.f32.mrf.mxu3 }
  0xec   : > { %v783_v18 = vadd.f32 %v769_v31, %v601_v42 }
  0xee   : > { %v918_v54 = vadd.f32 %v3405_v40, %v783_v18 }
  0xf1   : > { %v602_v63 = vpop.f32.mrf.mxu1  ;;  %v3413_v60 = vpop.f32.mrf.mxu0 }
  0xf2   : > { %v1449_v62 = vpop.f32.mrf.mxu2  ;;  %v603_v44 = vadd.f32 %v602_v63, %v501_v19  ;;  %v1695_v11 = vpop.f32.mrf.mxu3  ;;  %v915_v19 = vadd.f32 %v896_v36, %v780_v38  ;;  %v916_v36 = vadd.f32 %v3401_v7, %v781_v50  ;;  %v1163_v7 = vadd.f32 %v1147_v49, %v917_v37 }
  0xf4   : > { %v3415_v0 = vadd.f32 %v771_v41, %v603_v44  ;;  %v1161_v10 = vadd.f32 %v1142_v35, %v915_v19  ;;  %v1162_v20 = vadd.f32 %v1145_v43, %v916_v36 }
  0xf6   : > { %v919_v49 = vadd.f32 %v3407_v52, %v3415_v0 }
  0xf8   : > { %v1165_v40 = vadd.f32 %v3413_v60, %v919_v49 }
  0xf9   : > { %v605_v3 = vpop.f32.mrf.mxu1  ;;  %v3419_v4 = vpop.f32.mrf.mxu0 }
  0xfa   : > { %v1451_v2 = vpop.f32.mrf.mxu2  ;;  %v606_v6 = vadd.f32 %v605_v3, %v504_v32  ;;  %v1697_v14 = vpop.f32.mrf.mxu3 }
  0xfc   : > { %v3421_v33 = vadd.f32 %v774_v51, %v606_v6 }
 0x101   : > { %v607_v13 = vpop.f32.mrf.mxu1  ;;  %v3423_v29 = vpop.f32.mrf.mxu0 }
 0x102   : > { %v1454_v9 = vpop.f32.mrf.mxu2  ;;  %v608_v47 = vadd.f32 %v607_v13, %v506_v26  ;;  %v1700_v30 = vpop.f32.mrf.mxu3 }
 0x104   : > { %v3425_v5 = vadd.f32 %v776_v45, %v608_v47  ;;  %v920_v47 = vadd.f32 %v3411_v61, %v3421_v33 }
 0x106   : > { %v1166_v52 = vadd.f32 %v3419_v4, %v920_v47 }
 0x109   : > { %v1314_v15 = vpop.f32.mrf.mxu1  ;;  %v1869_v16 = vpop.f32.mrf.mxu0 }
 0x10a   : > { %v1334_v17 = vadd.f32 %v1314_v15, %v1160_v28  ;;  %v1456_v1 = vpop.f32.mrf.mxu2  ;;  %v1702_v41 = vpop.f32.mrf.mxu3 }
 0x10c   : > { %v1469_v21 = vadd.f32 %v1449_v62, %v1334_v17  ;;  %v1164_v62 = vadd.f32 %v3409_v59, %v918_v54  ;;  %v921_v17 = vadd.f32 %v3417_v46, %v3425_v5 }
 0x10e   : > { %v1715_v24 = vadd.f32 %v1695_v11, %v1469_v21  ;;  %v1167_v61 = vadd.f32 %v3423_v29, %v921_v17 }
 0x110   : > { %v3433_v32 = vadd.f32 %v1869_v16, %v1715_v24 }
 0x111   : > { %v1316_v57 = vpop.f32.mrf.mxu1  ;;  %v1871_v25 = vpop.f32.mrf.mxu0 }
 0x112   : > { %1897 = vst [vmem:[%s3431_s29] sm:$0xff] %v3433_v32  ;;  %v1335_v26 = vadd.f32 %v1316_v57, %v1161_v10  ;;  %v1459_v8 = vpop.f32.mrf.mxu2  ;;  %v1705_v42 = vpop.f32.mrf.mxu3 }
 0x114   : > { %v1470_v22 = vadd.f32 %v1451_v2, %v1335_v26 }
 0x116   : > { %v1716_v23 = vadd.f32 %v1697_v14, %v1470_v22 }
 0x118   : > { %v3438_v56 = vadd.f32 %v1871_v25, %v1716_v23 }
 0x119   : > { %v1319_v31 = vpop.f32.mrf.mxu1  ;;  %v1874_v34 = vpop.f32.mrf.mxu0 }
 0x11a   : > { %1898 = vst [vmem:[%s3431_s29 + $0x8] sm:$0xff] %v3438_v56  ;;  %v1336_v35 = vadd.f32 %v1319_v31, %v1162_v20  ;;  %v1461_v48 = vpop.f32.mrf.mxu2  ;;  %v1707_v11 = vpop.f32.mrf.mxu3 }
 0x11c   : > { %v1471_v38 = vadd.f32 %v1454_v9, %v1336_v35 }
 0x11e   : > { %v1717_v27 = vadd.f32 %v1700_v30, %v1471_v38 }
 0x120   : > { %v1891_v50 = vadd.f32 %v1874_v34, %v1717_v27 }
 0x121   : > { %v1321_v51 = vpop.f32.mrf.mxu1  ;;  %v1876_v53 = vpop.f32.mrf.mxu0 }
 0x122   : > { %1899 = vst [vmem:[%s3431_s29 + $0x10] sm:$0xff] %v1891_v50  ;;  %v1337_v43 = vadd.f32 %v1321_v51, %v1163_v7  ;;  %v1464_v55 = vpop.f32.mrf.mxu2  ;;  %v1710_v60 = vpop.f32.mrf.mxu3 }
 0x124   : > { %v1472_v45 = vadd.f32 %v1456_v1, %v1337_v43 }
 0x126   : > { %v1718_v58 = vadd.f32 %v1702_v41, %v1472_v45 }
 0x128   : > { %v1892_v12 = vadd.f32 %v1876_v53, %v1718_v58 }
 0x129   : > { %v1324_v63 = vpop.f32.mrf.mxu1  ;;  %v1879_v2 = vpop.f32.mrf.mxu0 }
 0x12a   : > { %1900 = vst [vmem:[%s3431_s29 + $0x18] sm:$0xff] %v1892_v12  ;;  %v1338_v44 = vadd.f32 %v1324_v63, %v1164_v62  ;;  %v1466_v59 = vpop.f32.mrf.mxu2  ;;  %v1712_v4 = vpop.f32.mrf.mxu3 }
 0x12c   : > { %v1473_v3 = vadd.f32 %v1459_v8, %v1338_v44 }
 0x12e   : > { %v1719_v6 = vadd.f32 %v1705_v42, %v1473_v3 }
 0x130   : > { %v1893_v18 = vadd.f32 %v1879_v2, %v1719_v6 }
 0x131   : > { %v1326_v9 = vpop.f32.mrf.mxu1  ;;  %v1881_v28 = vpop.f32.mrf.mxu0 }
 0x132   : > { %1901 = vst [vmem:[%s3431_s29 + $0x20] sm:$0xff] %v1893_v18  ;;  %v1339_v13 = vadd.f32 %v1326_v9, %v1165_v40  ;;  %v1884_v19 = vpop.f32.mrf.mxu2 }
 0x134   : > { %v1474_v39 = vadd.f32 %v1461_v48, %v1339_v13 }
 0x136   : > { %v1720_v14 = vadd.f32 %v1707_v11, %v1474_v39 }
 0x138   : > { %v1894_v0 = vadd.f32 %v1881_v28, %v1720_v14 }
 0x139   : > { %v1329_v15 = vpop.f32.mrf.mxu1 }
 0x13a   : > { %1902 = vst [vmem:[%s3431_s29 + $0x28] sm:$0xff] %v1894_v0  ;;  %v1340_v16 = vadd.f32 %v1329_v15, %v1166_v52  ;;  %v1886_v26 = vpop.f32.mrf.mxu2 }
 0x13c   : > { %v1475_v1 = vadd.f32 %v1464_v55, %v1340_v16 }
 0x13e   : > { %v1721_v21 = vadd.f32 %v1710_v60, %v1475_v1 }
 0x140   : > { %v1895_v33 = vadd.f32 %v1884_v19, %v1721_v21 }
 0x141   : > { %v1331_v24 = vpop.f32.mrf.mxu1 }
 0x142   : > { %1903 = vst [vmem:[%s3431_s29 + $0x30] sm:$0xff] %v1895_v33  ;;  %v1341_v10 = vadd.f32 %v1331_v24, %v1167_v61 }
 0x144   : > { %v1476_v57 = vadd.f32 %v1466_v59, %v1341_v10 }
 0x146   : > { %v1722_v25 = vadd.f32 %v1712_v4, %v1476_v57  ;;  %1908 = sbr.rel (%p2649_p5) target bundleno = 334 (0x14e), region = 32 }
 0x148   : > { %v1896_v30 = vadd.f32 %v1886_v26, %v1722_v25 }
 0x14a   : > { %1904 = vst [vmem:[%s3431_s29 + $0x38] sm:$0xff] %v1896_v30 }
 0x14b   : > { %v2805_v36 = vmov 0.0  }
 0x14c   : > { %1909 = vst [vmem:[%s3497_s3] sm:$0x1] %v2805_v36 }
 0x14d   : > { %1910 = vst [vmem:[%s3498_s4] sm:$0x1] %v2805_v36 }
 0x14e PF: > { %v1912_v46 = vadd.f32 %v3438_v56, %v3433_v32  ;;  %v1928_v29 = vmul.f32 %v3433_v32, %v3433_v32  ;;  %v1929_v5 = vmul.f32 %v3438_v56, %v3438_v56  ;;  %v1930_v22 = vmul.f32 %v1891_v50, %v1891_v50 }
 0x14f   : > { %v1931_v23 = vmul.f32 %v1892_v12, %v1892_v12  ;;  %v1932_v34 = vmul.f32 %v1893_v18, %v1893_v18  ;;  %v1933_v38 = vmul.f32 %v1894_v0, %v1894_v0  ;;  %v1934_v48 = vmul.f32 %v1895_v33, %v1895_v33 }
 0x150   : > { %v1913_v8 = vadd.f32 %v1912_v46, %v1891_v50  ;;  %v1936_v20 = vadd.f32 %v1929_v5, %v1928_v29  ;;  %v1935_v53 = vmul.f32 %v1896_v30, %v1896_v30 }
 0x152   : > { %v1914_v31 = vadd.f32 %v1913_v8, %v1892_v12  ;;  %v1937_v35 = vadd.f32 %v1936_v20, %v1930_v22 }
 0x153   : > { %v1911_v2 = vld [vmem:[%s3497_s3] sm:$0x1] }
 0x154   : > { %v1915_v37 = vadd.f32 %v1914_v31, %v1893_v18  ;;  %v1938_v41 = vadd.f32 %v1937_v35, %v1931_v23  ;;  %v1927_v6 = vld [vmem:[%s3498_s4] sm:$0x1] }
 0x156   : > { %v1916_v27 = vadd.f32 %v1915_v37, %v1894_v0  ;;  %v1939_v7 = vadd.f32 %v1938_v41, %v1932_v34 }
 0x158   : > { %v1917_v51 = vadd.f32 %v1916_v27, %v1895_v33  ;;  %v1940_v43 = vadd.f32 %v1939_v7, %v1933_v38 }
 0x15a   : > { %v1918_v32 = vadd.f32 %v1917_v51, %v1896_v30  ;;  %v1941_v54 = vadd.f32 %v1940_v43, %v1934_v48 }
 0x15c   : > { %v1919_v45 = vrot.slane %v1918_v32, 4  ;;  %v1942_v56 = vadd.f32 %v1941_v54, %v1935_v53 }
 0x15e   : > { %v1920_v58 = vadd.f32 %v1919_v45, %v1918_v32  ;;  %v1943_v50 = vrot.slane %v1942_v56, 4 }
 0x160   : > { %v1921_v42 = vrot.slane %v1920_v58, 2  ;;  %v1944_v62 = vadd.f32 %v1943_v50, %v1942_v56 }
 0x162   : > { %v1922_v12 = vadd.f32 %v1921_v42, %v1920_v58  ;;  %v1945_v55 = vrot.slane %v1944_v62, 2 }
 0x164   : > { %v1923_v63 = vrot.slane %v1922_v12, 1  ;;  %v1946_v44 = vadd.f32 %v1945_v55, %v1944_v62 }
 0x166   : > { %v1924_v49 = vadd.f32 %v1923_v63, %v1922_v12  ;;  %v1947_v3 = vrot.slane %v1946_v44, 1 }
 0x168   : > { %v1925_v40 = vadd.f32 %v1924_v49, %v1911_v2  ;;  %v1948_v18 = vadd.f32 %v1947_v3, %v1946_v44 }
 0x16a   : > { %1926 = vst [vmem:[%s3497_s3] sm:$0x1] %v1925_v40  ;;  %v1949_v11 = vadd.f32 %v1948_v18, %v1927_v6 }
 0x16c   : > { %1950 = vst [vmem:[%s3498_s4] sm:$0x1] %v1949_v11 }
 0x16d PF: > { %s15_s17 = sadd.s32 1, %s2803_s17   ;;  %s3503_s15 = smov %s2799_s16 }
 0x16e   : > { %p12_p6 = scmp.ge.s32.totalorder %s15_s17, 4   ;;  %s3504_s16 = smov %s3506_s18 }
 0x170   :  { %14 = sbr.rel (!%p12_p6) target bundleno = 2 (0x2), region = 99 }

</bundles_post_ra>
